<compile_context>
chip_gen: v7x
topology: tpu7x:2x2x1
jax: 0.10.0
libtpu: 0.0.40
codegen_flags: <defaults>
</compile_context>

<pallas_src>
import math

import jax
import jax.numpy as jnp
from jax.experimental import pallas as pl
from jax.experimental.pallas import tpu as pltpu

SMALL = 1e-16       # matches the reference code; only perturbs noise logits
TEMP = 0.1          # temperature passed to reparametrize_discrete(pi, 0.1)
N_SAMPLES = 10      # the hard-coded .repeat(10, 1, 1)
HIDDEN = 800        # mlp_mnist hidden width
LANE = 128
SUBLANE = 8
MAX_TB = 128        # batch-tile rows (128 keeps spill + v7x VMEM in check)


def _round_up(x, m):
    return ((x + m - 1) // m) * m


def _ceil_div(a, b):
    return -(-a // b)


def _softplus(x):
    return jnp.maximum(x, 0.0) + jnp.log(1.0 + jnp.exp(-jnp.abs(x)))


def _sigmoid(x):
    # saturating sigmoid via tanh (EUP); avoids exp overflow at TEMP=0.1
    return 0.5 * (jnp.tanh(0.5 * x) + 1.0)


# ----------------------------- fused kernel ----------------------------------

def _fused_kernel(x_ref, we1, be1, we2, be2, we3, be3,
                  a_ref, b_ref, tri_ref, uk_ref, eps_ref, logi_ref,
                  wd1, bd1, wd2, bd2, out_ref):
    kp = a_ref.shape[1]

    # ---- encoder f_theta: Linear(n_x,800)-ReLU-Linear(800,800)-ReLU-head ----
    xb = x_ref[...]                                                   # bf16
    h1 = jnp.maximum(
        jnp.dot(xb, we1[...], preferred_element_type=jnp.float32) + be1[...], 0.0)
    h2 = jnp.maximum(
        jnp.dot(h1.astype(jnp.bfloat16), we2[...],
                preferred_element_type=jnp.float32) + be2[...], 0.0)
    # fused mean/pre-sigma head: one (800, 2*KP) matmul, lane-aligned split
    head = jnp.dot(h2.astype(jnp.bfloat16), we3[...],
                   preferred_element_type=jnp.float32) + be3[...]
    mean_t = head[:, :kp]                                             # (TB, KP)
    sigma_t = _softplus(head[:, kp:])                                 # (TB, KP)

    # ---- IBP stick-breaking: pi = logit(exp(cumsum(log Kumaraswamy(a,b)))) ----
    a = _softplus(a_ref[...]) + 0.01                                  # (1, KP)
    b = _softplus(b_ref[...]) + 0.01                                  # (1, KP)
    u_k = uk_ref[...]                                                 # (TB, KP)
    # log v = log(1 - u^(1/b) + SMALL) / a ; never -inf because the inner
    # 1 - u^(1/b) + SMALL >= SMALL > 0 in f32.
    log_v = jnp.log(1.0 - jnp.exp(jnp.log(u_k + SMALL) / b) + SMALL) / a
    # cumsum over K via hoisted upper-triangular constant (bf16 MXU, tiny op)
    log_post = jnp.dot(log_v.astype(jnp.bfloat16), tri_ref[...],
                       preferred_element_type=jnp.float32)
    p = jnp.exp(log_post)
    pi = jnp.log(p / (1.0 - p + SMALL) + SMALL)       # exact torch logit() form

    # ---- sample-stacked reparameterization + decoder g_theta ----
    eps = eps_ref[...].astype(jnp.float32)                            # (G, TB, KP)
    logi = logi_ref[...].astype(jnp.float32)                          # (G, TB, KP)
    g, tb, _ = eps.shape
    t = mean_t[None] + sigma_t[None] * eps                            # Gaussian
    gamma = _sigmoid((pi[None] + logi) * (1.0 / TEMP))                # BinConcrete
    # NOTE: padded KP lanes of t/gamma/z carry garbage; correctness relies on
    # Wd1's padded rows being exactly zero (enforced in the wrapper padding).
    z = (t * gamma).astype(jnp.bfloat16).reshape(g * tb, kp)
    h = jnp.maximum(
        jnp.dot(z, wd1[...], preferred_element_type=jnp.float32) + bd1[...], 0.0)
    logits = jnp.dot(h.astype(jnp.bfloat16), wd2[...],
                     preferred_element_type=jnp.float32) + bd2[...]
    out_ref[...] = logits.astype(out_ref.dtype).reshape(g, tb, out_ref.shape[2])


# ----------------------------- model ----------------------------------------

def init_params(key, n_x, K, n_y, a_prior=5.0, b_prior=1.0):
    keys = jax.random.split(key, 10)

    def linear(kw, kb, fan_in, fan_out):
        bound = 1.0 / math.sqrt(fan_in)
        W = jax.random.uniform(kw, (fan_in, fan_out), jnp.float32, -bound, bound)
        b = jax.random.uniform(kb, (1, fan_out), jnp.float32, -bound, bound)
        return W, b

    We1, be1 = linear(keys[0], keys[1], n_x, HIDDEN)
    We2, be2 = linear(keys[2], keys[3], HIDDEN, HIDDEN)
    We3, be3 = linear(keys[4], keys[5], HIDDEN, 2 * K)
    Wd1, bd1 = linear(keys[6], keys[7], K, HIDDEN)
    Wd2, bd2 = linear(keys[8], keys[9], HIDDEN, n_y)

    a_val = math.log(math.exp(a_prior) - 1.0)
    b_val = math.log(math.exp(b_prior) - 1.0)
    a_param = jnp.full((1, K), a_val, jnp.float32)
    b_param = jnp.full((1, K), b_val, jnp.float32)

    return dict(We1=We1, be1=be1, We2=We2, be2=be2, We3=We3, be3=be3,
                Wd1=Wd1, bd1=bd1, Wd2=Wd2, bd2=bd2, a=a_param, b=b_param)


def nlib_forward(params, x, noise_key):
    """Forward pass of nlIB_network (IBP / mlp_mnist). Returns (10, B, n_y) logits."""
    B, n_x = x.shape
    K = params["a"].shape[1]
    n_y = params["bd2"].shape[1]

    KP = _round_up(K, LANE)                      # lane-padded bottleneck width
    NYP = _round_up(n_y, LANE)                   # lane-padded class width

    # Adaptive batch tiling: multiple of 8, <= MAX_TB, >= 2 grid steps when the
    # batch allows (v7x megacore + DMA/compute pipelining), minimal pad waste.
    min_tiles = 2 if B > SUBLANE else 1
    n_tiles = max(min_tiles, _ceil_div(B, MAX_TB))
    TB = _round_up(_ceil_div(B, n_tiles), SUBLANE)
    n_tiles = _ceil_div(B, TB)
    B_pad = TB * n_tiles

    # --- parameter prep: lane-padded heads, bf16 MXU weights, f32 biases ---
    def padw(w, r, c):
        return jnp.pad(w, ((0, r - w.shape[0]), (0, c - w.shape[1]))).astype(jnp.bfloat16)

    def padb(bv, c):
        return jnp.pad(bv, ((0, 0), (0, c - bv.shape[1]))).astype(jnp.float32)

    we1 = params["We1"].astype(jnp.bfloat16)
    be1 = params["be1"].astype(jnp.float32)
    we2 = params["We2"].astype(jnp.bfloat16)
    be2 = params["be2"].astype(jnp.float32)
    # fused head: [mean | pre-sigma], each lane-padded to KP
    we3 = jnp.concatenate([padw(params["We3"][:, :K], HIDDEN, KP),
                           padw(params["We3"][:, K:], HIDDEN, KP)], axis=1)
    be3 = jnp.concatenate([padb(params["be3"][:, :K], KP),
                           padb(params["be3"][:, K:], KP)], axis=1)
    a_p = padb(params["a"], KP)
    b_p = padb(params["b"], KP)
    # Wd1 padded rows >= K MUST stay exactly zero (kills garbage in padded z lanes).
    wd1 = padw(params["Wd1"], KP, HIDDEN)
    bd1 = params["bd1"].astype(jnp.float32)
    wd2 = padw(params["Wd2"], HIDDEN, NYP)
    bd2 = padb(params["bd2"], NYP)

    # hoisted upper-triangular cumsum mask (incl. diagonal), constant input
    tri = jnp.triu(jnp.ones((KP, KP), jnp.float32)).astype(jnp.bfloat16)

    x_p = jnp.pad(x.astype(jnp.float32), ((0, B_pad - B), (0, 0))).astype(jnp.bfloat16)

    # --- host-side noise (no in-kernel PRNG: interpret-mode portable) ---
    k_eps, k_logi, k_uk = jax.random.split(noise_key, 3)
    eps = jax.random.normal(k_eps, (N_SAMPLES, B_pad, KP), jnp.float32).astype(jnp.bfloat16)
    logi = jax.random.logistic(k_logi, (N_SAMPLES, B_pad, KP), jnp.float32).astype(jnp.bfloat16)
    u_k = jax.random.uniform(k_uk, (B_pad, KP), jnp.float32)

    grid = (n_tiles,)

    out = pl.pallas_call(
        _fused_kernel,
        out_shape=jax.ShapeDtypeStruct((N_SAMPLES, B_pad, NYP), jnp.bfloat16),
        grid_spec=pltpu.PrefetchScalarGridSpec(
            num_scalar_prefetch=0,
            grid=grid,
            in_specs=[
                pl.BlockSpec((TB, n_x), lambda i: (i, 0)),               # x
                pl.BlockSpec((n_x, HIDDEN), lambda i: (0, 0)),           # We1
                pl.BlockSpec((1, HIDDEN), lambda i: (0, 0)),             # be1
                pl.BlockSpec((HIDDEN, HIDDEN), lambda i: (0, 0)),        # We2
                pl.BlockSpec((1, HIDDEN), lambda i: (0, 0)),             # be2
                pl.BlockSpec((HIDDEN, 2 * KP), lambda i: (0, 0)),        # We3 fused
                pl.BlockSpec((1, 2 * KP), lambda i: (0, 0)),             # be3 fused
                pl.BlockSpec((1, KP), lambda i: (0, 0)),                 # a
                pl.BlockSpec((1, KP), lambda i: (0, 0)),                 # b
                pl.BlockSpec((KP, KP), lambda i: (0, 0)),                # tri
                pl.BlockSpec((TB, KP), lambda i: (i, 0)),                # u_k
                pl.BlockSpec((N_SAMPLES, TB, KP), lambda i: (0, i, 0)),  # eps
                pl.BlockSpec((N_SAMPLES, TB, KP), lambda i: (0, i, 0)),  # logistic
                pl.BlockSpec((KP, HIDDEN), lambda i: (0, 0)),            # Wd1
                pl.BlockSpec((1, HIDDEN), lambda i: (0, 0)),             # bd1
                pl.BlockSpec((HIDDEN, NYP), lambda i: (0, 0)),           # Wd2
                pl.BlockSpec((1, NYP), lambda i: (0, 0)),                # bd2
            ],
            out_specs=pl.BlockSpec((N_SAMPLES, TB, NYP), lambda i: (0, i, 0)),
        ),
        compiler_params=pltpu.CompilerParams(
            dimension_semantics=("parallel",),
            vmem_limit_bytes=48 << 20),
    )(x_p, we1, be1, we2, be2, we3, be3, a_p, b_p, tri, u_k, eps, logi,
      wd1, bd1, wd2, bd2)

    return out[:, :B, :n_y].astype(jnp.float32)


# ----------------------------- main ------------------------------------------

if __name__ == "__main__":
    key = jax.random.PRNGKey(0)
    kp_, kx, kn = jax.random.split(key, 3)

    B, n_x, K, n_y = 4, 32, 8, 10
    params = init_params(kp_, n_x, K, n_y, a_prior=5.0, b_prior=1.0)
    x = jax.random.normal(kx, (B, n_x), jnp.float32)

    logits = jax.jit(nlib_forward)(params, x, kn)
    logits = jax.block_until_ready(logits)

    assert logits.shape == (N_SAMPLES, B, n_y), logits.shape
    assert bool(jnp.all(jnp.isfinite(logits)))
    print("KERNEL_OK")
</pallas_src>

<mosaic_0001>
module attributes {stable_mosaic.version = 11 : i64} {
  func.func @_fused_kernel(%arg0: i32, %arg1: memref<8x32xbf16, #tpu.memory_space<vmem>>, %arg2: memref<32x800xbf16, #tpu.memory_space<vmem>>, %arg3: memref<1x800xf32, #tpu.memory_space<vmem>>, %arg4: memref<800x800xbf16, #tpu.memory_space<vmem>>, %arg5: memref<1x800xf32, #tpu.memory_space<vmem>>, %arg6: memref<800x256xbf16, #tpu.memory_space<vmem>>, %arg7: memref<1x256xf32, #tpu.memory_space<vmem>>, %arg8: memref<1x128xf32, #tpu.memory_space<vmem>>, %arg9: memref<1x128xf32, #tpu.memory_space<vmem>>, %arg10: memref<128x128xbf16, #tpu.memory_space<vmem>>, %arg11: memref<8x128xf32, #tpu.memory_space<vmem>>, %arg12: memref<10x8x128xbf16, #tpu.memory_space<vmem>>, %arg13: memref<10x8x128xbf16, #tpu.memory_space<vmem>>, %arg14: memref<128x800xbf16, #tpu.memory_space<vmem>>, %arg15: memref<1x800xf32, #tpu.memory_space<vmem>>, %arg16: memref<800x128xbf16, #tpu.memory_space<vmem>>, %arg17: memref<1x128xf32, #tpu.memory_space<vmem>>, %arg18: memref<10x8x128xbf16, #tpu.memory_space<vmem>>) attributes {dimension_semantics = [#tpu.dimension_semantics<parallel>], iteration_bounds = array<i64: 1>, scalar_prefetch = 0 : i64, scratch_operands = 0 : i64, tpu.core_type = #tpu.core_type<tc>, window_params = [{transform_indices = @transform_0, window_bounds = array<i64: 8, 32>}, {pipeline_mode = #tpu.pipeline_mode<synchronous>, transform_indices = @transform_1, window_bounds = array<i64: 32, 800>}, {pipeline_mode = #tpu.pipeline_mode<synchronous>, transform_indices = @transform_2, window_bounds = array<i64: 1, 800>}, {pipeline_mode = #tpu.pipeline_mode<synchronous>, transform_indices = @transform_3, window_bounds = array<i64: 800, 800>}, {pipeline_mode = #tpu.pipeline_mode<synchronous>, transform_indices = @transform_4, window_bounds = array<i64: 1, 800>}, {pipeline_mode = #tpu.pipeline_mode<synchronous>, transform_indices = @transform_5, window_bounds = array<i64: 800, 256>}, {pipeline_mode = #tpu.pipeline_mode<synchronous>, transform_indices = @transform_6, window_bounds = array<i64: 1, 256>}, {pipeline_mode = #tpu.pipeline_mode<synchronous>, transform_indices = @transform_7, window_bounds = array<i64: 1, 128>}, {pipeline_mode = #tpu.pipeline_mode<synchronous>, transform_indices = @transform_8, window_bounds = array<i64: 1, 128>}, {pipeline_mode = #tpu.pipeline_mode<synchronous>, transform_indices = @transform_9, window_bounds = array<i64: 128, 128>}, {transform_indices = @transform_10, window_bounds = array<i64: 8, 128>}, {transform_indices = @transform_11, window_bounds = array<i64: 10, 8, 128>}, {transform_indices = @transform_12, window_bounds = array<i64: 10, 8, 128>}, {pipeline_mode = #tpu.pipeline_mode<synchronous>, transform_indices = @transform_13, window_bounds = array<i64: 128, 800>}, {pipeline_mode = #tpu.pipeline_mode<synchronous>, transform_indices = @transform_14, window_bounds = array<i64: 1, 800>}, {pipeline_mode = #tpu.pipeline_mode<synchronous>, transform_indices = @transform_15, window_bounds = array<i64: 800, 128>}, {pipeline_mode = #tpu.pipeline_mode<synchronous>, transform_indices = @transform_16, window_bounds = array<i64: 1, 128>}, {transform_indices = @transform_17, window_bounds = array<i64: 10, 8, 128>}]} {
    %c0 = arith.constant 0 : index
    %c0_0 = arith.constant 0 : index
    %0 = vector.load %arg1[%c0, %c0_0] : memref<8x32xbf16, #tpu.memory_space<vmem>>, vector<8x32xbf16>
    %c0_1 = arith.constant 0 : index
    %c0_2 = arith.constant 0 : index
    %1 = vector.load %arg2[%c0_1, %c0_2] : memref<32x800xbf16, #tpu.memory_space<vmem>>, vector<32x800xbf16>
    %cst = arith.constant dense<0.000000e+00> : vector<8x800xf32>
    %2 = tpu.matmul %0, %1, %cst {dimension_numbers = #tpu.dot_dimension_numbers<[1], [0], [0], [1], [0, 0, 1, 1], [], []>} : vector<8x32xbf16>, vector<32x800xbf16>, vector<8x800xf32> -> vector<8x800xf32>
    %c0_3 = arith.constant 0 : index
    %c0_4 = arith.constant 0 : index
    %3 = vector.load %arg3[%c0_3, %c0_4] : memref<1x800xf32, #tpu.memory_space<vmem>>, vector<1x800xf32>
    %4 = vector.broadcast %3 : vector<1x800xf32> to vector<8x800xf32>
    %5 = arith.addf %2, %4 : vector<8x800xf32>
    %cst_5 = arith.constant 0.000000e+00 : f32
    %6 = vector.broadcast %cst_5 : f32 to vector<8x800xf32>
    %7 = arith.maximumf %5, %6 : vector<8x800xf32>
    %8 = arith.truncf %7 : vector<8x800xf32> to vector<8x800xbf16>
    %c0_6 = arith.constant 0 : index
    %c0_7 = arith.constant 0 : index
    %9 = vector.load %arg4[%c0_6, %c0_7] : memref<800x800xbf16, #tpu.memory_space<vmem>>, vector<800x800xbf16>
    %cst_8 = arith.constant dense<0.000000e+00> : vector<8x800xf32>
    %10 = tpu.matmul %8, %9, %cst_8 {dimension_numbers = #tpu.dot_dimension_numbers<[1], [0], [0], [1], [0, 0, 1, 1], [], []>} : vector<8x800xbf16>, vector<800x800xbf16>, vector<8x800xf32> -> vector<8x800xf32>
    %c0_9 = arith.constant 0 : index
    %c0_10 = arith.constant 0 : index
    %11 = vector.load %arg5[%c0_9, %c0_10] : memref<1x800xf32, #tpu.memory_space<vmem>>, vector<1x800xf32>
    %12 = vector.broadcast %11 : vector<1x800xf32> to vector<8x800xf32>
    %13 = arith.addf %10, %12 : vector<8x800xf32>
    %cst_11 = arith.constant 0.000000e+00 : f32
    %14 = vector.broadcast %cst_11 : f32 to vector<8x800xf32>
    %15 = arith.maximumf %13, %14 : vector<8x800xf32>
    %16 = arith.truncf %15 : vector<8x800xf32> to vector<8x800xbf16>
    %c0_12 = arith.constant 0 : index
    %c0_13 = arith.constant 0 : index
    %17 = vector.load %arg6[%c0_12, %c0_13] : memref<800x256xbf16, #tpu.memory_space<vmem>>, vector<800x256xbf16>
    %cst_14 = arith.constant dense<0.000000e+00> : vector<8x256xf32>
    %18 = tpu.matmul %16, %17, %cst_14 {dimension_numbers = #tpu.dot_dimension_numbers<[1], [0], [0], [1], [0, 0, 1, 1], [], []>} : vector<8x800xbf16>, vector<800x256xbf16>, vector<8x256xf32> -> vector<8x256xf32>
    %c0_15 = arith.constant 0 : index
    %c0_16 = arith.constant 0 : index
    %19 = vector.load %arg7[%c0_15, %c0_16] : memref<1x256xf32, #tpu.memory_space<vmem>>, vector<1x256xf32>
    %20 = vector.broadcast %19 : vector<1x256xf32> to vector<8x256xf32>
    %21 = arith.addf %18, %20 : vector<8x256xf32>
    %22 = vector.extract_strided_slice %21 {offsets = [0, 0], sizes = [8, 128], strides = [1, 1]} : vector<8x256xf32> to vector<8x128xf32>
    %23 = vector.extract_strided_slice %21 {offsets = [0, 128], sizes = [8, 128], strides = [1, 1]} : vector<8x256xf32> to vector<8x128xf32>
    %cst_17 = arith.constant 0.000000e+00 : f32
    %24 = vector.broadcast %cst_17 : f32 to vector<8x128xf32>
    %25 = arith.maximumf %23, %24 : vector<8x128xf32>
    %26 = math.absf %23 : vector<8x128xf32>
    %cst_18 = arith.constant 0.000000e+00 : f32
    %27 = vector.broadcast %cst_18 : f32 to vector<8x128xf32>
    %28 = arith.subf %27, %26 : vector<8x128xf32>
    %29 = math.exp %28 : vector<8x128xf32>
    %cst_19 = arith.constant 1.000000e+00 : f32
    %30 = vector.broadcast %cst_19 : f32 to vector<8x128xf32>
    %31 = arith.addf %30, %29 : vector<8x128xf32>
    %32 = math.log %31 : vector<8x128xf32>
    %33 = arith.addf %25, %32 : vector<8x128xf32>
    %c0_20 = arith.constant 0 : index
    %c0_21 = arith.constant 0 : index
    %34 = vector.load %arg8[%c0_20, %c0_21] : memref<1x128xf32, #tpu.memory_space<vmem>>, vector<1x128xf32>
    %cst_22 = arith.constant 0.000000e+00 : f32
    %35 = vector.broadcast %cst_22 : f32 to vector<1x128xf32>
    %36 = arith.maximumf %34, %35 : vector<1x128xf32>
    %37 = math.absf %34 : vector<1x128xf32>
    %cst_23 = arith.constant 0.000000e+00 : f32
    %38 = vector.broadcast %cst_23 : f32 to vector<1x128xf32>
    %39 = arith.subf %38, %37 : vector<1x128xf32>
    %40 = math.exp %39 : vector<1x128xf32>
    %cst_24 = arith.constant 1.000000e+00 : f32
    %41 = vector.broadcast %cst_24 : f32 to vector<1x128xf32>
    %42 = arith.addf %41, %40 : vector<1x128xf32>
    %43 = math.log %42 : vector<1x128xf32>
    %44 = arith.addf %36, %43 : vector<1x128xf32>
    %cst_25 = arith.constant 0.00999999977 : f32
    %45 = vector.broadcast %cst_25 : f32 to vector<1x128xf32>
    %46 = arith.addf %44, %45 : vector<1x128xf32>
    %c0_26 = arith.constant 0 : index
    %c0_27 = arith.constant 0 : index
    %47 = vector.load %arg9[%c0_26, %c0_27] : memref<1x128xf32, #tpu.memory_space<vmem>>, vector<1x128xf32>
    %cst_28 = arith.constant 0.000000e+00 : f32
    %48 = vector.broadcast %cst_28 : f32 to vector<1x128xf32>
    %49 = arith.maximumf %47, %48 : vector<1x128xf32>
    %50 = math.absf %47 : vector<1x128xf32>
    %cst_29 = arith.constant 0.000000e+00 : f32
    %51 = vector.broadcast %cst_29 : f32 to vector<1x128xf32>
    %52 = arith.subf %51, %50 : vector<1x128xf32>
    %53 = math.exp %52 : vector<1x128xf32>
    %cst_30 = arith.constant 1.000000e+00 : f32
    %54 = vector.broadcast %cst_30 : f32 to vector<1x128xf32>
    %55 = arith.addf %54, %53 : vector<1x128xf32>
    %56 = math.log %55 : vector<1x128xf32>
    %57 = arith.addf %49, %56 : vector<1x128xf32>
    %cst_31 = arith.constant 0.00999999977 : f32
    %58 = vector.broadcast %cst_31 : f32 to vector<1x128xf32>
    %59 = arith.addf %57, %58 : vector<1x128xf32>
    %c0_32 = arith.constant 0 : index
    %c0_33 = arith.constant 0 : index
    %60 = vector.load %arg11[%c0_32, %c0_33] : memref<8x128xf32, #tpu.memory_space<vmem>>, vector<8x128xf32>
    %cst_34 = arith.constant 1.000000e-16 : f32
    %61 = vector.broadcast %cst_34 : f32 to vector<8x128xf32>
    %62 = arith.addf %60, %61 : vector<8x128xf32>
    %63 = math.log %62 : vector<8x128xf32>
    %64 = vector.broadcast %59 : vector<1x128xf32> to vector<8x128xf32>
    %65 = arith.divf %63, %64 : vector<8x128xf32>
    %66 = math.exp %65 : vector<8x128xf32>
    %cst_35 = arith.constant 1.000000e+00 : f32
    %67 = vector.broadcast %cst_35 : f32 to vector<8x128xf32>
    %68 = arith.subf %67, %66 : vector<8x128xf32>
    %cst_36 = arith.constant 1.000000e-16 : f32
    %69 = vector.broadcast %cst_36 : f32 to vector<8x128xf32>
    %70 = arith.addf %68, %69 : vector<8x128xf32>
    %71 = math.log %70 : vector<8x128xf32>
    %72 = vector.broadcast %46 : vector<1x128xf32> to vector<8x128xf32>
    %73 = arith.divf %71, %72 : vector<8x128xf32>
    %74 = arith.truncf %73 : vector<8x128xf32> to vector<8x128xbf16>
    %c0_37 = arith.constant 0 : index
    %c0_38 = arith.constant 0 : index
    %75 = vector.load %arg10[%c0_37, %c0_38] : memref<128x128xbf16, #tpu.memory_space<vmem>>, vector<128x128xbf16>
    %cst_39 = arith.constant dense<0.000000e+00> : vector<8x128xf32>
    %76 = tpu.matmul %74, %75, %cst_39 {dimension_numbers = #tpu.dot_dimension_numbers<[1], [0], [0], [1], [0, 0, 1, 1], [], []>} : vector<8x128xbf16>, vector<128x128xbf16>, vector<8x128xf32> -> vector<8x128xf32>
    %77 = math.exp %76 : vector<8x128xf32>
    %cst_40 = arith.constant 1.000000e+00 : f32
    %78 = vector.broadcast %cst_40 : f32 to vector<8x128xf32>
    %79 = arith.subf %78, %77 : vector<8x128xf32>
    %cst_41 = arith.constant 1.000000e-16 : f32
    %80 = vector.broadcast %cst_41 : f32 to vector<8x128xf32>
    %81 = arith.addf %79, %80 : vector<8x128xf32>
    %82 = arith.divf %77, %81 : vector<8x128xf32>
    %cst_42 = arith.constant 1.000000e-16 : f32
    %83 = vector.broadcast %cst_42 : f32 to vector<8x128xf32>
    %84 = arith.addf %82, %83 : vector<8x128xf32>
    %85 = math.log %84 : vector<8x128xf32>
    %c0_43 = arith.constant 0 : index
    %c0_44 = arith.constant 0 : index
    %c0_45 = arith.constant 0 : index
    %86 = vector.load %arg12[%c0_43, %c0_44, %c0_45] : memref<10x8x128xbf16, #tpu.memory_space<vmem>>, vector<10x8x128xbf16>
    %87 = arith.extf %86 : vector<10x8x128xbf16> to vector<10x8x128xf32>
    %c0_46 = arith.constant 0 : index
    %c0_47 = arith.constant 0 : index
    %c0_48 = arith.constant 0 : index
    %88 = vector.load %arg13[%c0_46, %c0_47, %c0_48] : memref<10x8x128xbf16, #tpu.memory_space<vmem>>, vector<10x8x128xbf16>
    %89 = arith.extf %88 : vector<10x8x128xbf16> to vector<10x8x128xf32>
    %90 = vector.shape_cast %22 : vector<8x128xf32> to vector<1x8x128xf32>
    %91 = vector.shape_cast %33 : vector<8x128xf32> to vector<1x8x128xf32>
    %92 = vector.broadcast %91 : vector<1x8x128xf32> to vector<10x8x128xf32>
    %93 = arith.mulf %92, %87 : vector<10x8x128xf32>
    %94 = vector.broadcast %90 : vector<1x8x128xf32> to vector<10x8x128xf32>
    %95 = arith.addf %94, %93 : vector<10x8x128xf32>
    %96 = vector.shape_cast %85 : vector<8x128xf32> to vector<1x8x128xf32>
    %97 = vector.broadcast %96 : vector<1x8x128xf32> to vector<10x8x128xf32>
    %98 = arith.addf %97, %89 : vector<10x8x128xf32>
    %cst_49 = arith.constant 1.000000e+01 : f32
    %99 = vector.broadcast %cst_49 : f32 to vector<10x8x128xf32>
    %100 = arith.mulf %98, %99 : vector<10x8x128xf32>
    %cst_50 = arith.constant 5.000000e-01 : f32
    %101 = vector.broadcast %cst_50 : f32 to vector<10x8x128xf32>
    %102 = arith.mulf %101, %100 : vector<10x8x128xf32>
    %103 = math.tanh %102 : vector<10x8x128xf32>
    %cst_51 = arith.constant 1.000000e+00 : f32
    %104 = vector.broadcast %cst_51 : f32 to vector<10x8x128xf32>
    %105 = arith.addf %103, %104 : vector<10x8x128xf32>
    %cst_52 = arith.constant 5.000000e-01 : f32
    %106 = vector.broadcast %cst_52 : f32 to vector<10x8x128xf32>
    %107 = arith.mulf %106, %105 : vector<10x8x128xf32>
    %108 = arith.mulf %95, %107 : vector<10x8x128xf32>
    %109 = arith.truncf %108 : vector<10x8x128xf32> to vector<10x8x128xbf16>
    %110 = vector.shape_cast %109 : vector<10x8x128xbf16> to vector<80x128xbf16>
    %c0_53 = arith.constant 0 : index
    %c0_54 = arith.constant 0 : index
    %111 = vector.load %arg14[%c0_53, %c0_54] : memref<128x800xbf16, #tpu.memory_space<vmem>>, vector<128x800xbf16>
    %cst_55 = arith.constant dense<0.000000e+00> : vector<80x800xf32>
    %112 = tpu.matmul %110, %111, %cst_55 {dimension_numbers = #tpu.dot_dimension_numbers<[1], [0], [0], [1], [0, 0, 1, 1], [], []>} : vector<80x128xbf16>, vector<128x800xbf16>, vector<80x800xf32> -> vector<80x800xf32>
    %c0_56 = arith.constant 0 : index
    %c0_57 = arith.constant 0 : index
    %113 = vector.load %arg15[%c0_56, %c0_57] : memref<1x800xf32, #tpu.memory_space<vmem>>, vector<1x800xf32>
    %114 = vector.broadcast %113 : vector<1x800xf32> to vector<80x800xf32>
    %115 = arith.addf %112, %114 : vector<80x800xf32>
    %cst_58 = arith.constant 0.000000e+00 : f32
    %116 = vector.broadcast %cst_58 : f32 to vector<80x800xf32>
    %117 = arith.maximumf %115, %116 : vector<80x800xf32>
    %118 = arith.truncf %117 : vector<80x800xf32> to vector<80x800xbf16>
    %c0_59 = arith.constant 0 : index
    %c0_60 = arith.constant 0 : index
    %119 = vector.load %arg16[%c0_59, %c0_60] : memref<800x128xbf16, #tpu.memory_space<vmem>>, vector<800x128xbf16>
    %cst_61 = arith.constant dense<0.000000e+00> : vector<80x128xf32>
    %120 = tpu.matmul %118, %119, %cst_61 {dimension_numbers = #tpu.dot_dimension_numbers<[1], [0], [0], [1], [0, 0, 1, 1], [], []>} : vector<80x800xbf16>, vector<800x128xbf16>, vector<80x128xf32> -> vector<80x128xf32>
    %c0_62 = arith.constant 0 : index
    %c0_63 = arith.constant 0 : index
    %121 = vector.load %arg17[%c0_62, %c0_63] : memref<1x128xf32, #tpu.memory_space<vmem>>, vector<1x128xf32>
    %122 = vector.broadcast %121 : vector<1x128xf32> to vector<80x128xf32>
    %123 = arith.addf %120, %122 : vector<80x128xf32>
    %124 = arith.truncf %123 : vector<80x128xf32> to vector<80x128xbf16>
    %125 = vector.shape_cast %124 : vector<80x128xbf16> to vector<10x8x128xbf16>
    %c0_64 = arith.constant 0 : index
    %c0_65 = arith.constant 0 : index
    %c0_66 = arith.constant 0 : index
    %126 = vector.load %arg18[%c0_64, %c0_65, %c0_66] : memref<10x8x128xbf16, #tpu.memory_space<vmem>>, vector<10x8x128xbf16>
    tpu.vector_store %arg18[%c0_64, %c0_65, %c0_66], %125 {strides = array<i32>} : memref<10x8x128xbf16, #tpu.memory_space<vmem>>, vector<10x8x128xbf16>,
    return
  }
  func.func @transform_0(%arg0: i32) -> (i32, i32) {
    %c0_i32 = arith.constant 0 : i32
    %c0_i32_0 = arith.constant 0 : i32
    return %arg0, %c0_i32 : i32, i32
  }
  func.func @transform_1(%arg0: i32) -> (i32, i32) {
    %c0_i32 = arith.constant 0 : i32
    %c0_i32_0 = arith.constant 0 : i32
    %c0_i32_1 = arith.constant 0 : i32
    return %c0_i32, %c0_i32_0 : i32, i32
  }
  func.func @transform_2(%arg0: i32) -> (i32, i32) {
    %c0_i32 = arith.constant 0 : i32
    %c0_i32_0 = arith.constant 0 : i32
    %c0_i32_1 = arith.constant 0 : i32
    return %c0_i32, %c0_i32_0 : i32, i32
  }
  func.func @transform_3(%arg0: i32) -> (i32, i32) {
    %c0_i32 = arith.constant 0 : i32
    %c0_i32_0 = arith.constant 0 : i32
    %c0_i32_1 = arith.constant 0 : i32
    return %c0_i32, %c0_i32_0 : i32, i32
  }
  func.func @transform_4(%arg0: i32) -> (i32, i32) {
    %c0_i32 = arith.constant 0 : i32
    %c0_i32_0 = arith.constant 0 : i32
    %c0_i32_1 = arith.constant 0 : i32
    return %c0_i32, %c0_i32_0 : i32, i32
  }
  func.func @transform_5(%arg0: i32) -> (i32, i32) {
    %c0_i32 = arith.constant 0 : i32
    %c0_i32_0 = arith.constant 0 : i32
    %c0_i32_1 = arith.constant 0 : i32
    return %c0_i32, %c0_i32_0 : i32, i32
  }
  func.func @transform_6(%arg0: i32) -> (i32, i32) {
    %c0_i32 = arith.constant 0 : i32
    %c0_i32_0 = arith.constant 0 : i32
    %c0_i32_1 = arith.constant 0 : i32
    return %c0_i32, %c0_i32_0 : i32, i32
  }
  func.func @transform_7(%arg0: i32) -> (i32, i32) {
    %c0_i32 = arith.constant 0 : i32
    %c0_i32_0 = arith.constant 0 : i32
    %c0_i32_1 = arith.constant 0 : i32
    return %c0_i32, %c0_i32_0 : i32, i32
  }
  func.func @transform_8(%arg0: i32) -> (i32, i32) {
    %c0_i32 = arith.constant 0 : i32
    %c0_i32_0 = arith.constant 0 : i32
    %c0_i32_1 = arith.constant 0 : i32
    return %c0_i32, %c0_i32_0 : i32, i32
  }
  func.func @transform_9(%arg0: i32) -> (i32, i32) {
    %c0_i32 = arith.constant 0 : i32
    %c0_i32_0 = arith.constant 0 : i32
    %c0_i32_1 = arith.constant 0 : i32
    return %c0_i32, %c0_i32_0 : i32, i32
  }
  func.func @transform_10(%arg0: i32) -> (i32, i32) {
    %c0_i32 = arith.constant 0 : i32
    %c0_i32_0 = arith.constant 0 : i32
    return %arg0, %c0_i32 : i32, i32
  }
  func.func @transform_11(%arg0: i32) -> (i32, i32, i32) {
    %c0_i32 = arith.constant 0 : i32
    %c0_i32_0 = arith.constant 0 : i32
    %c0_i32_1 = arith.constant 0 : i32
    return %c0_i32, %arg0, %c0_i32_0 : i32, i32, i32
  }
  func.func @transform_12(%arg0: i32) -> (i32, i32, i32) {
    %c0_i32 = arith.constant 0 : i32
    %c0_i32_0 = arith.constant 0 : i32
    %c0_i32_1 = arith.constant 0 : i32
    return %c0_i32, %arg0, %c0_i32_0 : i32, i32, i32
  }
  func.func @transform_13(%arg0: i32) -> (i32, i32) {
    %c0_i32 = arith.constant 0 : i32
    %c0_i32_0 = arith.constant 0 : i32
    %c0_i32_1 = arith.constant 0 : i32
    return %c0_i32, %c0_i32_0 : i32, i32
  }
  func.func @transform_14(%arg0: i32) -> (i32, i32) {
    %c0_i32 = arith.constant 0 : i32
    %c0_i32_0 = arith.constant 0 : i32
    %c0_i32_1 = arith.constant 0 : i32
    return %c0_i32, %c0_i32_0 : i32, i32
  }
  func.func @transform_15(%arg0: i32) -> (i32, i32) {
    %c0_i32 = arith.constant 0 : i32
    %c0_i32_0 = arith.constant 0 : i32
    %c0_i32_1 = arith.constant 0 : i32
    return %c0_i32, %c0_i32_0 : i32, i32
  }
  func.func @transform_16(%arg0: i32) -> (i32, i32) {
    %c0_i32 = arith.constant 0 : i32
    %c0_i32_0 = arith.constant 0 : i32
    %c0_i32_1 = arith.constant 0 : i32
    return %c0_i32, %c0_i32_0 : i32, i32
  }
  func.func @transform_17(%arg0: i32) -> (i32, i32, i32) {
    %c0_i32 = arith.constant 0 : i32
    %c0_i32_0 = arith.constant 0 : i32
    %c0_i32_1 = arith.constant 0 : i32
    return %c0_i32, %arg0, %c0_i32_0 : i32, i32, i32
  }
}

</mosaic_0001>

<bundles_post_ra>
// kernel: nlib_forward.3
= control target key start
LH: loop header
LB: loop body
LE: loop exit
PB: predicated region body
PF: predicated region fallthrough
CT: control target
= control target key end

     0   :  { %v7924_v1 = vmov 0   ;;  %vm183_vm0 = vcmask 261120   ;;  %v7925_v15 = vmov 0.0   ;;  %vm7926_vm1 = vmmov 0   ;;  %s10229_s1 = inlined_call_operand.vmem [shape: bf16[32,800], index: 1, kind: input, shape index: {}]   ;;  %s10230_s0 = inlined_call_operand.vmem [shape: bf16[8,32], index: 0, kind: input, shape index: {}]   ;;  %s10231_s3 = inlined_call_operand.vmem [shape: bf16[800,800], index: 3, kind: input, shape index: {}]   ;;  %s10232_s2 = inlined_call_operand.vmem [shape: f32[1,800], index: 2, kind: input, shape index: {}]   ;;  %s10233_s5 = inlined_call_operand.vmem [shape: bf16[800,256], index: 5, kind: input, shape index: {}]   ;;  %s10234_s8 = inlined_call_operand.vmem [shape: f32[1,128], index: 8, kind: input, shape index: {}]   ;;  %s10235_s9 = inlined_call_operand.vmem [shape: bf16[128,128], index: 9, kind: input, shape index: {}]   ;;  %s10236_s4 = inlined_call_operand.vmem [shape: f32[1,800], index: 4, kind: input, shape index: {}]   ;;  %s10237_s7 = inlined_call_operand.vmem [shape: f32[1,128], index: 7, kind: input, shape index: {}]   ;;  %s10238_s10 = inlined_call_operand.vmem [shape: f32[8,128], index: 10, kind: input, shape index: {}]   ;;  %s10239_s13 = inlined_call_operand.vmem [shape: bf16[128,800], index: 13, kind: input, shape index: {}]   ;;  %s10240_s12 = inlined_call_operand.vmem [shape: bf16[10,8,128], index: 12, kind: input, shape index: {}]   ;;  %s10241_s6 = inlined_call_operand.vmem [shape: f32[1,256], index: 6, kind: input, shape index: {}]   ;;  %s10242_s11 = inlined_call_operand.vmem [shape: bf16[10,8,128], index: 11, kind: input, shape index: {}]   ;;  %s10243_s15 = inlined_call_operand.vmem [shape: bf16[800,128], index: 15, kind: input, shape index: {}]   ;;  %s10244_s14 = inlined_call_operand.vmem [shape: f32[1,800], index: 14, kind: input, shape index: {}]   ;;  %s10245_s16 = inlined_call_operand.vmem [shape: f32[1,128], index: 16, kind: input, shape index: {}]   ;;  %s10246_s17 = inlined_call_operand.vmem [shape: bf16[10,8,128], index: 17, kind: output, shape index: {}]  }
   0x1   :  { %10248 = sst [smem:[#allocation2_spill]] %s10229_s1  ;;  %219 = vmatprep.mubr.bf16.mxu0 %v7924_v1  ;;  %260 = vmatprep.mubr.bf16.mxu1 %v7924_v1  ;;  %v7090_v16 = vld [vmem:[%s10231_s3 + $0x4] ss:$28 sps:$4 sm:$0xff]   ;;  %v7093_v19 = vld [vmem:[%s10231_s3 + $0xc] ss:$28 sps:$4 sm:$0xff]  }
   0x2   :  { %10249 = sst [smem:[#allocation3_spill]] %s10230_s0  ;;  %s10250_s26 = sld [smem:[#allocation2_spill]]  ;;  %v7088_v18 = vld [vmem:[%s10231_s3] ss:$28 sps:$4 sm:$0xff]   ;;  %v7091_v21 = vld [vmem:[%s10231_s3 + $0x8] ss:$28 sps:$4 sm:$0xff]  }
   0x3   :  { %s10251_s24 = sld [smem:[#allocation3_spill]]  ;;  %v7096_v20 = vld [vmem:[%s10231_s3 + $0x3c] ss:$28 sps:$4 sm:$0xff]   ;;  %v7099_v23 = vld [vmem:[%s10231_s3 + $0x44] ss:$28 sps:$4 sm:$0xff]  }
   0x4   :  { %v7094_v22 = vld [vmem:[%s10231_s3 + $0x38] ss:$28 sps:$4 sm:$0xff]   ;;  %v7097_v25 = vld [vmem:[%s10231_s3 + $0x40] ss:$28 sps:$4 sm:$0xff]   ;;  %v7100_v26 = vld [vmem:[%s10231_s3 + $0x70] ss:$28 sps:$4 sm:$0xff]  }
   0x5   :  { %v7102_v24 = vld [vmem:[%s10231_s3 + $0x74] ss:$28 sps:$4 sm:$0xff]   ;;  %v7105_v27 = vld [vmem:[%s10231_s3 + $0x7c] ss:$28 sps:$4 sm:$0xff]   ;;  %v7108_v28 = vld [vmem:[%s10231_s3 + $0xac] ss:$28 sps:$4 sm:$0xff]  }
   0x6   :  { %v7103_v29 = vld [vmem:[%s10231_s3 + $0x78] ss:$28 sps:$4 sm:$0xff]   ;;  %v7106_v30 = vld [vmem:[%s10231_s3 + $0xa8] ss:$28 sps:$4 sm:$0xff]   ;;  %v7109_v33 = vld [vmem:[%s10231_s3 + $0xb0] ss:$28 sps:$4 sm:$0xff]  }
   0x7   :  { %v7111_v31 = vld [vmem:[%s10231_s3 + $0xb4] ss:$28 sps:$4 sm:$0xff]   ;;  %v7114_v32 = vld [vmem:[%s10231_s3 + $0xe4] ss:$28 sps:$4 sm:$0xff]   ;;  %v7117_v35 = vld [vmem:[%s10231_s3 + $0xec] ss:$28 sps:$4 sm:$0xff]  }
   0x8   :  { %v7068_v0 = vld [vmem:[%s10250_s26 + $0x4] ss:$28 sps:$4 sm:$0xff]   ;;  %v7071_v3 = vld [vmem:[%s10250_s26 + $0x3c] ss:$28 sps:$4 sm:$0xff]   ;;  %v7074_v5 = vld [vmem:[%s10250_s26 + $0xc] ss:$28 sps:$4 sm:$0xff]  }
   0x9   :  { %v7070_v2 = vld [vmem:[%s10250_s26] ss:$28 sps:$4 sm:$0xff]   ;;  %187 = vmatprep.subr.bf16.mxu0 %v7068_v0  ;;  %v7073_v4 = vld [vmem:[%s10250_s26 + $0x38] ss:$28 sps:$4 sm:$0xff]   ;;  %v7076_v6 = vld [vmem:[%s10250_s26 + $0x8] ss:$28 sps:$4 sm:$0xff]   ;;  %228 = vmatprep.subr.bf16.mxu1 %v7074_v5 }
   0xa   :  { %188 = vmatpush1.bf16.msra.mxu0 %v7070_v2  ;;  %v57_v7 = vld [vmem:[%s10251_s24] sm:$0xf]  ;;  %229 = vmatpush1.bf16.msra.mxu1 %v7076_v6  ;;  %v7082_v10 = vld [vmem:[%s10250_s26 + $0x14] ss:$28 sps:$4 sm:$0xff]   ;;  %v7085_v12 = vld [vmem:[%s10250_s26 + $0x4c] ss:$28 sps:$4 sm:$0xff]  }
   0xb   :  { %189 = vmatprep.subr.bf16.mxu0 %v7071_v3  ;;  %v7077_v8 = vld [vmem:[%s10250_s26 + $0x44] ss:$28 sps:$4 sm:$0xff]   ;;  %v7080_v11 = vld [vmem:[%s10250_s26 + $0x10] ss:$28 sps:$4 sm:$0xff]   ;;  %v7086_v13 = vld [vmem:[%s10250_s26 + $0x18] ss:$28 sps:$4 sm:$0xff]  }
   0xc   :  { %v7079_v9 = vld [vmem:[%s10250_s26 + $0x40] ss:$28 sps:$4 sm:$0xff]   ;;  %230 = vmatprep.subr.bf16.mxu1 %v7077_v8  ;;  %v7083_v14 = vld [vmem:[%s10250_s26 + $0x48] ss:$28 sps:$4 sm:$0xff]   ;;  %v7087_v17 = vld [vmem:[%s10250_s26 + $0x50] ss:$28 sps:$4 sm:$0xff]  }
   0xd   :  { %v7112_v34 = vld [vmem:[%s10231_s3 + $0xe0] ss:$28 sps:$4 sm:$0xff]   ;;  %v7115_v37 = vld [vmem:[%s10231_s3 + $0xe8] ss:$28 sps:$4 sm:$0xff]   ;;  %v7118_v38 = vld [vmem:[%s10231_s3 + $0x118] ss:$28 sps:$4 sm:$0xff]  }
   0xe   :  { %190 = vmatpush1.bf16.msra.mxu0 %v7073_v4  ;;  %231 = vmatpush1.bf16.msra.mxu1 %v7079_v9  ;;  %v7120_v36 = vld [vmem:[%s10231_s3 + $0x11c] ss:$28 sps:$4 sm:$0xff]   ;;  %v7123_v39 = vld [vmem:[%s10231_s3 + $0x124] ss:$28 sps:$4 sm:$0xff]   ;;  %v7126_v40 = vld [vmem:[%s10231_s3 + $0x154] ss:$28 sps:$4 sm:$0xff]  }
   0xf   :  { %269 = vmatprep.subr.bf16.mxu0 %v7082_v10  ;;  %6913 = vmatprep.subr.bf16.mxu1 %v7925_v15  ;;  %v7121_v41 = vld [vmem:[%s10231_s3 + $0x120] ss:$28 sps:$4 sm:$0xff]   ;;  %v7124_v42 = vld [vmem:[%s10231_s3 + $0x150] ss:$28 sps:$4 sm:$0xff]   ;;  %v7127_v45 = vld [vmem:[%s10231_s3 + $0x158] ss:$28 sps:$4 sm:$0xff]  }
  0x10   :  { %v7129_v43 = vld [vmem:[%s10231_s3 + $0x15c] ss:$28 sps:$4 sm:$0xff]   ;;  %v7132_v44 = vld [vmem:[%s10231_s3 + $0x18c] ss:$28 sps:$4 sm:$0xff]   ;;  %v7135_v47 = vld [vmem:[%s10231_s3 + $0x194] ss:$28 sps:$4 sm:$0xff]  }
  0x11   :  { %5988 = vmatmul.mubr.msk.bf16.vlgmr.msra.gmra.mrb[0].mxu0 %vm183_vm0, %v57_v7  ;;  %5989 = vmatmul.mubr.msk.bf16.vlgmr.msra.gmra.mrb[0].mxu1 %vm183_vm0, %v57_v7  ;;  %v7130_v46 = vld [vmem:[%s10231_s3 + $0x188] ss:$28 sps:$4 sm:$0xff]   ;;  %v7133_v49 = vld [vmem:[%s10231_s3 + $0x190] ss:$28 sps:$4 sm:$0xff]   ;;  %v7136_v50 = vld [vmem:[%s10231_s3 + $0x1c0] ss:$28 sps:$4 sm:$0xff]  }
  0x12   :  { %270 = vmatpush1.bf16.msra.mxu0 %v7080_v11  ;;  %301 = vmatprep.mubr.bf16.mxu0 %v7924_v1  ;;  %v7138_v48 = vld [vmem:[%s10231_s3 + $0x1c4] ss:$28 sps:$4 sm:$0xff]   ;;  %v7141_v51 = vld [vmem:[%s10231_s3 + $0x1cc] ss:$28 sps:$4 sm:$0xff]   ;;  %v7144_v52 = vld [vmem:[%s10231_s3 + $0x1fc] ss:$28 sps:$4 sm:$0xff]  }
  0x13   :  { %271 = vmatprep.subr.bf16.mxu0 %v7085_v12  ;;  %6914 = vmatpush3.bf16.msra.mxu1 %v7086_v13  ;;  %v7139_v53 = vld [vmem:[%s10231_s3 + $0x1c8] ss:$28 sps:$4 sm:$0xff]   ;;  %v7142_v54 = vld [vmem:[%s10231_s3 + $0x1f8] ss:$28 sps:$4 sm:$0xff]   ;;  %v7145_v57 = vld [vmem:[%s10231_s3 + $0x200] ss:$28 sps:$4 sm:$0xff]  }
  0x14   :  { %6917 = vmatprep.mubr.msk.bf16.mxu1 %vm7926_vm1, %v7925_v15  ;;  %6915 = vmatprep.subr.bf16.mxu1 %v7925_v15  ;;  %v7147_v55 = vld [vmem:[%s10231_s3 + $0x204] ss:$28 sps:$4 sm:$0xff]   ;;  %v7150_v56 = vld [vmem:[%s10231_s3 + $0x234] ss:$28 sps:$4 sm:$0xff]   ;;  %v7153_v59 = vld [vmem:[%s10231_s3 + $0x23c] ss:$28 sps:$4 sm:$0xff]  }
  0x15   :  { %v7148_v58 = vld [vmem:[%s10231_s3 + $0x230] ss:$28 sps:$4 sm:$0xff]   ;;  %v7151_v61 = vld [vmem:[%s10231_s3 + $0x238] ss:$28 sps:$4 sm:$0xff]   ;;  %v7154_v62 = vld [vmem:[%s10231_s3 + $0x268] ss:$28 sps:$4 sm:$0xff]  }
  0x16   :  { %272 = vmatpush1.bf16.msra.mxu0 %v7083_v14  ;;  %v7156_v60 = vld [vmem:[%s10231_s3 + $0x26c] ss:$28 sps:$4 sm:$0xff]   ;;  %v7159_v63 = vld [vmem:[%s10231_s3 + $0x274] ss:$28 sps:$4 sm:$0xff]   ;;  %v7162_v0 = vld [vmem:[%s10231_s3 + $0x2a4] ss:$28 sps:$4 sm:$0xff]  }
  0x17   :  { %2604 = vmatprep.subr.bf16.mxu0 %v7090_v16  ;;  %6916 = vmatpush3.bf16.msra.mxu1 %v7087_v17  ;;  %v7157_v2 = vld [vmem:[%s10231_s3 + $0x270] ss:$28 sps:$4 sm:$0xff]   ;;  %v7160_v3 = vld [vmem:[%s10231_s3 + $0x2a0] ss:$28 sps:$4 sm:$0xff]   ;;  %v7163_v6 = vld [vmem:[%s10231_s3 + $0x2a8] ss:$28 sps:$4 sm:$0xff]  }
  0x18   :  { %2768 = vmatprep.subr.bf16.mxu1 %v7093_v19  ;;  %v7165_v4 = vld [vmem:[%s10231_s3 + $0x2ac] ss:$28 sps:$4 sm:$0xff]   ;;  %v7168_v5 = vld [vmem:[%s10231_s3 + $0x2dc] ss:$28 sps:$4 sm:$0xff]   ;;  %v7171_v8 = vld [vmem:[%s10231_s3 + $0x2e4] ss:$28 sps:$4 sm:$0xff]  }
  0x19   :  { %5990 = vmatmul.mubr.msk.bf16.vlgmr.msra.gmra.mrb[4].mxu0 %vm183_vm0, %v57_v7  ;;  %v7169_v9 = vld [vmem:[%s10231_s3 + $0x2e0] ss:$28 sps:$4 sm:$0xff]   ;;  %v7174_v10 = vld [vmem:[%s10231_s3 + $0x314] ss:$28 sps:$4 sm:$0xff]   ;;  %v7180_v14 = vld [vmem:[%s10231_s3 + $0x34c] ss:$28 sps:$4 sm:$0xff]  }
  0x1a   :  { %2605 = vmatpush1.bf16.msra.mxu0 %v7088_v18  ;;  %6918 = vmatmul.mubr.msk.bf16.vlgmr.msra.gmra.mrb[4].mxu1 %vm183_vm0, %v57_v7  ;;  %v7166_v7 = vld [vmem:[%s10231_s3 + $0x2d8] ss:$28 sps:$4 sm:$0xff]   ;;  %v7172_v12 = vld [vmem:[%s10231_s3 + $0x310] ss:$28 sps:$4 sm:$0xff]   ;;  %v7178_v17 = vld [vmem:[%s10231_s3 + $0x348] ss:$28 sps:$4 sm:$0xff]  }
  0x1b   :  { %2606 = vmatprep.subr.bf16.mxu0 %v7096_v20  ;;  %2769 = vmatpush1.bf16.msra.mxu1 %v7091_v21  ;;  %v7177_v11 = vld [vmem:[%s10231_s3 + $0x31c] ss:$28 sps:$4 sm:$0xff]   ;;  %v7183_v16 = vld [vmem:[%s10231_s3 + $0x354] ss:$28 sps:$4 sm:$0xff]   ;;  %v7186_v19 = vld [vmem:[%s10231_s3 + $0x384] ss:$28 sps:$4 sm:$0xff]   ;;  %v76_v21 = vlaneseq }
  0x1c   :  { %2770 = vmatprep.subr.bf16.mxu1 %v7099_v23  ;;  %v7175_v13 = vld [vmem:[%s10231_s3 + $0x318] ss:$28 sps:$4 sm:$0xff]   ;;  %v7181_v18 = vld [vmem:[%s10231_s3 + $0x350] ss:$28 sps:$4 sm:$0xff]  }
  0x1d   :  { %v7189_v20 = vld [vmem:[%s10231_s3 + $0x38c] ss:$28 sps:$4 sm:$0xff]  }
  0x1e   :  { %2607 = vmatpush1.bf16.msra.mxu0 %v7094_v22  ;;  %v8271_v22 = vshrl.u32 %v76_v21, 7  ;;  %v7226_v21 = vld [vmem:[%s10231_s3 + $0x508] ss:$28 sps:$4 sm:$0xff]  }
  0x1f   :  { %2608 = vmatprep.subr.bf16.mxu0 %v7102_v24  ;;  %2771 = vmatpush1.bf16.msra.mxu1 %v7097_v25  ;;  %v8279_v24 = vld [vmem:[%s10232_s2] sm:$0x7f] }
  0x20   :  { %2772 = vmatprep.subr.bf16.mxu1 %v7105_v27  ;;  %v8274_v23 = vsub.s32 0, %v8271_v22  ;;  %v8282_v25 = vsub.s32 1, %v8271_v22  ;;  %v8287_v27 = vsub.s32 3, %v8271_v22 }
  0x22   :  { %2609 = vmatpush1.bf16.msra.mxu0 %v7100_v26  ;;  %v79_v26 = vrot.slane %v8279_v24, %v8274_v23 }
  0x23   :  { %2610 = vmatprep.subr.bf16.mxu0 %v7108_v28  ;;  %2773 = vmatpush1.bf16.msra.mxu1 %v7103_v29  ;;  %v83_v28 = vrot.slane %v8279_v24, %v8282_v25 }
  0x24   :  { %2774 = vmatprep.subr.bf16.mxu1 %v7111_v31 }
  0x26   :  { %2611 = vmatpush1.bf16.msra.mxu0 %v7106_v30 }
  0x27   :  { %2612 = vmatprep.subr.bf16.mxu0 %v7114_v32  ;;  %2775 = vmatpush1.bf16.msra.mxu1 %v7109_v33  ;;  %v91_v32 = vrot.slane %v8279_v24, %v8287_v27 }
  0x28   :  { %2776 = vmatprep.subr.bf16.mxu1 %v7117_v35 }
  0x2a   :  { %2613 = vmatpush1.bf16.msra.mxu0 %v7112_v34 }
  0x2b   :  { %2614 = vmatprep.subr.bf16.mxu0 %v7120_v36  ;;  %2777 = vmatpush1.bf16.msra.mxu1 %v7115_v37 }
  0x2c   :  { %2778 = vmatprep.subr.bf16.mxu1 %v7123_v39 }
  0x2e   :  { %2615 = vmatpush1.bf16.msra.mxu0 %v7118_v38 }
  0x2f   :  { %2616 = vmatprep.subr.bf16.mxu0 %v7126_v40  ;;  %2779 = vmatpush1.bf16.msra.mxu1 %v7121_v41 }
  0x30   :  { %2780 = vmatprep.subr.bf16.mxu1 %v7129_v43  ;;  %v7184_v43 = vld [vmem:[%s10231_s3 + $0x380] ss:$28 sps:$4 sm:$0xff]  }
  0x32   :  { %2617 = vmatpush1.bf16.msra.mxu0 %v7124_v42 }
  0x33   :  { %2618 = vmatprep.subr.bf16.mxu0 %v7132_v44  ;;  %2781 = vmatpush1.bf16.msra.mxu1 %v7127_v45  ;;  %v7187_v44 = vld [vmem:[%s10231_s3 + $0x388] ss:$28 sps:$4 sm:$0xff]  }
  0x34   :  { %2782 = vmatprep.subr.bf16.mxu1 %v7135_v47  ;;  %v7192_v47 = vld [vmem:[%s10231_s3 + $0x3bc] ss:$28 sps:$4 sm:$0xff]  }
  0x36   :  { %2619 = vmatpush1.bf16.msra.mxu0 %v7130_v46 }
  0x37   :  { %2620 = vmatprep.subr.bf16.mxu0 %v7138_v48  ;;  %2783 = vmatpush1.bf16.msra.mxu1 %v7133_v49  ;;  %v7195_v48 = vld [vmem:[%s10231_s3 + $0x3c4] ss:$28 sps:$4 sm:$0xff]  }
  0x38   :  { %2784 = vmatprep.subr.bf16.mxu1 %v7141_v51 }
  0x3a   :  { %2621 = vmatpush1.bf16.msra.mxu0 %v7136_v50 }
  0x3b   :  { %2622 = vmatprep.subr.bf16.mxu0 %v7144_v52  ;;  %2785 = vmatpush1.bf16.msra.mxu1 %v7139_v53  ;;  %v7190_v53 = vld [vmem:[%s10231_s3 + $0x3b8] ss:$28 sps:$4 sm:$0xff]  }
  0x3c   :  { %2786 = vmatprep.subr.bf16.mxu1 %v7147_v55 }
  0x3e   :  { %2623 = vmatpush1.bf16.msra.mxu0 %v7142_v54  ;;  %v7193_v54 = vld [vmem:[%s10231_s3 + $0x3c0] ss:$28 sps:$4 sm:$0xff]  }
  0x3f   :  { %2624 = vmatprep.subr.bf16.mxu0 %v7150_v56  ;;  %2787 = vmatpush1.bf16.msra.mxu1 %v7145_v57  ;;  %v7198_v56 = vld [vmem:[%s10231_s3 + $0x3f4] ss:$28 sps:$4 sm:$0xff]   ;;  %v7201_v57 = vld [vmem:[%s10231_s3 + $0x3fc] ss:$28 sps:$4 sm:$0xff]  }
  0x40   :  { %2788 = vmatprep.subr.bf16.mxu1 %v7153_v59 }
  0x42   :  { %2625 = vmatpush1.bf16.msra.mxu0 %v7148_v58 }
  0x43   :  { %2626 = vmatprep.subr.bf16.mxu0 %v7156_v60  ;;  %2789 = vmatpush1.bf16.msra.mxu1 %v7151_v61 }
  0x44   :  { %2790 = vmatprep.subr.bf16.mxu1 %v7159_v63  ;;  %v7199_v63 = vld [vmem:[%s10231_s3 + $0x3f8] ss:$28 sps:$4 sm:$0xff]  }
  0x46   :  { %2627 = vmatpush1.bf16.msra.mxu0 %v7154_v62  ;;  %v7196_v62 = vld [vmem:[%s10231_s3 + $0x3f0] ss:$28 sps:$4 sm:$0xff]  }
  0x47   :  { %2628 = vmatprep.subr.bf16.mxu0 %v7162_v0  ;;  %2791 = vmatpush1.bf16.msra.mxu1 %v7157_v2  ;;  %v7204_v2 = vld [vmem:[%s10231_s3 + $0x42c] ss:$28 sps:$4 sm:$0xff]  }
  0x48   :  { %2792 = vmatprep.subr.bf16.mxu1 %v7165_v4  ;;  %v7202_v4 = vld [vmem:[%s10231_s3 + $0x428] ss:$28 sps:$4 sm:$0xff]  }
  0x4a   :  { %2629 = vmatpush1.bf16.msra.mxu0 %v7160_v3  ;;  %v7207_v3 = vld [vmem:[%s10231_s3 + $0x434] ss:$28 sps:$4 sm:$0xff]  }
  0x4b   :  { %2630 = vmatprep.subr.bf16.mxu0 %v7168_v5  ;;  %2793 = vmatpush1.bf16.msra.mxu1 %v7163_v6  ;;  %v7205_v5 = vld [vmem:[%s10231_s3 + $0x430] ss:$28 sps:$4 sm:$0xff]   ;;  %v7210_v6 = vld [vmem:[%s10231_s3 + $0x464] ss:$28 sps:$4 sm:$0xff]  }
  0x4c   :  { %2794 = vmatprep.subr.bf16.mxu1 %v7171_v8  ;;  %v7208_v8 = vld [vmem:[%s10231_s3 + $0x460] ss:$28 sps:$4 sm:$0xff]  }
  0x4e   :  { %2631 = vmatpush1.bf16.msra.mxu0 %v7166_v7  ;;  %v7213_v7 = vld [vmem:[%s10231_s3 + $0x46c] ss:$28 sps:$4 sm:$0xff]  }
  0x4f   :  { %2795 = vmatpush1.bf16.msra.mxu1 %v7169_v9  ;;  %2632 = vmatprep.subr.bf16.mxu0 %v7174_v10  ;;  %v7211_v9 = vld [vmem:[%s10231_s3 + $0x468] ss:$28 sps:$4 sm:$0xff]   ;;  %v7216_v10 = vld [vmem:[%s10231_s3 + $0x49c] ss:$28 sps:$4 sm:$0xff]  }
  0x50   :  { %2796 = vmatprep.subr.bf16.mxu1 %v7177_v11  ;;  %v7219_v11 = vld [vmem:[%s10231_s3 + $0x4a4] ss:$28 sps:$4 sm:$0xff]  }
  0x52   :  { %2633 = vmatpush1.bf16.msra.mxu0 %v7172_v12  ;;  %v7214_v12 = vld [vmem:[%s10231_s3 + $0x498] ss:$28 sps:$4 sm:$0xff]  }
  0x53   :  { %2797 = vmatpush1.bf16.msra.mxu1 %v7175_v13  ;;  %2634 = vmatprep.subr.bf16.mxu0 %v7180_v14  ;;  %v7217_v13 = vld [vmem:[%s10231_s3 + $0x4a0] ss:$28 sps:$4 sm:$0xff]   ;;  %v7222_v14 = vld [vmem:[%s10231_s3 + $0x4d4] ss:$28 sps:$4 sm:$0xff]  }
  0x54   :  { %2798 = vmatprep.subr.bf16.mxu1 %v7183_v16  ;;  %v7225_v16 = vld [vmem:[%s10231_s3 + $0x4dc] ss:$28 sps:$4 sm:$0xff]  }
  0x56   :  { %2635 = vmatpush1.bf16.msra.mxu0 %v7178_v17  ;;  %v7220_v17 = vld [vmem:[%s10231_s3 + $0x4d0] ss:$28 sps:$4 sm:$0xff]  }
  0x57   :  { %2799 = vmatpush1.bf16.msra.mxu1 %v7181_v18  ;;  %2645 = vmatprep.subr.bf16.mxu0 %v7186_v19  ;;  %v7223_v18 = vld [vmem:[%s10231_s3 + $0x4d8] ss:$28 sps:$4 sm:$0xff]   ;;  %v7228_v19 = vld [vmem:[%s10231_s3 + $0x50c] ss:$28 sps:$4 sm:$0xff]  }
  0x58   :  { %2809 = vmatprep.subr.bf16.mxu1 %v7189_v20  ;;  %v7231_v20 = vld [vmem:[%s10231_s3 + $0x514] ss:$28 sps:$4 sm:$0xff]  }
  0xe4   :  { %v221_v29 = vpop.f32.mrb[0].mxu0  ;;  %v8293_v37 = vpop.f32.mrb[0].mxu1 }
  0xe5   :  { %v222_v30 = vadd.f32 %v221_v29, %v79_v26  ;;  %v223_v31 = vpop.f32.mrb[1].mxu0  ;;  %v264_v39 = vpop.f32.mrb[1].mxu1  ;;  %v7229_v26 = vld [vmem:[%s10231_s3 + $0x510] ss:$28 sps:$4 sm:$0xff]  }
  0xe6   :  { %v224_v33 = vadd.f32 %v223_v31, %v83_v28  ;;  %v225_v34 = vpop.f32.mrb[2].mxu0  ;;  %v265_v40 = vadd.f32 %v264_v39, %v91_v32  ;;  %v266_v41 = vpop.f32.mrb[2].mxu1  ;;  %v7234_v28 = vld [vmem:[%s10231_s3 + $0x544] ss:$28 sps:$4 sm:$0xff]   ;;  %v7237_v29 = vld [vmem:[%s10231_s3 + $0x54c] ss:$28 sps:$4 sm:$0xff]  }
  0xe7   :  { %v350_v35 = vmax.f32 %v222_v30, 0.0  ;;  %v226_v36 = vpop.f32.mrb[3].mxu0  ;;  %v267_v45 = vpop.f32.mrb[3].mxu1  ;;  %v7232_v30 = vld [vmem:[%s10231_s3 + $0x540] ss:$28 sps:$4 sm:$0xff]  }
  0xe8   :  { %v351_v38 = vmax.f32 %v224_v33, 0.0  ;;  %v353_v49 = vmax.f32 %v265_v40, 0.0  ;;  %v7235_v31 = vld [vmem:[%s10231_s3 + $0x548] ss:$28 sps:$4 sm:$0xff]   ;;  %v7240_v32 = vld [vmem:[%s10231_s3 + $0x57c] ss:$28 sps:$4 sm:$0xff]  }
  0xe9   :  { %v8303_v46 = vpack.c.bf16 %v350_v35, %v350_v35  ;;  %v7243_v33 = vld [vmem:[%s10231_s3 + $0x584] ss:$28 sps:$4 sm:$0xff]   ;;  %v7238_v34 = vld [vmem:[%s10231_s3 + $0x578] ss:$28 sps:$4 sm:$0xff]   ;;  %v7244_v39 = vld [vmem:[%s10231_s3 + $0x5b0] ss:$28 sps:$4 sm:$0xff]  }
  0xea   :  { %v8295_v42 = vpack.c.bf16 %v351_v38, %v351_v38  ;;  %v8317_v51 = vpack.c.bf16 %v353_v49, %v353_v49  ;;  %v7241_v35 = vld [vmem:[%s10231_s3 + $0x580] ss:$28 sps:$4 sm:$0xff]   ;;  %v7246_v36 = vld [vmem:[%s10231_s3 + $0x5b4] ss:$28 sps:$4 sm:$0xff]   ;;  %v7252_v41 = vld [vmem:[%s10231_s3 + $0x5ec] ss:$28 sps:$4 sm:$0xff]  }
  0xeb   :  { %v7249_v38 = vld [vmem:[%s10231_s3 + $0x5bc] ss:$28 sps:$4 sm:$0xff]   ;;  %v7253_v45 = vld [vmem:[%s10231_s3 + $0x5f0] ss:$28 sps:$4 sm:$0xff]   ;;  %v8458_v49 = vsub.s32 2, %v8271_v22 }
  0xec   :  { %2636 = vmatprep.mubr.bf16.mxu0 %v8295_v42  ;;  %2800 = vmatprep.mubr.bf16.mxu1 %v8295_v42  ;;  %v8313_v50 = vpop.f32.mrb[4].mxu0  ;;  %v7247_v40 = vld [vmem:[%s10231_s3 + $0x5b8] ss:$28 sps:$4 sm:$0xff]  }
  0xed   :  { %2637 = vmatmul.mubr.bf16.vlgmr.msra.gmra.mrb[8].mxu0 %v8303_v46  ;;  %2801 = vmatmul.mubr.bf16.vlgmr.msra.gmra.mrb[8].mxu1 %v8303_v46  ;;  %v8319_v52 = vpop.f32.mrb[5].mxu0  ;;  %v8333_v59 = vpop.f32.mrb[4].mxu1 }
  0xee   :  { %2646 = vmatpush1.bf16.msra.mxu0 %v7184_v43  ;;  %2810 = vmatpush1.bf16.msra.mxu1 %v7187_v44  ;;  %v307_v55 = vpop.f32.mrb[6].mxu0  ;;  %v6919_v60 = vpop.f32.mrb[5].mxu1  ;;  %v7255_v43 = vld [vmem:[%s10231_s3 + $0x5f4] ss:$28 sps:$4 sm:$0xff]   ;;  %v7250_v44 = vld [vmem:[%s10231_s3 + $0x5e8] ss:$28 sps:$4 sm:$0xff]  }
  0xef   :  { %2647 = vmatprep.subr.bf16.mxu0 %v7192_v47  ;;  %2811 = vmatprep.subr.bf16.mxu1 %v7195_v48  ;;  %v308_v58 = vpop.f32.mrb[7].mxu0  ;;  %v347_v61 = vpop.f32.mrb[6].mxu1  ;;  %v7258_v47 = vld [vmem:[%s10231_s3 + $0x624] ss:$28 sps:$4 sm:$0xff]   ;;  %v7261_v48 = vld [vmem:[%s10231_s3 + $0x62c] ss:$28 sps:$4 sm:$0xff]  }
  0xf0   :  { %2677 = vmatprep.mubr.bf16.mxu0 %v8317_v51  ;;  %2841 = vmatprep.mubr.bf16.mxu1 %v8317_v51  ;;  %v6920_v0 = vpop.f32.mrb[7].mxu1  ;;  %v7264_v55 = vld [vmem:[%s10231_s3 + $0x65c] ss:$28 sps:$4 sm:$0xff]   ;;  %v87_v58 = vrot.slane %v8279_v24, %v8458_v49 }
  0xf1   :  { %v7262_v60 = vld [vmem:[%s10231_s3 + $0x658] ss:$28 sps:$4 sm:$0xff]   ;;  %v7265_v61 = vld [vmem:[%s10231_s3 + $0x660] ss:$28 sps:$4 sm:$0xff]  }
  0xf2   :  { %2648 = vmatpush1.bf16.msra.mxu0 %v7190_v53  ;;  %2812 = vmatpush1.bf16.msra.mxu1 %v7193_v54  ;;  %v7256_v53 = vld [vmem:[%s10231_s3 + $0x620] ss:$28 sps:$4 sm:$0xff]   ;;  %v7259_v54 = vld [vmem:[%s10231_s3 + $0x628] ss:$28 sps:$4 sm:$0xff]  }
  0xf3   :  { %2649 = vmatprep.subr.bf16.mxu0 %v7198_v56  ;;  %2813 = vmatprep.subr.bf16.mxu1 %v7201_v57  ;;  %v7267_v56 = vld [vmem:[%s10231_s3 + $0x664] ss:$28 sps:$4 sm:$0xff]   ;;  %v8473_v57 = vsub.s32 5, %v8271_v22 }
  0xf5   :  { %v99_v0 = vrot.slane %v8279_v24, %v8473_v57 }
  0xf6   :  { %2650 = vmatpush1.bf16.msra.mxu0 %v7196_v62  ;;  %2814 = vmatpush1.bf16.msra.mxu1 %v7199_v63  ;;  %v7270_v62 = vld [vmem:[%s10231_s3 + $0x694] ss:$28 sps:$4 sm:$0xff]   ;;  %v7273_v63 = vld [vmem:[%s10231_s3 + $0x69c] ss:$28 sps:$4 sm:$0xff]  }
  0xf7   :  { %2651 = vmatprep.subr.bf16.mxu0 %v7204_v2  ;;  %2815 = vmatprep.subr.bf16.mxu1 %v7207_v3  ;;  %v263_v2 = vadd.f32 %v8293_v37, %v87_v58  ;;  %v7268_v3 = vld [vmem:[%s10231_s3 + $0x690] ss:$28 sps:$4 sm:$0xff]   ;;  %v7330_v58 = vld [vmem:[%s10231_s3 + $0x8c4] ss:$28 sps:$4 sm:$0xff]  }
  0xf8   :  { %v7279_v37 = vld [vmem:[%s10231_s3 + $0x6d4] ss:$28 sps:$4 sm:$0xff]  }
  0xfa   :  { %2652 = vmatpush1.bf16.msra.mxu0 %v7202_v4  ;;  %2816 = vmatpush1.bf16.msra.mxu1 %v7205_v5  ;;  %v7271_v4 = vld [vmem:[%s10231_s3 + $0x698] ss:$28 sps:$4 sm:$0xff]   ;;  %v7276_v5 = vld [vmem:[%s10231_s3 + $0x6cc] ss:$28 sps:$4 sm:$0xff]  }
  0xfb   :  { %2653 = vmatprep.subr.bf16.mxu0 %v7210_v6  ;;  %2817 = vmatprep.subr.bf16.mxu1 %v7213_v7  ;;  %v306_v6 = vadd.f32 %v8319_v52, %v99_v0  ;;  %v352_v7 = vmax.f32 %v263_v2, 0.0  ;;  %v7285_v52 = vld [vmem:[%s10231_s3 + $0x70c] ss:$28 sps:$4 sm:$0xff]   ;;  %v7339_v0 = vld [vmem:[%s10231_s3 + $0x904] ss:$28 sps:$4 sm:$0xff]  }
  0xfc   :  { %v7334_v2 = vld [vmem:[%s10231_s3 + $0x8f8] ss:$28 sps:$4 sm:$0xff]  }
  0xfe   :  { %2654 = vmatpush1.bf16.msra.mxu0 %v7208_v8  ;;  %2818 = vmatpush1.bf16.msra.mxu1 %v7211_v9  ;;  %v7274_v8 = vld [vmem:[%s10231_s3 + $0x6c8] ss:$28 sps:$4 sm:$0xff]   ;;  %v7277_v9 = vld [vmem:[%s10231_s3 + $0x6d0] ss:$28 sps:$4 sm:$0xff]  }
  0xff   :  { %2655 = vmatprep.subr.bf16.mxu0 %v7216_v10  ;;  %2819 = vmatprep.subr.bf16.mxu1 %v7219_v11  ;;  %v7282_v10 = vld [vmem:[%s10231_s3 + $0x704] ss:$28 sps:$4 sm:$0xff]   ;;  %v355_v11 = vmax.f32 %v306_v6, 0.0  ;;  %v7343_v6 = vld [vmem:[%s10231_s3 + $0x938] ss:$28 sps:$4 sm:$0xff]  }
 0x102   :  { %2656 = vmatpush1.bf16.msra.mxu0 %v7214_v12  ;;  %2820 = vmatpush1.bf16.msra.mxu1 %v7217_v13  ;;  %v8517_v12 = vpack.c.bf16 %v352_v7, %v352_v7  ;;  %v7280_v13 = vld [vmem:[%s10231_s3 + $0x700] ss:$28 sps:$4 sm:$0xff]   ;;  %v7348_v7 = vld [vmem:[%s10231_s3 + $0x96c] ss:$28 sps:$4 sm:$0xff]  }
 0x103   :  { %2657 = vmatprep.subr.bf16.mxu0 %v7222_v14  ;;  %2821 = vmatprep.subr.bf16.mxu1 %v7225_v16  ;;  %v7283_v14 = vld [vmem:[%s10231_s3 + $0x708] ss:$28 sps:$4 sm:$0xff]   ;;  %v7288_v16 = vld [vmem:[%s10231_s3 + $0x73c] ss:$28 sps:$4 sm:$0xff]  }
 0x106   :  { %2658 = vmatpush1.bf16.msra.mxu0 %v7220_v17  ;;  %2822 = vmatpush1.bf16.msra.mxu1 %v7223_v18  ;;  %v7291_v17 = vld [vmem:[%s10231_s3 + $0x744] ss:$28 sps:$4 sm:$0xff]   ;;  %v8531_v18 = vpack.c.bf16 %v355_v11, %v355_v11  ;;  %v7357_v11 = vld [vmem:[%s10231_s3 + $0x9ac] ss:$28 sps:$4 sm:$0xff]  }
 0x107   :  { %2659 = vmatprep.subr.bf16.mxu0 %v7228_v19  ;;  %2823 = vmatprep.subr.bf16.mxu1 %v7231_v20  ;;  %v7286_v19 = vld [vmem:[%s10231_s3 + $0x738] ss:$28 sps:$4 sm:$0xff]   ;;  %v7289_v20 = vld [vmem:[%s10231_s3 + $0x740] ss:$28 sps:$4 sm:$0xff]  }
 0x10a   :  { %2660 = vmatpush1.bf16.msra.mxu0 %v7226_v21  ;;  %2824 = vmatpush1.bf16.msra.mxu1 %v7229_v26  ;;  %v7294_v21 = vld [vmem:[%s10231_s3 + $0x774] ss:$28 sps:$4 sm:$0xff]   ;;  %v7297_v26 = vld [vmem:[%s10231_s3 + $0x77c] ss:$28 sps:$4 sm:$0xff]  }
 0x10b   :  { %2661 = vmatprep.subr.bf16.mxu0 %v7234_v28  ;;  %2825 = vmatprep.subr.bf16.mxu1 %v7237_v29  ;;  %v7292_v28 = vld [vmem:[%s10231_s3 + $0x770] ss:$28 sps:$4 sm:$0xff]   ;;  %v7295_v29 = vld [vmem:[%s10231_s3 + $0x778] ss:$28 sps:$4 sm:$0xff]  }
 0x10e   :  { %2662 = vmatpush1.bf16.msra.mxu0 %v7232_v30  ;;  %2826 = vmatpush1.bf16.msra.mxu1 %v7235_v31  ;;  %v7300_v30 = vld [vmem:[%s10231_s3 + $0x7ac] ss:$28 sps:$4 sm:$0xff]   ;;  %v7303_v31 = vld [vmem:[%s10231_s3 + $0x7b4] ss:$28 sps:$4 sm:$0xff]  }
 0x10f   :  { %2663 = vmatprep.subr.bf16.mxu0 %v7240_v32  ;;  %2827 = vmatprep.subr.bf16.mxu1 %v7243_v33  ;;  %v7298_v32 = vld [vmem:[%s10231_s3 + $0x7a8] ss:$28 sps:$4 sm:$0xff]   ;;  %v7301_v33 = vld [vmem:[%s10231_s3 + $0x7b0] ss:$28 sps:$4 sm:$0xff]  }
 0x112   :  { %2664 = vmatpush1.bf16.msra.mxu0 %v7238_v34  ;;  %2828 = vmatpush1.bf16.msra.mxu1 %v7241_v35  ;;  %v7306_v34 = vld [vmem:[%s10231_s3 + $0x7e4] ss:$28 sps:$4 sm:$0xff]   ;;  %v7309_v35 = vld [vmem:[%s10231_s3 + $0x7ec] ss:$28 sps:$4 sm:$0xff]  }
 0x113   :  { %2665 = vmatprep.subr.bf16.mxu0 %v7246_v36  ;;  %2829 = vmatprep.subr.bf16.mxu1 %v7249_v38  ;;  %v7304_v36 = vld [vmem:[%s10231_s3 + $0x7e0] ss:$28 sps:$4 sm:$0xff]   ;;  %v7307_v38 = vld [vmem:[%s10231_s3 + $0x7e8] ss:$28 sps:$4 sm:$0xff]  }
 0x116   :  { %2666 = vmatpush1.bf16.msra.mxu0 %v7244_v39  ;;  %2830 = vmatpush1.bf16.msra.mxu1 %v7247_v40  ;;  %v7312_v39 = vld [vmem:[%s10231_s3 + $0x81c] ss:$28 sps:$4 sm:$0xff]   ;;  %v7315_v40 = vld [vmem:[%s10231_s3 + $0x824] ss:$28 sps:$4 sm:$0xff]  }
 0x117   :  { %2667 = vmatprep.subr.bf16.mxu0 %v7252_v41  ;;  %2831 = vmatprep.subr.bf16.mxu1 %v7255_v43  ;;  %v7310_v41 = vld [vmem:[%s10231_s3 + $0x818] ss:$28 sps:$4 sm:$0xff]   ;;  %v7313_v43 = vld [vmem:[%s10231_s3 + $0x820] ss:$28 sps:$4 sm:$0xff]  }
 0x11a   :  { %2668 = vmatpush1.bf16.msra.mxu0 %v7250_v44  ;;  %2832 = vmatpush1.bf16.msra.mxu1 %v7253_v45  ;;  %v7318_v44 = vld [vmem:[%s10231_s3 + $0x854] ss:$28 sps:$4 sm:$0xff]   ;;  %v7321_v45 = vld [vmem:[%s10231_s3 + $0x85c] ss:$28 sps:$4 sm:$0xff]  }
 0x11b   :  { %2669 = vmatprep.subr.bf16.mxu0 %v7258_v47  ;;  %2833 = vmatprep.subr.bf16.mxu1 %v7261_v48  ;;  %v7316_v47 = vld [vmem:[%s10231_s3 + $0x850] ss:$28 sps:$4 sm:$0xff]   ;;  %v7319_v48 = vld [vmem:[%s10231_s3 + $0x858] ss:$28 sps:$4 sm:$0xff]  }
 0x11e   :  { %2670 = vmatpush1.bf16.msra.mxu0 %v7256_v53  ;;  %2834 = vmatpush1.bf16.msra.mxu1 %v7259_v54  ;;  %v7324_v53 = vld [vmem:[%s10231_s3 + $0x88c] ss:$28 sps:$4 sm:$0xff]   ;;  %v7327_v54 = vld [vmem:[%s10231_s3 + $0x894] ss:$28 sps:$4 sm:$0xff]  }
 0x11f   :  { %2671 = vmatprep.subr.bf16.mxu0 %v7264_v55  ;;  %2835 = vmatprep.subr.bf16.mxu1 %v7267_v56  ;;  %v7322_v55 = vld [vmem:[%s10231_s3 + $0x888] ss:$28 sps:$4 sm:$0xff]   ;;  %v7325_v56 = vld [vmem:[%s10231_s3 + $0x890] ss:$28 sps:$4 sm:$0xff]  }
 0x122   :  { %2672 = vmatpush1.bf16.msra.mxu0 %v7262_v60  ;;  %2836 = vmatpush1.bf16.msra.mxu1 %v7265_v61  ;;  %v7333_v60 = vld [vmem:[%s10231_s3 + $0x8cc] ss:$28 sps:$4 sm:$0xff]   ;;  %v7328_v61 = vld [vmem:[%s10231_s3 + $0x8c0] ss:$28 sps:$4 sm:$0xff]  }
 0x123   :  { %2673 = vmatprep.subr.bf16.mxu0 %v7270_v62  ;;  %2837 = vmatprep.subr.bf16.mxu1 %v7273_v63  ;;  %v7331_v62 = vld [vmem:[%s10231_s3 + $0x8c8] ss:$28 sps:$4 sm:$0xff]   ;;  %v7336_v63 = vld [vmem:[%s10231_s3 + $0x8fc] ss:$28 sps:$4 sm:$0xff]  }
 0x126   :  { %2674 = vmatpush1.bf16.msra.mxu0 %v7268_v3  ;;  %2838 = vmatpush1.bf16.msra.mxu1 %v7271_v4  ;;  %v7337_v3 = vld [vmem:[%s10231_s3 + $0x900] ss:$28 sps:$4 sm:$0xff]   ;;  %v7342_v4 = vld [vmem:[%s10231_s3 + $0x934] ss:$28 sps:$4 sm:$0xff]  }
 0x127   :  { %2675 = vmatprep.subr.bf16.mxu0 %v7276_v5  ;;  %2839 = vmatprep.subr.bf16.mxu1 %v7279_v37  ;;  %v7345_v5 = vld [vmem:[%s10231_s3 + $0x93c] ss:$28 sps:$4 sm:$0xff]   ;;  %v7340_v37 = vld [vmem:[%s10231_s3 + $0x930] ss:$28 sps:$4 sm:$0xff]  }
 0x12a   :  { %2676 = vmatpush1.bf16.msra.mxu0 %v7274_v8  ;;  %2840 = vmatpush1.bf16.msra.mxu1 %v7277_v9  ;;  %v7351_v8 = vld [vmem:[%s10231_s3 + $0x974] ss:$28 sps:$4 sm:$0xff]   ;;  %v7346_v9 = vld [vmem:[%s10231_s3 + $0x968] ss:$28 sps:$4 sm:$0xff]  }
 0x12b   :  { %2686 = vmatprep.subr.bf16.mxu0 %v7282_v10  ;;  %2850 = vmatprep.subr.bf16.mxu1 %v7285_v52  ;;  %v7349_v10 = vld [vmem:[%s10231_s3 + $0x970] ss:$28 sps:$4 sm:$0xff]   ;;  %v7354_v52 = vld [vmem:[%s10231_s3 + $0x9a4] ss:$28 sps:$4 sm:$0xff]  }
 0x12d   :  { %2678 = vmatmul.mubr.bf16.vlgmr.msra.gmra.mrb[8].mxu0 %v8517_v12  ;;  %2842 = vmatmul.mubr.bf16.vlgmr.msra.gmra.mrb[8].mxu1 %v8517_v12 }
 0x12e   :  { %2687 = vmatpush1.bf16.msra.mxu0 %v7280_v13  ;;  %2851 = vmatpush1.bf16.msra.mxu1 %v7283_v14  ;;  %v7352_v13 = vld [vmem:[%s10231_s3 + $0x9a0] ss:$28 sps:$4 sm:$0xff]   ;;  %v7355_v14 = vld [vmem:[%s10231_s3 + $0x9a8] ss:$28 sps:$4 sm:$0xff]  }
 0x12f   :  { %2688 = vmatprep.subr.bf16.mxu0 %v7288_v16  ;;  %2852 = vmatprep.subr.bf16.mxu1 %v7291_v17  ;;  %v8676_v16 = vsub.s32 4, %v8271_v22  ;;  %v7360_v17 = vld [vmem:[%s10231_s3 + $0x9dc] ss:$28 sps:$4 sm:$0xff]  }
 0x130   :  { %2718 = vmatprep.mubr.bf16.mxu0 %v8531_v18  ;;  %2882 = vmatprep.mubr.bf16.mxu1 %v8531_v18 }
 0x132   :  { %2689 = vmatpush1.bf16.msra.mxu0 %v7286_v19  ;;  %2853 = vmatpush1.bf16.msra.mxu1 %v7289_v20  ;;  %v7363_v19 = vld [vmem:[%s10231_s3 + $0x9e4] ss:$28 sps:$4 sm:$0xff]   ;;  %v7358_v20 = vld [vmem:[%s10231_s3 + $0x9d8] ss:$28 sps:$4 sm:$0xff]  }
 0x133   :  { %2690 = vmatprep.subr.bf16.mxu0 %v7294_v21  ;;  %2854 = vmatprep.subr.bf16.mxu1 %v7297_v26  ;;  %v7361_v21 = vld [vmem:[%s10231_s3 + $0x9e0] ss:$28 sps:$4 sm:$0xff]   ;;  %v95_v26 = vrot.slane %v8279_v24, %v8676_v16 }
 0x136   :  { %2691 = vmatpush1.bf16.msra.mxu0 %v7292_v28  ;;  %2855 = vmatpush1.bf16.msra.mxu1 %v7295_v29  ;;  %v7366_v28 = vld [vmem:[%s10231_s3 + $0xa14] ss:$28 sps:$4 sm:$0xff]   ;;  %v7369_v29 = vld [vmem:[%s10231_s3 + $0xa1c] ss:$28 sps:$4 sm:$0xff]  }
 0x137   :  { %2692 = vmatprep.subr.bf16.mxu0 %v7300_v30  ;;  %2856 = vmatprep.subr.bf16.mxu1 %v7303_v31  ;;  %v7364_v30 = vld [vmem:[%s10231_s3 + $0xa10] ss:$28 sps:$4 sm:$0xff]   ;;  %v7367_v31 = vld [vmem:[%s10231_s3 + $0xa18] ss:$28 sps:$4 sm:$0xff]  }
 0x13a   :  { %2693 = vmatpush1.bf16.msra.mxu0 %v7298_v32  ;;  %2857 = vmatpush1.bf16.msra.mxu1 %v7301_v33  ;;  %v304_v32 = vadd.f32 %v8313_v50, %v95_v26  ;;  %v7372_v33 = vld [vmem:[%s10231_s3 + $0xa4c] ss:$28 sps:$4 sm:$0xff]  }
 0x13b   :  { %2694 = vmatprep.subr.bf16.mxu0 %v7306_v34  ;;  %2858 = vmatprep.subr.bf16.mxu1 %v7309_v35  ;;  %v7375_v34 = vld [vmem:[%s10231_s3 + $0xa54] ss:$28 sps:$4 sm:$0xff]   ;;  %v8712_v35 = vsub.s32 6, %v8271_v22  ;;  %v7381_v22 = vld [vmem:[%s10231_s3 + $0xa8c] ss:$28 sps:$4 sm:$0xff]  }
 0x13c   :  { %v7373_v50 = vld [vmem:[%s10231_s3 + $0xa50] ss:$28 sps:$4 sm:$0xff]   ;;  %v7422_v26 = vld [vmem:[%s10231_s3 + $0x168] ss:$28 sps:$4 sm:$0xff]  }
 0x13e   :  { %2695 = vmatpush1.bf16.msra.mxu0 %v7304_v36  ;;  %2859 = vmatpush1.bf16.msra.mxu1 %v7307_v38  ;;  %v7370_v36 = vld [vmem:[%s10231_s3 + $0xa48] ss:$28 sps:$4 sm:$0xff]   ;;  %v354_v38 = vmax.f32 %v304_v32, 0.0  ;;  %v7430_v32 = vld [vmem:[%s10231_s3 + $0x1d4] ss:$28 sps:$4 sm:$0xff]  }
 0x13f   :  { %2696 = vmatprep.subr.bf16.mxu0 %v7312_v39  ;;  %2860 = vmatprep.subr.bf16.mxu1 %v7315_v40  ;;  %v7378_v39 = vld [vmem:[%s10231_s3 + $0xa84] ss:$28 sps:$4 sm:$0xff]   ;;  %v103_v40 = vrot.slane %v8279_v24, %v8712_v35 }
 0x140   :  { %v7387_v24 = vld [vmem:[%s10231_s3 + $0xac4] ss:$28 sps:$4 sm:$0xff]  }
 0x142   :  { %2697 = vmatpush1.bf16.msra.mxu0 %v7310_v41  ;;  %2861 = vmatpush1.bf16.msra.mxu1 %v7313_v43  ;;  %v7376_v41 = vld [vmem:[%s10231_s3 + $0xa80] ss:$28 sps:$4 sm:$0xff]   ;;  %v7379_v43 = vld [vmem:[%s10231_s3 + $0xa88] ss:$28 sps:$4 sm:$0xff]  }
 0x143   :  { %2698 = vmatprep.subr.bf16.mxu0 %v7318_v44  ;;  %2862 = vmatprep.subr.bf16.mxu1 %v7321_v45  ;;  %v8734_v44 = vpack.c.bf16 %v354_v38, %v354_v38  ;;  %v7384_v45 = vld [vmem:[%s10231_s3 + $0xabc] ss:$28 sps:$4 sm:$0xff]   ;;  %v7436_v38 = vld [vmem:[%s10231_s3 + $0x590] ss:$28 sps:$4 sm:$0xff]  }
 0x146   :  { %2699 = vmatpush1.bf16.msra.mxu0 %v7316_v47  ;;  %2863 = vmatpush1.bf16.msra.mxu1 %v7319_v48  ;;  %v345_v47 = vadd.f32 %v8333_v59, %v103_v40  ;;  %v7382_v48 = vld [vmem:[%s10231_s3 + $0xab8] ss:$28 sps:$4 sm:$0xff]   ;;  %v7440_v40 = vld [vmem:[%s10231_s3 + $0x244] ss:$28 sps:$4 sm:$0xff]  }
 0x147   :  { %2700 = vmatprep.subr.bf16.mxu0 %v7324_v53  ;;  %2864 = vmatprep.subr.bf16.mxu1 %v7327_v54  ;;  %v7385_v53 = vld [vmem:[%s10231_s3 + $0xac0] ss:$28 sps:$4 sm:$0xff]   ;;  %v7390_v54 = vld [vmem:[%s10231_s3 + $0x14] ss:$28 sps:$4 sm:$0xff]  }
 0x148   :  { %v7391_v59 = vld [vmem:[%s10231_s3 + $0x1d8] ss:$28 sps:$4 sm:$0xff]  }
 0x14a   :  { %2701 = vmatpush1.bf16.msra.mxu0 %v7322_v55  ;;  %2865 = vmatpush1.bf16.msra.mxu1 %v7325_v56  ;;  %v356_v55 = vmax.f32 %v345_v47, 0.0  ;;  %v7446_v47 = vld [vmem:[%s10231_s3 + $0x600] ss:$28 sps:$4 sm:$0xff]  }
 0x14b   :  { %2702 = vmatprep.subr.bf16.mxu0 %v7330_v58  ;;  %2866 = vmatprep.subr.bf16.mxu1 %v7333_v60  ;;  %v7388_v58 = vld [vmem:[%s10231_s3 + $0x10] ss:$28 sps:$4 sm:$0xff]   ;;  %v7392_v60 = vld [vmem:[%s10231_s3 + $0x18] ss:$28 sps:$4 sm:$0xff]  }
 0x14c   :  { %v8759_v56 = vpack.c.bf16 %v356_v55, %v356_v55  ;;  %v7448_v55 = vld [vmem:[%s10231_s3 + $0x2b0] ss:$28 sps:$4 sm:$0xff]  }
 0x14e   :  { %2703 = vmatpush1.bf16.msra.mxu0 %v7328_v61  ;;  %2867 = vmatpush1.bf16.msra.mxu1 %v7331_v62  ;;  %v7395_v61 = vld [vmem:[%s10231_s3 + $0x4c] ss:$28 sps:$4 sm:$0xff]  }
 0x14f   :  { %2704 = vmatprep.subr.bf16.mxu0 %v7336_v63  ;;  %2868 = vmatprep.subr.bf16.mxu1 %v7339_v0  ;;  %v7396_v62 = vld [vmem:[%s10231_s3 + $0x210] ss:$28 sps:$4 sm:$0xff]   ;;  %v7393_v63 = vld [vmem:[%s10231_s3 + $0x48] ss:$28 sps:$4 sm:$0xff]  }
 0x150   :  { %v7397_v0 = vld [vmem:[%s10231_s3 + $0x50] ss:$28 sps:$4 sm:$0xff]  }
 0x152   :  { %2705 = vmatpush1.bf16.msra.mxu0 %v7334_v2  ;;  %2869 = vmatpush1.bf16.msra.mxu1 %v7337_v3  ;;  %v7400_v2 = vld [vmem:[%s10231_s3 + $0x84] ss:$28 sps:$4 sm:$0xff]  }
 0x153   :  { %2706 = vmatprep.subr.bf16.mxu0 %v7342_v4  ;;  %2870 = vmatprep.subr.bf16.mxu1 %v7345_v5  ;;  %v7401_v3 = vld [vmem:[%s10231_s3 + $0x248] ss:$28 sps:$4 sm:$0xff]   ;;  %v7398_v4 = vld [vmem:[%s10231_s3 + $0x80] ss:$28 sps:$4 sm:$0xff]  }
 0x154   :  { %v7405_v5 = vld [vmem:[%s10231_s3 + $0xbc] ss:$28 sps:$4 sm:$0xff]  }
 0x156   :  { %2707 = vmatpush1.bf16.msra.mxu0 %v7340_v37  ;;  %2871 = vmatpush1.bf16.msra.mxu1 %v7343_v6  ;;  %v7406_v37 = vld [vmem:[%s10231_s3 + $0x280] ss:$28 sps:$4 sm:$0xff]   ;;  %v7403_v6 = vld [vmem:[%s10231_s3 + $0xb8] ss:$28 sps:$4 sm:$0xff]  }
 0x157   :  { %2708 = vmatprep.subr.bf16.mxu0 %v7348_v7  ;;  %2872 = vmatprep.subr.bf16.mxu1 %v7351_v8  ;;  %v7407_v7 = vld [vmem:[%s10231_s3 + $0xc0] ss:$28 sps:$4 sm:$0xff]   ;;  %v7410_v8 = vld [vmem:[%s10231_s3 + $0xf4] ss:$28 sps:$4 sm:$0xff]  }
 0x15a   :  { %2709 = vmatpush1.bf16.msra.mxu0 %v7346_v9  ;;  %2873 = vmatpush1.bf16.msra.mxu1 %v7349_v10  ;;  %v7411_v9 = vld [vmem:[%s10231_s3 + $0x2b8] ss:$28 sps:$4 sm:$0xff]   ;;  %v7408_v10 = vld [vmem:[%s10231_s3 + $0xf0] ss:$28 sps:$4 sm:$0xff]  }
 0x15b   :  { %2710 = vmatprep.subr.bf16.mxu0 %v7354_v52  ;;  %2874 = vmatprep.subr.bf16.mxu1 %v7357_v11  ;;  %v7412_v52 = vld [vmem:[%s10231_s3 + $0xf8] ss:$28 sps:$4 sm:$0xff]   ;;  %v7415_v11 = vld [vmem:[%s10231_s3 + $0x12c] ss:$28 sps:$4 sm:$0xff]  }
 0x15e   :  { %2711 = vmatpush1.bf16.msra.mxu0 %v7352_v13  ;;  %2875 = vmatpush1.bf16.msra.mxu1 %v7355_v14  ;;  %v7416_v13 = vld [vmem:[%s10231_s3 + $0x2f0] ss:$28 sps:$4 sm:$0xff]   ;;  %v7413_v14 = vld [vmem:[%s10231_s3 + $0x128] ss:$28 sps:$4 sm:$0xff]  }
 0x15f   :  { %2712 = vmatprep.subr.bf16.mxu0 %v7360_v17  ;;  %2876 = vmatprep.subr.bf16.mxu1 %v7363_v19  ;;  %v7417_v17 = vld [vmem:[%s10231_s3 + $0x130] ss:$28 sps:$4 sm:$0xff]   ;;  %v7420_v19 = vld [vmem:[%s10231_s3 + $0x164] ss:$28 sps:$4 sm:$0xff]  }
 0x162   :  { %2713 = vmatpush1.bf16.msra.mxu0 %v7358_v20  ;;  %2877 = vmatpush1.bf16.msra.mxu1 %v7361_v21  ;;  %v7421_v20 = vld [vmem:[%s10231_s3 + $0x328] ss:$28 sps:$4 sm:$0xff]   ;;  %v7418_v21 = vld [vmem:[%s10231_s3 + $0x160] ss:$28 sps:$4 sm:$0xff]  }
 0x163   :  { %2714 = vmatprep.subr.bf16.mxu0 %v7366_v28  ;;  %2878 = vmatprep.subr.bf16.mxu1 %v7369_v29  ;;  %v7425_v28 = vld [vmem:[%s10231_s3 + $0x19c] ss:$28 sps:$4 sm:$0xff]  }
 0x164   :  { %v7426_v29 = vld [vmem:[%s10231_s3 + $0x360] ss:$28 sps:$4 sm:$0xff]  }
 0x166   :  { %2715 = vmatpush1.bf16.msra.mxu0 %v7364_v30  ;;  %2879 = vmatpush1.bf16.msra.mxu1 %v7367_v31  ;;  %v7423_v30 = vld [vmem:[%s10231_s3 + $0x198] ss:$28 sps:$4 sm:$0xff]   ;;  %v7427_v31 = vld [vmem:[%s10231_s3 + $0x1a0] ss:$28 sps:$4 sm:$0xff]  }
 0x167   :  { %2716 = vmatprep.subr.bf16.mxu0 %v7372_v33  ;;  %2880 = vmatprep.subr.bf16.mxu1 %v7375_v34  ;;  %v7431_v33 = vld [vmem:[%s10231_s3 + $0x558] ss:$28 sps:$4 sm:$0xff]   ;;  %v7428_v34 = vld [vmem:[%s10231_s3 + $0x1d0] ss:$28 sps:$4 sm:$0xff]  }
 0x16a   :  { %2717 = vmatpush1.bf16.msra.mxu0 %v7370_v36  ;;  %2881 = vmatpush1.bf16.msra.mxu1 %v7373_v50  ;;  %v7432_v36 = vld [vmem:[%s10231_s3 + $0x398] ss:$28 sps:$4 sm:$0xff]   ;;  %v7435_v50 = vld [vmem:[%s10231_s3 + $0x20c] ss:$28 sps:$4 sm:$0xff]  }
 0x16b   :  { %2727 = vmatprep.subr.bf16.mxu0 %v7378_v39  ;;  %2891 = vmatprep.subr.bf16.mxu1 %v7381_v22  ;;  %v7433_v39 = vld [vmem:[%s10231_s3 + $0x208] ss:$28 sps:$4 sm:$0xff]   ;;  %v7437_v22 = vld [vmem:[%s10231_s3 + $0x3d0] ss:$28 sps:$4 sm:$0xff]  }
 0x16d   :  { %2719 = vmatmul.mubr.bf16.vlgmr.msra.gmra.mrb[8].mxu0 %v8734_v44  ;;  %2883 = vmatmul.mubr.bf16.vlgmr.msra.gmra.mrb[8].mxu1 %v8734_v44 }
 0x16e   :  { %2728 = vmatpush1.bf16.msra.mxu0 %v7376_v41  ;;  %2892 = vmatpush1.bf16.msra.mxu1 %v7379_v43  ;;  %v7441_v41 = vld [vmem:[%s10231_s3 + $0x5c8] ss:$28 sps:$4 sm:$0xff]   ;;  %v7438_v43 = vld [vmem:[%s10231_s3 + $0x240] ss:$28 sps:$4 sm:$0xff]  }
 0x16f   :  { %2729 = vmatprep.subr.bf16.mxu0 %v7384_v45  ;;  %2893 = vmatprep.subr.bf16.mxu1 %v7387_v24  ;;  %v7442_v45 = vld [vmem:[%s10231_s3 + $0x408] ss:$28 sps:$4 sm:$0xff]   ;;  %v7445_v24 = vld [vmem:[%s10231_s3 + $0x27c] ss:$28 sps:$4 sm:$0xff]  }
 0x170   :  { %2759 = vmatprep.mubr.bf16.mxu0 %v7924_v1  ;;  %2923 = vmatprep.mubr.bf16.mxu1 %v7924_v1 }
 0x172   :  { %2730 = vmatpush1.bf16.msra.mxu0 %v7382_v48  ;;  %2894 = vmatpush1.bf16.msra.mxu1 %v7385_v53  ;;  %v7443_v48 = vld [vmem:[%s10231_s3 + $0x278] ss:$28 sps:$4 sm:$0xff]   ;;  %v7447_v53 = vld [vmem:[%s10231_s3 + $0x440] ss:$28 sps:$4 sm:$0xff]  }
 0x173   :  { %2932 = vmatprep.subr.bf16.mxu0 %v7390_v54  ;;  %6677 = vmatprep.subr.bf16.mxu1 %v7391_v59  ;;  %v7450_v54 = vld [vmem:[%s10231_s3 + $0x2b4] ss:$28 sps:$4 sm:$0xff]  }
 0x174   :  { %v7451_v59 = vld [vmem:[%s10231_s3 + $0x638] ss:$28 sps:$4 sm:$0xff]  }
 0x179   :  { %6342 = vmatmul.mubr.msk.bf16.vlgmr.msra.gmra.mrb[8].mxu0 %vm183_vm0, %v8759_v56  ;;  %6343 = vmatmul.mubr.msk.bf16.vlgmr.msra.gmra.mrb[8].mxu1 %vm183_vm0, %v8759_v56 }
 0x17a   :  { %2933 = vmatpush1.bf16.msra.mxu0 %v7388_v58  ;;  %6678 = vmatpush3.bf16.msra.mxu1 %v7392_v60  ;;  %v7452_v58 = vld [vmem:[%s10231_s3 + $0x478] ss:$28 sps:$4 sm:$0xff]   ;;  %v7455_v60 = vld [vmem:[%s10231_s3 + $0x2ec] ss:$28 sps:$4 sm:$0xff]  }
 0x17b   :  { %2964 = vmatprep.mubr.bf16.mxu0 %v8295_v42  ;;  %3128 = vmatprep.mubr.bf16.mxu1 %v8295_v42  ;;  %v7402_v42 = vld [vmem:[%s10231_s3 + $0x88] ss:$28 sps:$4 sm:$0xff]  }
 0x17c   :  { %2934 = vmatprep.subr.bf16.mxu0 %v7395_v61  ;;  %6679 = vmatprep.subr.bf16.mxu1 %v7396_v62  ;;  %v7456_v61 = vld [vmem:[%s10231_s3 + $0x670] ss:$28 sps:$4 sm:$0xff]   ;;  %v7453_v62 = vld [vmem:[%s10231_s3 + $0x2e8] ss:$28 sps:$4 sm:$0xff]  }
 0x17e   :  { %2935 = vmatpush1.bf16.msra.mxu0 %v7393_v63  ;;  %6680 = vmatpush3.bf16.msra.mxu1 %v7397_v0  ;;  %v7457_v63 = vld [vmem:[%s10231_s3 + $0x4b0] ss:$28 sps:$4 sm:$0xff]   ;;  %v7460_v0 = vld [vmem:[%s10231_s3 + $0x324] ss:$28 sps:$4 sm:$0xff]  }
 0x17f   :  { %2936 = vmatprep.subr.bf16.mxu0 %v7400_v2  ;;  %6681 = vmatprep.subr.bf16.mxu1 %v7401_v3  ;;  %v7461_v2 = vld [vmem:[%s10231_s3 + $0x6a8] ss:$28 sps:$4 sm:$0xff]   ;;  %v7458_v3 = vld [vmem:[%s10231_s3 + $0x320] ss:$28 sps:$4 sm:$0xff]  }
 0x182   :  { %2937 = vmatpush1.bf16.msra.mxu0 %v7398_v4  ;;  %6682 = vmatpush3.bf16.msra.mxu1 %v7402_v42  ;;  %v7462_v4 = vld [vmem:[%s10231_s3 + $0x4e8] ss:$28 sps:$4 sm:$0xff]   ;;  %v7465_v42 = vld [vmem:[%s10231_s3 + $0x35c] ss:$28 sps:$4 sm:$0xff]  }
 0x183   :  { %2938 = vmatprep.subr.bf16.mxu0 %v7405_v5  ;;  %6683 = vmatprep.subr.bf16.mxu1 %v7406_v37  ;;  %v7466_v5 = vld [vmem:[%s10231_s3 + $0x6e0] ss:$28 sps:$4 sm:$0xff]   ;;  %v7463_v37 = vld [vmem:[%s10231_s3 + $0x358] ss:$28 sps:$4 sm:$0xff]  }
 0x186   :  { %2939 = vmatpush1.bf16.msra.mxu0 %v7403_v6  ;;  %6684 = vmatpush3.bf16.msra.mxu1 %v7407_v7  ;;  %v7467_v6 = vld [vmem:[%s10231_s3 + $0x520] ss:$28 sps:$4 sm:$0xff]   ;;  %v7470_v7 = vld [vmem:[%s10231_s3 + $0x394] ss:$28 sps:$4 sm:$0xff]  }
 0x187   :  { %2940 = vmatprep.subr.bf16.mxu0 %v7410_v8  ;;  %6685 = vmatprep.subr.bf16.mxu1 %v7411_v9  ;;  %v7471_v8 = vld [vmem:[%s10231_s3 + $0x8d8] ss:$28 sps:$4 sm:$0xff]   ;;  %v7468_v9 = vld [vmem:[%s10231_s3 + $0x390] ss:$28 sps:$4 sm:$0xff]  }
 0x18a   :  { %2941 = vmatpush1.bf16.msra.mxu0 %v7408_v10  ;;  %6686 = vmatpush3.bf16.msra.mxu1 %v7412_v52  ;;  %v7472_v10 = vld [vmem:[%s10231_s3 + $0x718] ss:$28 sps:$4 sm:$0xff]   ;;  %v7475_v52 = vld [vmem:[%s10231_s3 + $0x3cc] ss:$28 sps:$4 sm:$0xff]  }
 0x18b   :  { %2942 = vmatprep.subr.bf16.mxu0 %v7415_v11  ;;  %6687 = vmatprep.subr.bf16.mxu1 %v7416_v13  ;;  %v7476_v11 = vld [vmem:[%s10231_s3 + $0x910] ss:$28 sps:$4 sm:$0xff]   ;;  %v7473_v13 = vld [vmem:[%s10231_s3 + $0x3c8] ss:$28 sps:$4 sm:$0xff]  }
 0x18e   :  { %2943 = vmatpush1.bf16.msra.mxu0 %v7413_v14  ;;  %6688 = vmatpush3.bf16.msra.mxu1 %v7417_v17  ;;  %v7477_v14 = vld [vmem:[%s10231_s3 + $0x750] ss:$28 sps:$4 sm:$0xff]   ;;  %v7480_v17 = vld [vmem:[%s10231_s3 + $0x404] ss:$28 sps:$4 sm:$0xff]  }
 0x18f   :  { %2944 = vmatprep.subr.bf16.mxu0 %v7420_v19  ;;  %6689 = vmatprep.subr.bf16.mxu1 %v7421_v20  ;;  %v7482_v19 = vld [vmem:[%s10231_s3 + $0x788] ss:$28 sps:$4 sm:$0xff]   ;;  %v7485_v20 = vld [vmem:[%s10231_s3 + $0x43c] ss:$28 sps:$4 sm:$0xff]  }
 0x192   :  { %2945 = vmatpush1.bf16.msra.mxu0 %v7418_v21  ;;  %6690 = vmatpush3.bf16.msra.mxu1 %v7422_v26  ;;  %v7486_v21 = vld [vmem:[%s10231_s3 + $0x980] ss:$28 sps:$4 sm:$0xff]   ;;  %v7483_v26 = vld [vmem:[%s10231_s3 + $0x438] ss:$28 sps:$4 sm:$0xff]  }
 0x193   :  { %2946 = vmatprep.subr.bf16.mxu0 %v7425_v28  ;;  %6691 = vmatprep.subr.bf16.mxu1 %v7426_v29  ;;  %v7487_v28 = vld [vmem:[%s10231_s3 + $0x7c0] ss:$28 sps:$4 sm:$0xff]   ;;  %v7490_v29 = vld [vmem:[%s10231_s3 + $0x474] ss:$28 sps:$4 sm:$0xff]  }
 0x196   :  { %2947 = vmatpush1.bf16.msra.mxu0 %v7423_v30  ;;  %6692 = vmatpush3.bf16.msra.mxu1 %v7427_v31  ;;  %v7491_v30 = vld [vmem:[%s10231_s3 + $0x9b8] ss:$28 sps:$4 sm:$0xff]   ;;  %v7488_v31 = vld [vmem:[%s10231_s3 + $0x470] ss:$28 sps:$4 sm:$0xff]  }
 0x197   :  { %2948 = vmatprep.subr.bf16.mxu0 %v7430_v32  ;;  %6699 = vmatprep.subr.bf16.mxu1 %v7431_v33  ;;  %v7492_v32 = vld [vmem:[%s10231_s3 + $0x7f8] ss:$28 sps:$4 sm:$0xff]   ;;  %v7495_v33 = vld [vmem:[%s10231_s3 + $0x4ac] ss:$28 sps:$4 sm:$0xff]  }
 0x199   :  { %3129 = vmatmul.mubr.bf16.vlgmr.msra.gmra.mrb[12].mxu1 %v8303_v46 }
 0x19a   :  { %2949 = vmatpush1.bf16.msra.mxu0 %v7428_v34  ;;  %6700 = vmatpush3.bf16.msra.mxu1 %v7432_v36  ;;  %v7496_v34 = vld [vmem:[%s10231_s3 + $0x9f0] ss:$28 sps:$4 sm:$0xff]   ;;  %v7493_v36 = vld [vmem:[%s10231_s3 + $0x4a8] ss:$28 sps:$4 sm:$0xff]  }
 0x19b   :  { %3168 = vmatprep.mubr.bf16.mxu1 %v8317_v51  ;;  %2950 = vmatprep.subr.bf16.mxu0 %v7435_v50  ;;  %v7497_v50 = vld [vmem:[%s10231_s3 + $0x830] ss:$28 sps:$4 sm:$0xff]  }
 0x19c   :  { %6701 = vmatprep.subr.bf16.mxu1 %v7436_v38  ;;  %v7500_v38 = vld [vmem:[%s10231_s3 + $0x4e4] ss:$28 sps:$4 sm:$0xff]  }
 0x19e   :  { %2951 = vmatpush1.bf16.msra.mxu0 %v7433_v39  ;;  %6702 = vmatpush3.bf16.msra.mxu1 %v7437_v22  ;;  %v7501_v39 = vld [vmem:[%s10231_s3 + $0xa28] ss:$28 sps:$4 sm:$0xff]   ;;  %v7498_v22 = vld [vmem:[%s10231_s3 + $0x4e0] ss:$28 sps:$4 sm:$0xff]  }
 0x19f   :  { %2952 = vmatprep.subr.bf16.mxu0 %v7440_v40  ;;  %6703 = vmatprep.subr.bf16.mxu1 %v7441_v41  ;;  %v7502_v40 = vld [vmem:[%s10231_s3 + $0x868] ss:$28 sps:$4 sm:$0xff]   ;;  %v7505_v41 = vld [vmem:[%s10231_s3 + $0x51c] ss:$28 sps:$4 sm:$0xff]  }
 0x1a2   :  { %2953 = vmatpush1.bf16.msra.mxu0 %v7438_v43  ;;  %6704 = vmatpush3.bf16.msra.mxu1 %v7442_v45  ;;  %v7506_v43 = vld [vmem:[%s10231_s3 + $0xa60] ss:$28 sps:$4 sm:$0xff]   ;;  %v7503_v45 = vld [vmem:[%s10231_s3 + $0x518] ss:$28 sps:$4 sm:$0xff]  }
 0x1a3   :  { %2954 = vmatprep.subr.bf16.mxu0 %v7445_v24  ;;  %6705 = vmatprep.subr.bf16.mxu1 %v7446_v47  ;;  %v7507_v24 = vld [vmem:[%s10231_s3 + $0x8a0] ss:$28 sps:$4 sm:$0xff]   ;;  %v7510_v47 = vld [vmem:[%s10231_s3 + $0x554] ss:$28 sps:$4 sm:$0xff]  }
 0x1a6   :  { %2955 = vmatpush1.bf16.msra.mxu0 %v7443_v48  ;;  %6706 = vmatpush3.bf16.msra.mxu1 %v7447_v53  ;;  %v7508_v48 = vld [vmem:[%s10231_s3 + $0x550] ss:$28 sps:$4 sm:$0xff]   ;;  %v7511_v53 = vld [vmem:[%s10231_s3 + $0xa98] ss:$28 sps:$4 sm:$0xff]  }
 0x1a7   :  { %2956 = vmatprep.subr.bf16.mxu0 %v7450_v54  ;;  %6707 = vmatprep.subr.bf16.mxu1 %v7451_v59  ;;  %v7514_v54 = vld [vmem:[%s10231_s3 + $0x58c] ss:$28 sps:$4 sm:$0xff]  }
 0x1a8   :  { %v7512_v59 = vld [vmem:[%s10231_s3 + $0x588] ss:$28 sps:$4 sm:$0xff]  }
 0x1aa   :  { %2957 = vmatpush1.bf16.msra.mxu0 %v7448_v55  ;;  %6708 = vmatpush3.bf16.msra.mxu1 %v7452_v58  ;;  %v7515_v55 = vld [vmem:[%s10231_s3 + $0xad0] ss:$28 sps:$4 sm:$0xff]   ;;  %v7518_v58 = vld [vmem:[%s10231_s3 + $0x5c4] ss:$28 sps:$4 sm:$0xff]  }
 0x1ab   :  { %2958 = vmatprep.subr.bf16.mxu0 %v7455_v60  ;;  %6709 = vmatprep.subr.bf16.mxu1 %v7456_v61  ;;  %v7560_v60 = vld [vmem:[%s10233_s5 + $0x4] ss:$8 sps:$4 sm:$0xff]   ;;  %v7516_v61 = vld [vmem:[%s10231_s3 + $0x5c0] ss:$28 sps:$4 sm:$0xff]  }
 0x1ae   :  { %2959 = vmatpush1.bf16.msra.mxu0 %v7453_v62  ;;  %6710 = vmatpush3.bf16.msra.mxu1 %v7457_v63  ;;  %v7521_v62 = vld [vmem:[%s10231_s3 + $0x5fc] ss:$28 sps:$4 sm:$0xff]   ;;  %v7558_v63 = vld [vmem:[%s10233_s5] ss:$8 sps:$4 sm:$0xff]  }
 0x1af   :  { %2960 = vmatprep.subr.bf16.mxu0 %v7460_v0  ;;  %6711 = vmatprep.subr.bf16.mxu1 %v7461_v2  ;;  %v7566_v0 = vld [vmem:[%s10233_s5 + $0x14] ss:$8 sps:$4 sm:$0xff]  }
 0x1b0   :  { %v7519_v2 = vld [vmem:[%s10231_s3 + $0x5f8] ss:$28 sps:$4 sm:$0xff]  }
 0x1b2   :  { %2961 = vmatpush1.bf16.msra.mxu0 %v7458_v3  ;;  %6712 = vmatpush3.bf16.msra.mxu1 %v7462_v4  ;;  %v7524_v3 = vld [vmem:[%s10231_s3 + $0x634] ss:$28 sps:$4 sm:$0xff]  }
 0x1b3   :  { %2962 = vmatprep.subr.bf16.mxu0 %v7465_v42  ;;  %6713 = vmatprep.subr.bf16.mxu1 %v7466_v5  ;;  %v7564_v4 = vld [vmem:[%s10233_s5 + $0x10] ss:$8 sps:$4 sm:$0xff]   ;;  %v7572_v42 = vld [vmem:[%s10233_s5 + $0x24] ss:$8 sps:$4 sm:$0xff]  }
 0x1b4   :  { %v7522_v5 = vld [vmem:[%s10231_s3 + $0x630] ss:$28 sps:$4 sm:$0xff]  }
 0x1b6   :  { %2963 = vmatpush1.bf16.msra.mxu0 %v7463_v37  ;;  %6714 = vmatpush3.bf16.msra.mxu1 %v7467_v6  ;;  %v7527_v37 = vld [vmem:[%s10231_s3 + $0x66c] ss:$28 sps:$4 sm:$0xff]  }
 0x1b7   :  { %2973 = vmatprep.subr.bf16.mxu0 %v7470_v7  ;;  %6721 = vmatprep.subr.bf16.mxu1 %v7471_v8  ;;  %v7570_v6 = vld [vmem:[%s10233_s5 + $0x20] ss:$8 sps:$4 sm:$0xff]   ;;  %v7578_v7 = vld [vmem:[%s10233_s5 + $0x34] ss:$8 sps:$4 sm:$0xff]  }
 0x1b8   :  { %v7525_v8 = vld [vmem:[%s10231_s3 + $0x668] ss:$28 sps:$4 sm:$0xff]  }
 0x1b9   :  { %2965 = vmatmul.mubr.bf16.vlgmr.msra.gmra.mrb[12].mxu0 %v8303_v46  ;;  %3169 = vmatmul.mubr.bf16.vlgmr.msra.gmra.mrb[16].mxu1 %v8517_v12  ;;  %v7481_v46 = vld [vmem:[%s10231_s3 + $0x948] ss:$28 sps:$4 sm:$0xff]  }
 0x1ba   :  { %2974 = vmatpush1.bf16.msra.mxu0 %v7468_v9  ;;  %3005 = vmatprep.mubr.bf16.mxu0 %v8317_v51  ;;  %v7478_v51 = vld [vmem:[%s10231_s3 + $0x400] ss:$28 sps:$4 sm:$0xff]  }
 0x1bb   :  { %6722 = vmatpush3.bf16.msra.mxu1 %v7472_v10  ;;  %3208 = vmatprep.mubr.bf16.mxu1 %v8531_v18  ;;  %v7530_v9 = vld [vmem:[%s10231_s3 + $0x6a4] ss:$28 sps:$4 sm:$0xff]   ;;  %v7576_v10 = vld [vmem:[%s10233_s5 + $0x30] ss:$8 sps:$4 sm:$0xff]  }
 0x1bc   :  { %2975 = vmatprep.subr.bf16.mxu0 %v7475_v52  ;;  %6723 = vmatprep.subr.bf16.mxu1 %v7476_v11  ;;  %v7584_v52 = vld [vmem:[%s10233_s5 + $0x44] ss:$8 sps:$4 sm:$0xff]   ;;  %v7528_v11 = vld [vmem:[%s10231_s3 + $0x6a0] ss:$28 sps:$4 sm:$0xff]  }
 0x1be   :  { %2976 = vmatpush1.bf16.msra.mxu0 %v7473_v13  ;;  %v7533_v13 = vld [vmem:[%s10231_s3 + $0x6dc] ss:$28 sps:$4 sm:$0xff]  }
 0x1bf   :  { %6724 = vmatpush3.bf16.msra.mxu1 %v7477_v14  ;;  %2977 = vmatprep.subr.bf16.mxu0 %v7480_v17  ;;  %v7582_v14 = vld [vmem:[%s10233_s5 + $0x40] ss:$8 sps:$4 sm:$0xff]   ;;  %v7590_v17 = vld [vmem:[%s10233_s5 + $0x54] ss:$8 sps:$4 sm:$0xff]  }
 0x1c0   :  { %6725 = vmatprep.subr.bf16.mxu1 %v7481_v46  ;;  %v7531_v46 = vld [vmem:[%s10231_s3 + $0x6d8] ss:$28 sps:$4 sm:$0xff]  }
 0x1c2   :  { %2978 = vmatpush1.bf16.msra.mxu0 %v7478_v51  ;;  %v7536_v51 = vld [vmem:[%s10231_s3 + $0x714] ss:$28 sps:$4 sm:$0xff]  }
 0x1c3   :  { %6726 = vmatpush3.bf16.msra.mxu1 %v7482_v19  ;;  %2979 = vmatprep.subr.bf16.mxu0 %v7485_v20  ;;  %v7588_v19 = vld [vmem:[%s10233_s5 + $0x50] ss:$8 sps:$4 sm:$0xff]   ;;  %v7596_v20 = vld [vmem:[%s10233_s5 + $0x64] ss:$8 sps:$4 sm:$0xff]  }
 0x1c4   :  { %6727 = vmatprep.subr.bf16.mxu1 %v7486_v21  ;;  %v7534_v21 = vld [vmem:[%s10231_s3 + $0x710] ss:$28 sps:$4 sm:$0xff]  }
 0x1c6   :  { %2980 = vmatpush1.bf16.msra.mxu0 %v7483_v26  ;;  %v7539_v26 = vld [vmem:[%s10231_s3 + $0x74c] ss:$28 sps:$4 sm:$0xff]  }
 0x1c7   :  { %6728 = vmatpush3.bf16.msra.mxu1 %v7487_v28  ;;  %2981 = vmatprep.subr.bf16.mxu0 %v7490_v29  ;;  %v7594_v28 = vld [vmem:[%s10233_s5 + $0x60] ss:$8 sps:$4 sm:$0xff]   ;;  %v7602_v29 = vld [vmem:[%s10233_s5 + $0x74] ss:$8 sps:$4 sm:$0xff]  }
 0x1c8   :  { %6729 = vmatprep.subr.bf16.mxu1 %v7491_v30  ;;  %v7537_v30 = vld [vmem:[%s10231_s3 + $0x748] ss:$28 sps:$4 sm:$0xff]  }
 0x1ca   :  { %2982 = vmatpush1.bf16.msra.mxu0 %v7488_v31  ;;  %v7542_v31 = vld [vmem:[%s10231_s3 + $0x784] ss:$28 sps:$4 sm:$0xff]  }
 0x1cb   :  { %6730 = vmatpush3.bf16.msra.mxu1 %v7492_v32  ;;  %2983 = vmatprep.subr.bf16.mxu0 %v7495_v33  ;;  %v7600_v32 = vld [vmem:[%s10233_s5 + $0x70] ss:$8 sps:$4 sm:$0xff]  }
 0x1cc   :  { %6731 = vmatprep.subr.bf16.mxu1 %v7496_v34  ;;  %v7545_v33 = vld [vmem:[%s10231_s3 + $0x7bc] ss:$28 sps:$4 sm:$0xff]   ;;  %v7606_v34 = vld [vmem:[%s10233_s5 + $0x80] ss:$8 sps:$4 sm:$0xff]  }
 0x1ce   :  { %2984 = vmatpush1.bf16.msra.mxu0 %v7493_v36  ;;  %v7614_v36 = vld [vmem:[%s10233_s5 + $0x94] ss:$8 sps:$4 sm:$0xff]  }
 0x1cf   :  { %6732 = vmatpush3.bf16.msra.mxu1 %v7497_v50  ;;  %2985 = vmatprep.subr.bf16.mxu0 %v7500_v38  ;;  %v7543_v50 = vld [vmem:[%s10231_s3 + $0x7b8] ss:$28 sps:$4 sm:$0xff]  }
 0x1d0   :  { %6733 = vmatprep.subr.bf16.mxu1 %v7501_v39  ;;  %v7548_v38 = vld [vmem:[%s10231_s3 + $0x7f4] ss:$28 sps:$4 sm:$0xff]  }
 0x1d1   :  { %v7612_v39 = vld [vmem:[%s10233_s5 + $0x90] ss:$8 sps:$4 sm:$0xff]  }
 0x1d2   :  { %2986 = vmatpush1.bf16.msra.mxu0 %v7498_v22  ;;  %v7617_v22 = vld [vmem:[%s10233_s5 + $0xa4] ss:$8 sps:$4 sm:$0xff]  }
 0x1d3   :  { %6734 = vmatpush3.bf16.msra.mxu1 %v7502_v40  ;;  %2987 = vmatprep.subr.bf16.mxu0 %v7505_v41  ;;  %v7546_v40 = vld [vmem:[%s10231_s3 + $0x7f0] ss:$28 sps:$4 sm:$0xff]  }
 0x1d4   :  { %6735 = vmatprep.subr.bf16.mxu1 %v7506_v43  ;;  %v7551_v41 = vld [vmem:[%s10231_s3 + $0x82c] ss:$28 sps:$4 sm:$0xff]  }
 0x1d5   :  { %v7615_v43 = vld [vmem:[%s10233_s5 + $0xa0] ss:$8 sps:$4 sm:$0xff]  }
 0x1d6   :  { %2988 = vmatpush1.bf16.msra.mxu0 %v7503_v45  ;;  %v7623_v45 = vld [vmem:[%s10233_s5 + $0xb4] ss:$8 sps:$4 sm:$0xff]  }
 0x1d7   :  { %6736 = vmatpush3.bf16.msra.mxu1 %v7507_v24  ;;  %2989 = vmatprep.subr.bf16.mxu0 %v7510_v47  ;;  %v7549_v24 = vld [vmem:[%s10231_s3 + $0x828] ss:$28 sps:$4 sm:$0xff]  }
 0x1d8   :  { %6921 = vmatprep.subr.bf16.mxu1 %v7925_v15  ;;  %v7554_v47 = vld [vmem:[%s10231_s3 + $0x864] ss:$28 sps:$4 sm:$0xff]  }
 0x1da   :  { %3209 = vmatmul.mubr.bf16.vlgmr.msra.gmra.mrb[20].mxu1 %v8734_v44  ;;  %2990 = vmatpush1.bf16.msra.mxu0 %v7508_v48  ;;  %v7621_v48 = vld [vmem:[%s10233_s5 + $0xb0] ss:$8 sps:$4 sm:$0xff]  }
 0x1db   :  { %6922 = vmatpush3.bf16.msra.mxu1 %v7511_v53  ;;  %2991 = vmatprep.subr.bf16.mxu0 %v7514_v54  ;;  %v7626_v53 = vld [vmem:[%s10233_s5 + $0xc4] ss:$8 sps:$4 sm:$0xff]   ;;  %v7552_v54 = vld [vmem:[%s10231_s3 + $0x860] ss:$28 sps:$4 sm:$0xff]  }
 0x1dc   :  { %6923 = vmatprep.subr.bf16.mxu1 %v7925_v15  ;;  %6925 = vmatprep.mubr.msk.bf16.mxu1 %vm7926_vm1, %v7925_v15 }
 0x1de   :  { %2992 = vmatpush1.bf16.msra.mxu0 %v7512_v59  ;;  %v7557_v59 = vld [vmem:[%s10231_s3 + $0x89c] ss:$28 sps:$4 sm:$0xff]  }
 0x1df   :  { %6924 = vmatpush3.bf16.msra.mxu1 %v7515_v55  ;;  %2993 = vmatprep.subr.bf16.mxu0 %v7518_v58  ;;  %v7624_v55 = vld [vmem:[%s10233_s5 + $0xc0] ss:$8 sps:$4 sm:$0xff]   ;;  %v7629_v58 = vld [vmem:[%s10233_s5 + $0xd4] ss:$8 sps:$4 sm:$0xff]  }
 0x1e0   :  { %3885 = vmatprep.subr.bf16.mxu1 %v7560_v60  ;;  %v7555_v60 = vld [vmem:[%s10231_s3 + $0x898] ss:$28 sps:$4 sm:$0xff]  }
 0x1e2   :  { %6926 = vmatmul.mubr.msk.bf16.vlgmr.msra.gmra.mrb[24].mxu1 %vm183_vm0, %v8759_v56  ;;  %2994 = vmatpush1.bf16.msra.mxu0 %v7516_v61  ;;  %v7563_v61 = vld [vmem:[%s10231_s3 + $0x8d4] ss:$28 sps:$4 sm:$0xff]  }
 0x1e3   :  { %2995 = vmatprep.subr.bf16.mxu0 %v7521_v62  ;;  %3886 = vmatpush1.bf16.msra.mxu1 %v7558_v63  ;;  %v7627_v62 = vld [vmem:[%s10233_s5 + $0xd0] ss:$8 sps:$4 sm:$0xff]   ;;  %v7632_v63 = vld [vmem:[%s10233_s5 + $0xe4] ss:$8 sps:$4 sm:$0xff]  }
 0x1e4   :  { %3887 = vmatprep.subr.bf16.mxu1 %v7566_v0  ;;  %v7561_v0 = vld [vmem:[%s10231_s3 + $0x8d0] ss:$28 sps:$4 sm:$0xff]  }
 0x1e6   :  { %2996 = vmatpush1.bf16.msra.mxu0 %v7519_v2  ;;  %v7569_v2 = vld [vmem:[%s10231_s3 + $0x90c] ss:$28 sps:$4 sm:$0xff]  }
 0x1e7   :  { %2997 = vmatprep.subr.bf16.mxu0 %v7524_v3  ;;  %3888 = vmatpush1.bf16.msra.mxu1 %v7564_v4  ;;  %v7630_v3 = vld [vmem:[%s10233_s5 + $0xe0] ss:$8 sps:$4 sm:$0xff]   ;;  %v7635_v4 = vld [vmem:[%s10233_s5 + $0xf4] ss:$8 sps:$4 sm:$0xff]  }
 0x1e8   :  { %3889 = vmatprep.subr.bf16.mxu1 %v7572_v42  ;;  %v7567_v42 = vld [vmem:[%s10231_s3 + $0x908] ss:$28 sps:$4 sm:$0xff]  }
 0x1ea   :  { %2998 = vmatpush1.bf16.msra.mxu0 %v7522_v5  ;;  %v7575_v5 = vld [vmem:[%s10231_s3 + $0x944] ss:$28 sps:$4 sm:$0xff]  }
 0x1eb   :  { %2999 = vmatprep.subr.bf16.mxu0 %v7527_v37  ;;  %3890 = vmatpush1.bf16.msra.mxu1 %v7570_v6  ;;  %v7633_v37 = vld [vmem:[%s10233_s5 + $0xf0] ss:$8 sps:$4 sm:$0xff]   ;;  %v7638_v6 = vld [vmem:[%s10233_s5 + $0x104] ss:$8 sps:$4 sm:$0xff]  }
 0x1ec   :  { %3891 = vmatprep.subr.bf16.mxu1 %v7578_v7  ;;  %v7573_v7 = vld [vmem:[%s10231_s3 + $0x940] ss:$28 sps:$4 sm:$0xff]  }
 0x1ee   :  { %3000 = vmatpush1.bf16.msra.mxu0 %v7525_v8  ;;  %v7581_v8 = vld [vmem:[%s10231_s3 + $0x97c] ss:$28 sps:$4 sm:$0xff]  }
 0x1ef   :  { %3001 = vmatprep.subr.bf16.mxu0 %v7530_v9  ;;  %3892 = vmatpush1.bf16.msra.mxu1 %v7576_v10  ;;  %v7579_v9 = vld [vmem:[%s10231_s3 + $0x978] ss:$28 sps:$4 sm:$0xff]  }
 0x1f0   :  { %3893 = vmatprep.subr.bf16.mxu1 %v7584_v52  ;;  %v7587_v10 = vld [vmem:[%s10231_s3 + $0x9b4] ss:$28 sps:$4 sm:$0xff]  }
 0x1f1   :  { %v7585_v52 = vld [vmem:[%s10231_s3 + $0x9b0] ss:$28 sps:$4 sm:$0xff]  }
 0x1f2   :  { %3002 = vmatpush1.bf16.msra.mxu0 %v7528_v11  ;;  %v7593_v11 = vld [vmem:[%s10231_s3 + $0x9ec] ss:$28 sps:$4 sm:$0xff]  }
 0x1f3   :  { %3003 = vmatprep.subr.bf16.mxu0 %v7533_v13  ;;  %3894 = vmatpush1.bf16.msra.mxu1 %v7582_v14  ;;  %v7591_v13 = vld [vmem:[%s10231_s3 + $0x9e8] ss:$28 sps:$4 sm:$0xff]  }
 0x1f4   :  { %3895 = vmatprep.subr.bf16.mxu1 %v7590_v17  ;;  %v7599_v14 = vld [vmem:[%s10231_s3 + $0xa24] ss:$28 sps:$4 sm:$0xff]  }
 0x1f5   :  { %v7597_v17 = vld [vmem:[%s10231_s3 + $0xa20] ss:$28 sps:$4 sm:$0xff]  }
 0x1f6   :  { %3004 = vmatpush1.bf16.msra.mxu0 %v7531_v46  ;;  %v7605_v46 = vld [vmem:[%s10231_s3 + $0xa5c] ss:$28 sps:$4 sm:$0xff]  }
 0x1f7   :  { %3014 = vmatprep.subr.bf16.mxu0 %v7536_v51  ;;  %3896 = vmatpush1.bf16.msra.mxu1 %v7588_v19  ;;  %v9313_v51 = vld [vmem:[%s10234_s8] sm:$0x1] }
 0x1f8   :  { %3897 = vmatprep.subr.bf16.mxu1 %v7596_v20  ;;  %v4071_v19 = vand.u32 2147483647, %v9313_v51  ;;  %v7603_v20 = vld [vmem:[%s10231_s3 + $0xa58] ss:$28 sps:$4 sm:$0xff]  }
 0x1f9   :  { %3006 = vmatmul.mubr.bf16.vlgmr.msra.gmra.mrb[12].mxu0 %v8517_v12  ;;  %v7608_v12 = vld [vmem:[%s10233_s5 + $0x84] ss:$8 sps:$4 sm:$0xff]  }
 0x1fa   :  { %3015 = vmatpush1.bf16.msra.mxu0 %v7534_v21  ;;  %3046 = vmatprep.mubr.bf16.mxu0 %v8531_v18  ;;  %v7540_v18 = vld [vmem:[%s10231_s3 + $0x780] ss:$28 sps:$4 sm:$0xff]   ;;  %v7611_v21 = vld [vmem:[%s10231_s3 + $0xa94] ss:$28 sps:$4 sm:$0xff]  }
 0x1fb   :  { %3016 = vmatprep.subr.bf16.mxu0 %v7539_v26  ;;  %3898 = vmatpush1.bf16.msra.mxu1 %v7594_v28  ;;  %v4072_v26 = vsub.f32 0.0, %v4071_v19 }
 0x1fc   :  { %3899 = vmatprep.subr.bf16.mxu1 %v7602_v29  ;;  %v7609_v29 = vld [vmem:[%s10231_s3 + $0xa90] ss:$28 sps:$4 sm:$0xff]  }
 0x1fd   :  { %v4073_v28 = vmul.f32 1.442695, %v4072_v26  ;;  %v7714_v26 = vld [vmem:[%s10235_s9 + $0x30] sm:$0xff]  }
 0x1fe   :  { %3017 = vmatpush1.bf16.msra.mxu0 %v7537_v30  ;;  %v7620_v30 = vld [vmem:[%s10231_s3 + $0xacc] ss:$28 sps:$4 sm:$0xff]  }
 0x1ff   :  { %3018 = vmatprep.subr.bf16.mxu0 %v7542_v31  ;;  %3900 = vmatpush1.bf16.msra.mxu1 %v7600_v32  ;;  %7876 = vpow2.f32 %v4073_v28  ;;  %v7618_v31 = vld [vmem:[%s10231_s3 + $0xac8] ss:$28 sps:$4 sm:$0xff]   ;;  %v7645_v28 = vld [vmem:[%s10233_s5 + $0x130] ss:$8 sps:$4 sm:$0xff]  }
 0x200   :  { %3901 = vmatprep.subr.bf16.mxu1 %v7608_v12  ;;  %v7690_v12 = vld [vmem:[%s10235_s9] sm:$0xff]  }
 0x202   :  { %3019 = vmatpush1.bf16.msra.mxu0 %v7540_v18 }
 0x203   :  { %3020 = vmatprep.subr.bf16.mxu0 %v7545_v33  ;;  %3902 = vmatpush1.bf16.msra.mxu1 %v7606_v34  ;;  %v7694_v33 = vld [vmem:[%s10235_s9 + $0x8] sm:$0xff]   ;;  %v9353_v34 = vld [vmem:[%s10237_s7] sm:$0x1] }
 0x204   :  { %3903 = vmatprep.subr.bf16.mxu1 %v7614_v36  ;;  %v4060_v36 = vand.u32 2147483647, %v9353_v34 }
 0x206   :  { %3021 = vmatpush1.bf16.msra.mxu0 %v7543_v50 }
 0x207   :  { %3022 = vmatprep.subr.bf16.mxu0 %v7548_v38  ;;  %3904 = vmatpush1.bf16.msra.mxu1 %v7612_v39  ;;  %v7698_v39 = vld [vmem:[%s10235_s9 + $0x10] sm:$0xff]  }
 0x208   :  { %3905 = vmatprep.subr.bf16.mxu1 %v7617_v22  ;;  %v4080_v22 = vld [vmem:[%s10238_s10] sm:$0xff] }
 0x209   :  { %v7877_v32 = vpop.eup %7876 }
 0x20a   :  { %3023 = vmatpush1.bf16.msra.mxu0 %v7546_v40  ;;  %v4075_v18 = vadd.f32 1.0, %v7877_v32  ;;  %v4061_v40 = vsub.f32 0.0, %v4060_v36  ;;  %v4059_v36 = vmax.f32 %v9353_v34, 0.0  ;;  %v7659_v34 = vld [vmem:[%s10233_s5 + $0x174] ss:$8 sps:$4 sm:$0xff]  }
 0x20b   :  { %3024 = vmatprep.subr.bf16.mxu0 %v7551_v41  ;;  %3906 = vmatpush1.bf16.msra.mxu1 %v7615_v43 }
 0x20c   :  { %3907 = vmatprep.subr.bf16.mxu1 %v7623_v45  ;;  %7878 = vlog2.f32 %v4075_v18  ;;  %v4070_v45 = vmax.f32 %v9313_v51, 0.0  ;;  %v7642_v51 = vld [vmem:[%s10233_s5 + $0x120] ss:$8 sps:$4 sm:$0xff]  }
 0x20e   :  { %3025 = vmatpush1.bf16.msra.mxu0 %v7549_v24 }
 0x20f   :  { %3026 = vmatprep.subr.bf16.mxu0 %v7554_v47  ;;  %3908 = vmatpush1.bf16.msra.mxu1 %v7621_v48 }
 0x210   :  { %3909 = vmatprep.subr.bf16.mxu1 %v7626_v53  ;;  %v4062_v53 = vmul.f32 1.442695, %v4061_v40 }
 0x212   :  { %3027 = vmatpush1.bf16.msra.mxu0 %v7552_v54  ;;  %v4081_v54 = vadd.f32 1e-16, %v4080_v22  ;;  %7880 = vpow2.f32 %v4062_v53 }
 0x213   :  { %3028 = vmatprep.subr.bf16.mxu0 %v7557_v59  ;;  %3910 = vmatpush1.bf16.msra.mxu1 %v7624_v55 }
 0x214   :  { %3911 = vmatprep.subr.bf16.mxu1 %v7629_v58  ;;  %7882 = vlog2.f32 %v4081_v54  ;;  %v7657_v54 = vld [vmem:[%s10233_s5 + $0x170] ss:$8 sps:$4 sm:$0xff]  }
 0x216   :  { %3029 = vmatpush1.bf16.msra.mxu0 %v7555_v60  ;;  %v7879_v59 = vpop.eup %7878 }
 0x217   :  { %3030 = vmatprep.subr.bf16.mxu0 %v7563_v61  ;;  %3912 = vmatpush1.bf16.msra.mxu1 %v7627_v62  ;;  %v7702_v62 = vld [vmem:[%s10235_s9 + $0x18] sm:$0xff]  }
 0x218   :  { %3913 = vmatprep.subr.bf16.mxu1 %v7632_v63 }
 0x21a   :  { %3031 = vmatpush1.bf16.msra.mxu0 %v7561_v0 }
 0x21b   :  { %3032 = vmatprep.subr.bf16.mxu0 %v7569_v2  ;;  %3914 = vmatpush1.bf16.msra.mxu1 %v7630_v3  ;;  %v4077_v3 = vmul.f32 0.6931472, %v7879_v59 }
 0x21c   :  { %3915 = vmatprep.subr.bf16.mxu1 %v7635_v4 }
 0x21e   :  { %3033 = vmatpush1.bf16.msra.mxu0 %v7567_v42 }
 0x21f   :  { %3034 = vmatprep.subr.bf16.mxu0 %v7575_v5  ;;  %3916 = vmatpush1.bf16.msra.mxu1 %v7633_v37  ;;  %v4078_v5 = vadd.f32 %v4077_v3, %v4070_v45  ;;  %v7668_v3 = vld [vmem:[%s10233_s5 + $0x1a4] ss:$8 sps:$4 sm:$0xff]  }
 0x220   :  { %3926 = vmatprep.subr.bf16.mxu1 %v7638_v6  ;;  %v7636_v6 = vld [vmem:[%s10233_s5 + $0x100] ss:$8 sps:$4 sm:$0xff]  }
 0x222   :  { %3035 = vmatpush1.bf16.msra.mxu0 %v7573_v7 }
 0x223   :  { %3036 = vmatprep.subr.bf16.mxu0 %v7581_v8  ;;  %v7641_v8 = vld [vmem:[%s10233_s5 + $0x114] ss:$8 sps:$4 sm:$0xff]  }
 0x226   :  { %3037 = vmatpush1.bf16.msra.mxu0 %v7579_v9  ;;  %v7706_v9 = vld [vmem:[%s10235_s9 + $0x20] sm:$0xff]  }
 0x227   :  { %3038 = vmatprep.subr.bf16.mxu0 %v7587_v10  ;;  %v4079_v10 = vadd.f32 0.01, %v4078_v5 }
 0x22a   :  { %3039 = vmatpush1.bf16.msra.mxu0 %v7585_v52 }
 0x22b   :  { %3040 = vmatprep.subr.bf16.mxu0 %v7593_v11  ;;  %v4088_v11 = vrot.slane %v4079_v10, %v8274_v23 }
 0x22d   :  { %7884 = vrcp.f32 %v4088_v11 }
 0x22e   :  { %3041 = vmatpush1.bf16.msra.mxu0 %v7591_v13  ;;  %v7639_v13 = vld [vmem:[%s10233_s5 + $0x110] ss:$8 sps:$4 sm:$0xff]  }
 0x22f   :  { %3042 = vmatprep.subr.bf16.mxu0 %v7599_v14  ;;  %v7644_v14 = vld [vmem:[%s10233_s5 + $0x124] ss:$8 sps:$4 sm:$0xff]  }
 0x232   :  { %3043 = vmatpush1.bf16.msra.mxu0 %v7597_v17  ;;  %v7710_v17 = vld [vmem:[%s10235_s9 + $0x28] sm:$0xff]  }
 0x233   :  { %3044 = vmatprep.subr.bf16.mxu0 %v7605_v46  ;;  %v7881_v46 = vpop.eup %7880 }
 0x234   :  { %v4064_v19 = vadd.f32 1.0, %v7881_v46 }
 0x236   :  { %3045 = vmatpush1.bf16.msra.mxu0 %v7603_v20  ;;  %v7883_v20 = vpop.eup %7882  ;;  %7886 = vlog2.f32 %v4064_v19 }
 0x237   :  { %3055 = vmatprep.subr.bf16.mxu0 %v7611_v21  ;;  %v7647_v21 = vld [vmem:[%s10233_s5 + $0x134] ss:$8 sps:$4 sm:$0xff]   ;;  %v7885_v32 = vpop.eup %7884 }
 0x239   :  { %3047 = vmatmul.mubr.bf16.vlgmr.msra.gmra.mrb[12].mxu0 %v8734_v44  ;;  %v9342_v44 = vld [vmem:[%s10236_s4] sm:$0x7f] }
 0x23a   :  { %3056 = vmatpush1.bf16.msra.mxu0 %v7609_v29  ;;  %3087 = vmatprep.mubr.bf16.mxu0 %v7924_v1  ;;  %v773_v50 = vrot.slane %v9342_v44, %v8282_v25  ;;  %v781_v38 = vrot.slane %v9342_v44, %v8287_v27  ;;  %v4083_v29 = vmul.f32 0.6931472, %v7883_v20  ;;  %v793_v46 = vrot.slane %v9342_v44, %v8712_v35  ;;  %v7683_v20 = vld [vmem:[%s10233_s5 + $0x1f4] ss:$8 sps:$4 sm:$0xff]  }
 0x23b   :  { %3057 = vmatprep.subr.bf16.mxu0 %v7620_v30  ;;  %v7650_v30 = vld [vmem:[%s10233_s5 + $0x144] ss:$8 sps:$4 sm:$0xff]  }
 0x23c   :  { %v4091_v18 = vmul.f32 %v7885_v32, %v4083_v29 }
 0x23e   :  { %3058 = vmatpush1.bf16.msra.mxu0 %v7618_v31  ;;  %v7718_v31 = vld [vmem:[%s10235_s9 + $0x38] sm:$0xff]  }
 0x23f   :  { %6929 = vmatprep.subr.bf16.mxu0 %v7925_v15 }
 0x245   :  { %6344 = vmatmul.mubr.msk.bf16.vlgmr.msra.gmra.mrb[12].mxu0 %vm183_vm0, %v8759_v56  ;;  %v769_v56 = vrot.slane %v9342_v44, %v8274_v23 }
 0x246   :  { %6930 = vmatpush3.bf16.msra.mxu0 %v7690_v12  ;;  %6945 = vmatprep.mubr.msk.bf16.mxu0 %vm7926_vm1, %v7925_v15  ;;  %v7648_v12 = vld [vmem:[%s10233_s5 + $0x140] ss:$8 sps:$4 sm:$0xff]  }
 0x247   :  { %6931 = vmatprep.subr.bf16.mxu0 %v7925_v15 }
 0x24a   :  { %6932 = vmatpush3.bf16.msra.mxu0 %v7694_v33  ;;  %v7653_v33 = vld [vmem:[%s10233_s5 + $0x154] ss:$8 sps:$4 sm:$0xff]  }
 0x24b   :  { %6933 = vmatprep.subr.bf16.mxu0 %v7925_v15 }
 0x24c   :  { %v2761_v41 = vpop.f32.mrb[8].mxu0  ;;  %v9369_v43 = vpop.f32.mrb[8].mxu1 }
 0x24d   :  { %v7009_v24 = vadd.f32 %v2761_v41, %v769_v56  ;;  %v2763_v47 = vpop.f32.mrb[9].mxu0  ;;  %v2927_v48 = vpop.f32.mrb[9].mxu1  ;;  %v4092_v56 = vmul.f32 1.442695, %v4091_v18  ;;  %v7654_v41 = vld [vmem:[%s10233_s5 + $0x160] ss:$8 sps:$4 sm:$0xff]  }
 0x24e   :  { %v7010_v55 = vadd.f32 %v2763_v47, %v773_v50  ;;  %v7012_v58 = vadd.f32 %v2927_v48, %v781_v38  ;;  %v2765_v60 = vpop.f32.mrb[10].mxu0  ;;  %v2929_v61 = vpop.f32.mrb[10].mxu1  ;;  %6934 = vmatpush3.bf16.msra.mxu0 %v7698_v39  ;;  %v7651_v38 = vld [vmem:[%s10233_s5 + $0x150] ss:$8 sps:$4 sm:$0xff]   ;;  %v7656_v39 = vld [vmem:[%s10233_s5 + $0x164] ss:$8 sps:$4 sm:$0xff]  }
 0x24f   :  { %v3256_v63 = vmax.f32 %v7009_v24, 0.0  ;;  %v2766_v0 = vpop.f32.mrb[11].mxu0  ;;  %v2930_v2 = vpop.f32.mrb[11].mxu1  ;;  %6935 = vmatprep.subr.bf16.mxu0 %v7925_v15  ;;  %7888 = vpow2.f32 %v4092_v56 }
 0x250   :  { %v3257_v4 = vmax.f32 %v7010_v55, 0.0  ;;  %v3259_v42 = vmax.f32 %v7012_v58, 0.0  ;;  %v7887_v50 = vpop.eup %7886  ;;  %v7662_v55 = vld [vmem:[%s10233_s5 + $0x184] ss:$8 sps:$4 sm:$0xff]   ;;  %v7663_v2 = vld [vmem:[%s10233_s5 + $0x190] ss:$8 sps:$4 sm:$0xff]  }
 0x251   :  { %v3263_v7 = vpack.c.bf16 %v3256_v63, %v3256_v63  ;;  %v4066_v22 = vmul.f32 0.6931472, %v7887_v50  ;;  %v7665_v63 = vld [vmem:[%s10233_s5 + $0x194] ss:$8 sps:$4 sm:$0xff]   ;;  %v7687_v50 = vld [vmem:[%s10233_s5 + $0x210] ss:$8 sps:$4 sm:$0xff]  }
 0x252   :  { %v3264_v37 = vpack.c.bf16 %v3257_v4, %v3257_v4  ;;  %6936 = vmatpush3.bf16.msra.mxu0 %v7702_v62  ;;  %v3266_v52 = vpack.c.bf16 %v3259_v42, %v3259_v42  ;;  %v7660_v62 = vld [vmem:[%s10233_s5 + $0x180] ss:$8 sps:$4 sm:$0xff]   ;;  %v7671_v42 = vld [vmem:[%s10233_s5 + $0x1b4] ss:$8 sps:$4 sm:$0xff]  }
 0x253   :  { %6937 = vmatprep.subr.bf16.mxu0 %v7925_v15  ;;  %v4067_v40 = vadd.f32 %v4066_v22, %v4059_v36  ;;  %v7666_v4 = vld [vmem:[%s10233_s5 + $0x1a0] ss:$8 sps:$4 sm:$0xff]   ;;  %v7689_v36 = vld [vmem:[%s10233_s5 + $0x214] ss:$8 sps:$4 sm:$0xff]  }
 0x254   :  { %3917 = vmatprep.mubr.bf16.mxu1 %v3264_v37  ;;  %v7669_v37 = vld [vmem:[%s10233_s5 + $0x1b0] ss:$8 sps:$4 sm:$0xff]   ;;  %v7697_v22 = vld [vmem:[%s10233_s5 + $0x234] ss:$8 sps:$4 sm:$0xff]  }
 0x255   :  { %3918 = vmatmul.mubr.bf16.vlgmr.msra.gmra.mrb[28].mxu1 %v3263_v7  ;;  %v4068_v24 = vadd.f32 0.01, %v4067_v40  ;;  %v7674_v7 = vld [vmem:[%s10233_s5 + $0x1c4] ss:$8 sps:$4 sm:$0xff]   ;;  %v7695_v40 = vld [vmem:[%s10233_s5 + $0x230] ss:$8 sps:$4 sm:$0xff]  }
 0x256   :  { %3927 = vmatpush1.bf16.msra.mxu1 %v7636_v6  ;;  %3958 = vmatprep.mubr.bf16.mxu1 %v3266_v52  ;;  %v7677_v52 = vld [vmem:[%s10233_s5 + $0x1d4] ss:$8 sps:$4 sm:$0xff]  }
 0x257   :  { %3928 = vmatprep.subr.bf16.mxu1 %v7641_v8  ;;  %6938 = vmatpush3.bf16.msra.mxu0 %v7706_v9  ;;  %v4102_v60 = vrot.slane %v4068_v24, %v8274_v23  ;;  %v7672_v9 = vld [vmem:[%s10233_s5 + $0x1c0] ss:$8 sps:$4 sm:$0xff]   ;;  %v7703_v24 = vld [vmem:[%s10233_s5 + $0x250] ss:$8 sps:$4 sm:$0xff]  }
 0x258   :  { %6939 = vmatprep.subr.bf16.mxu0 %v7925_v15 }
 0x259   :  { %v7889_v58 = vpop.eup %7888  ;;  %7890 = vrcp.f32 %v4102_v60 }
 0x25a   :  { %3929 = vmatpush1.bf16.msra.mxu1 %v7639_v13  ;;  %v4094_v61 = vsub.f32 1.0, %v7889_v58  ;;  %v7675_v13 = vld [vmem:[%s10233_s5 + $0x1d0] ss:$8 sps:$4 sm:$0xff]  }
 0x25b   :  { %3930 = vmatprep.subr.bf16.mxu1 %v7644_v14  ;;  %6940 = vmatpush3.bf16.msra.mxu0 %v7710_v17  ;;  %v777_v14 = vrot.slane %v9342_v44, %v8458_v49  ;;  %v7680_v17 = vld [vmem:[%s10233_s5 + $0x1e4] ss:$8 sps:$4 sm:$0xff]  }
 0x25c   :  { %6941 = vmatprep.subr.bf16.mxu0 %v7925_v15  ;;  %v4095_v0 = vadd.f32 1e-16, %v4094_v61  ;;  %v7717_v61 = vld [vmem:[%s10233_s5 + $0x284] ss:$8 sps:$4 sm:$0xff]  }
 0x25d   :  { %v7011_v19 = vadd.f32 %v9369_v43, %v777_v14  ;;  %v7686_v43 = vld [vmem:[%s10233_s5 + $0x204] ss:$8 sps:$4 sm:$0xff]   ;;  %v7731_v14 = vld [vmem:[%s10233_s5 + $0x2d0] ss:$8 sps:$4 sm:$0xff]  }
 0x25e   :  { %3931 = vmatpush1.bf16.msra.mxu1 %v7642_v51  ;;  %7892 = vlog2.f32 %v4095_v0  ;;  %v7678_v51 = vld [vmem:[%s10233_s5 + $0x1e0] ss:$8 sps:$4 sm:$0xff]  }
 0x25f   :  { %3932 = vmatprep.subr.bf16.mxu1 %v7647_v21  ;;  %6942 = vmatpush3.bf16.msra.mxu0 %v7714_v26  ;;  %v3258_v32 = vmax.f32 %v7011_v19, 0.0  ;;  %v7715_v0 = vld [vmem:[%s10233_s5 + $0x280] ss:$8 sps:$4 sm:$0xff]   ;;  %v7737_v19 = vld [vmem:[%s10233_s5 + $0x2f0] ss:$8 sps:$4 sm:$0xff]  }
 0x260   :  { %6943 = vmatprep.subr.bf16.mxu0 %v7925_v15 }
 0x261   :  { %v3265_v56 = vpack.c.bf16 %v3258_v32, %v3258_v32 }
 0x262   :  { %3933 = vmatpush1.bf16.msra.mxu1 %v7645_v28 }
 0x263   :  { %3934 = vmatprep.subr.bf16.mxu1 %v7650_v30  ;;  %6944 = vmatpush3.bf16.msra.mxu0 %v7718_v31  ;;  %v7891_v5 = vpop.eup %7890  ;;  %v7681_v31 = vld [vmem:[%s10233_s5 + $0x1f0] ss:$8 sps:$4 sm:$0xff]  }
 0x266   :  { %3935 = vmatpush1.bf16.msra.mxu1 %v7648_v12 }
 0x267   :  { %3936 = vmatprep.subr.bf16.mxu1 %v7653_v33  ;;  %v7684_v33 = vld [vmem:[%s10233_s5 + $0x200] ss:$8 sps:$4 sm:$0xff]  }
 0x268   :  { %v7893_v6 = vpop.eup %7892 }
 0x269   :  { %v4097_v8 = vmul.f32 0.6931472, %v7893_v6  ;;  %v7724_v6 = vld [vmem:[%s10233_s5 + $0x2a4] ss:$8 sps:$4 sm:$0xff]  }
 0x26a   :  { %3937 = vmatpush1.bf16.msra.mxu1 %v7651_v38  ;;  %v7693_v38 = vld [vmem:[%s10233_s5 + $0x224] ss:$8 sps:$4 sm:$0xff]  }
 0x26b   :  { %3938 = vmatprep.subr.bf16.mxu1 %v7656_v39  ;;  %v4105_v10 = vmul.f32 %v7891_v5, %v4097_v8  ;;  %v7691_v39 = vld [vmem:[%s10233_s5 + $0x220] ss:$8 sps:$4 sm:$0xff]   ;;  %v7719_v5 = vld [vmem:[%s10233_s5 + $0x290] ss:$8 sps:$4 sm:$0xff]  }
 0x26c   :  { %v6693_v45 = vpop.f32.mrb[12].mxu1  ;;  %v7722_v8 = vld [vmem:[%s10233_s5 + $0x2a0] ss:$8 sps:$4 sm:$0xff]  }
 0x26d   :  { %v6694_v47 = vpop.f32.mrb[13].mxu1  ;;  %v4106_v11 = vpack.c.bf16 %v4105_v10, %v4105_v10  ;;  %v7725_v10 = vld [vmem:[%s10233_s5 + $0x2b0] ss:$8 sps:$4 sm:$0xff]  }
 0x26e   :  { %v6695_v48 = vadd.f32 %v6694_v47, %v6693_v45  ;;  %v6696_v53 = vpop.f32.mrb[14].mxu1  ;;  %3939 = vmatpush1.bf16.msra.mxu1 %v7654_v41  ;;  %v7701_v41 = vld [vmem:[%s10233_s5 + $0x244] ss:$8 sps:$4 sm:$0xff]   ;;  %v7705_v45 = vld [vmem:[%s10233_s5 + $0x254] ss:$8 sps:$4 sm:$0xff]  }
 0x26f   :  { %v6697_v59 = vpop.f32.mrb[15].mxu1  ;;  %3940 = vmatprep.subr.bf16.mxu1 %v7659_v34  ;;  %6946 = vmatmul.mubr.bf16.vlgmr.msra.gmra.mrb[16].mxu0 %v4106_v11  ;;  %v7699_v34 = vld [vmem:[%s10233_s5 + $0x240] ss:$8 sps:$4 sm:$0xff]   ;;  %v7709_v47 = vld [vmem:[%s10233_s5 + $0x264] ss:$8 sps:$4 sm:$0xff]  }
 0x270   :  { %4811 = vmatprep.mubr.bf16.mxu0 %v7924_v1  ;;  %v3131_v28 = vadd.f32 %v6695_v48, %v793_v46  ;;  %v7707_v48 = vld [vmem:[%s10233_s5 + $0x260] ss:$8 sps:$4 sm:$0xff]   ;;  %v7713_v53 = vld [vmem:[%s10233_s5 + $0x274] ss:$8 sps:$4 sm:$0xff]  }
 0x271   :  { %v7728_v11 = vld [vmem:[%s10233_s5 + $0x2c0] ss:$8 sps:$4 sm:$0xff]  }
 0x272   :  { %3941 = vmatpush1.bf16.msra.mxu1 %v7657_v54  ;;  %v7734_v46 = vld [vmem:[%s10233_s5 + $0x2e0] ss:$8 sps:$4 sm:$0xff]  }
 0x273   :  { %3942 = vmatprep.subr.bf16.mxu1 %v7662_v55  ;;  %v7711_v55 = vld [vmem:[%s10233_s5 + $0x270] ss:$8 sps:$4 sm:$0xff]  }
 0x276   :  { %3943 = vmatpush1.bf16.msra.mxu1 %v7660_v62 }
 0x277   :  { %3944 = vmatprep.subr.bf16.mxu1 %v7665_v63 }
 0x27a   :  { %3945 = vmatpush1.bf16.msra.mxu1 %v7663_v2  ;;  %v7721_v2 = vld [vmem:[%s10233_s5 + $0x294] ss:$8 sps:$4 sm:$0xff]  }
 0x27b   :  { %3946 = vmatprep.subr.bf16.mxu1 %v7668_v3 }
 0x27e   :  { %3947 = vmatpush1.bf16.msra.mxu1 %v7666_v4 }
 0x27f   :  { %3948 = vmatprep.subr.bf16.mxu1 %v7671_v42 }
 0x282   :  { %3949 = vmatpush1.bf16.msra.mxu1 %v7669_v37 }
 0x283   :  { %3950 = vmatprep.subr.bf16.mxu1 %v7674_v7 }
 0x286   :  { %3951 = vmatpush1.bf16.msra.mxu1 %v7672_v9  ;;  %v7727_v9 = vld [vmem:[%s10233_s5 + $0x2b4] ss:$8 sps:$4 sm:$0xff]  }
 0x287   :  { %3952 = vmatprep.subr.bf16.mxu1 %v7677_v52  ;;  %v7730_v52 = vld [vmem:[%s10233_s5 + $0x2c4] ss:$8 sps:$4 sm:$0xff]  }
 0x28a   :  { %3953 = vmatpush1.bf16.msra.mxu1 %v7675_v13  ;;  %v7733_v13 = vld [vmem:[%s10233_s5 + $0x2d4] ss:$8 sps:$4 sm:$0xff]  }
 0x28b   :  { %3954 = vmatprep.subr.bf16.mxu1 %v7680_v17  ;;  %v7736_v17 = vld [vmem:[%s10233_s5 + $0x2e4] ss:$8 sps:$4 sm:$0xff]  }
 0x28c   :  { %v6715_v21 = vpop.f32.mrb[16].mxu1 }
 0x28d   :  { %v6716_v26 = vpop.f32.mrb[17].mxu1 }
 0x28e   :  { %v6717_v29 = vadd.f32 %v6716_v26, %v6715_v21  ;;  %v6718_v30 = vpop.f32.mrb[18].mxu1  ;;  %3955 = vmatpush1.bf16.msra.mxu1 %v7678_v51  ;;  %v7739_v51 = vld [vmem:[%s10233_s5 + $0x2f4] ss:$8 sps:$4 sm:$0xff]   ;;  %v785_v21 = vrot.slane %v9342_v44, %v8676_v16  ;;  %v789_v26 = vrot.slane %v9342_v44, %v8473_v57  ;;  %v7743_v44 = vld [vmem:[%s10233_s5 + $0x310] ss:$8 sps:$4 sm:$0xff]  }
 0x28f   :  { %v6719_v12 = vpop.f32.mrb[19].mxu1  ;;  %3956 = vmatprep.subr.bf16.mxu1 %v7683_v20  ;;  %v7742_v20 = vld [vmem:[%s10233_s5 + $0x304] ss:$8 sps:$4 sm:$0xff]  }
 0x290   :  { %v3171_v18 = vadd.f32 %v6717_v29, %v3131_v28 }
 0x292   :  { %3957 = vmatpush1.bf16.msra.mxu1 %v7681_v31 }
 0x293   :  { %3967 = vmatprep.subr.bf16.mxu1 %v7686_v43 }
 0x295   :  { %3959 = vmatmul.mubr.bf16.vlgmr.msra.gmra.mrb[28].mxu1 %v3265_v56  ;;  %v7740_v56 = vld [vmem:[%s10233_s5 + $0x300] ss:$8 sps:$4 sm:$0xff]  }
 0x296   :  { %3968 = vmatpush1.bf16.msra.mxu1 %v7684_v33 }
 0x297   :  { %3969 = vmatprep.subr.bf16.mxu1 %v7689_v36 }
 0x29a   :  { %3970 = vmatpush1.bf16.msra.mxu1 %v7687_v50  ;;  %v7745_v50 = vld [vmem:[%s10233_s5 + $0x314] ss:$8 sps:$4 sm:$0xff]  }
 0x29b   :  { %3971 = vmatprep.subr.bf16.mxu1 %v7693_v38 }
 0x29e   :  { %3972 = vmatpush1.bf16.msra.mxu1 %v7691_v39 }
 0x29f   :  { %3973 = vmatprep.subr.bf16.mxu1 %v7697_v22 }
 0x2a2   :  { %3974 = vmatpush1.bf16.msra.mxu1 %v7695_v40 }
 0x2a3   :  { %3975 = vmatprep.subr.bf16.mxu1 %v7701_v41 }
 0x2a6   :  { %3976 = vmatpush1.bf16.msra.mxu1 %v7699_v34 }
 0x2a7   :  { %3977 = vmatprep.subr.bf16.mxu1 %v7705_v45  ;;  %v7748_v45 = vld [vmem:[%s10239_s13 + $0x4] ss:$28 sps:$4 sm:$0xff]  }
 0x2a8   :  { %4779 = vmatprep.subr.bf16.mxu0 %v7748_v45 }
 0x2aa   :  { %3978 = vmatpush1.bf16.msra.mxu1 %v7703_v24  ;;  %v7746_v24 = vld [vmem:[%s10239_s13] ss:$28 sps:$4 sm:$0xff]  }
 0x2ab   :  { %3979 = vmatprep.subr.bf16.mxu1 %v7709_v47  ;;  %v7749_v47 = vld [vmem:[%s10239_s13 + $0x10] ss:$28 sps:$4 sm:$0xff]   ;;  %4780 = vmatpush1.bf16.msra.mxu0 %v7746_v24 }
 0x2ad   :  { %v6737_v54 = vpop.f32.mrb[20].mxu1 }
 0x2ae   :  { %v6738_v59 = vpop.f32.mrb[21].mxu1  ;;  %3980 = vmatpush1.bf16.msra.mxu1 %v7707_v48  ;;  %v7751_v48 = vld [vmem:[%s10239_s13 + $0x14] ss:$28 sps:$4 sm:$0xff]  }
 0x2af   :  { %v6739_v58 = vadd.f32 %v6738_v59, %v6737_v54  ;;  %v6740_v60 = vpop.f32.mrb[22].mxu1  ;;  %3981 = vmatprep.subr.bf16.mxu1 %v7713_v53  ;;  %v7754_v53 = vld [vmem:[%s10239_s13 + $0x3c] ss:$28 sps:$4 sm:$0xff]   ;;  %v7757_v54 = vld [vmem:[%s10239_s13 + $0x4c] ss:$28 sps:$4 sm:$0xff]  }
 0x2b0   :  { %v6741_v62 = vpop.f32.mrb[23].mxu1  ;;  %v7752_v59 = vld [vmem:[%s10239_s13 + $0x38] ss:$28 sps:$4 sm:$0xff]   ;;  %4781 = vmatprep.subr.bf16.mxu0 %v7754_v53  ;;  %v7763_v60 = vld [vmem:[%s10239_s13 + $0x84] ss:$28 sps:$4 sm:$0xff]  }
 0x2b1   :  { %v3211_v63 = vadd.f32 %v6739_v58, %v3171_v18  ;;  %4782 = vmatpush1.bf16.msra.mxu0 %v7752_v59  ;;  %v7760_v58 = vld [vmem:[%s10239_s13 + $0x74] ss:$28 sps:$4 sm:$0xff]   ;;  %v7761_v62 = vld [vmem:[%s10239_s13 + $0x80] ss:$28 sps:$4 sm:$0xff]  }
 0x2b2   :  { %3982 = vmatpush1.bf16.msra.mxu1 %v7711_v55  ;;  %v7755_v55 = vld [vmem:[%s10239_s13 + $0x48] ss:$28 sps:$4 sm:$0xff]   ;;  %4783 = vmatprep.subr.bf16.mxu0 %v7760_v58 }
 0x2b3   :  { %3983 = vmatprep.subr.bf16.mxu1 %v7717_v61  ;;  %v7758_v61 = vld [vmem:[%s10239_s13 + $0x70] ss:$28 sps:$4 sm:$0xff]  }
 0x2b5   :  { %v3250_v3 = vpop.f32.mrb[24].mxu1  ;;  %4784 = vmatpush1.bf16.msra.mxu0 %v7758_v61 }
 0x2b6   :  { %v3251_v4 = vadd.f32 %v3250_v3, %v3211_v63  ;;  %v6927_v42 = vpop.f32.mrb[25].mxu1  ;;  %3984 = vmatpush1.bf16.msra.mxu1 %v7715_v0  ;;  %v7766_v63 = vld [vmem:[%s10239_s13 + $0xac] ss:$28 sps:$4 sm:$0xff]   ;;  %v7769_v0 = vld [vmem:[%s10239_s13 + $0xbc] ss:$28 sps:$4 sm:$0xff]  }
 0x2b7   :  { %v3253_v37 = vpop.f32.mrb[26].mxu1  ;;  %3985 = vmatprep.subr.bf16.mxu1 %v7721_v2  ;;  %v7764_v2 = vld [vmem:[%s10239_s13 + $0xa8] ss:$28 sps:$4 sm:$0xff]   ;;  %v7767_v3 = vld [vmem:[%s10239_s13 + $0xb8] ss:$28 sps:$4 sm:$0xff]   ;;  %4785 = vmatprep.subr.bf16.mxu0 %v7766_v63 }
 0x2b8   :  { %v6928_v7 = vpop.f32.mrb[27].mxu1  ;;  %v3262_v38 = vmax.f32 %v3251_v4, 0.0  ;;  %v7772_v4 = vld [vmem:[%s10239_s13 + $0xe4] ss:$28 sps:$4 sm:$0xff]   ;;  %v7775_v42 = vld [vmem:[%s10239_s13 + $0xf4] ss:$28 sps:$4 sm:$0xff]  }
 0x2b9   :  { %4786 = vmatpush1.bf16.msra.mxu0 %v7764_v2  ;;  %v7773_v37 = vld [vmem:[%s10239_s13 + $0xf0] ss:$28 sps:$4 sm:$0xff]  }
 0x2ba   :  { %3986 = vmatpush1.bf16.msra.mxu1 %v7719_v5  ;;  %v3269_v39 = vpack.c.bf16 %v3262_v38, %v3262_v38  ;;  %v7770_v5 = vld [vmem:[%s10239_s13 + $0xe0] ss:$28 sps:$4 sm:$0xff]   ;;  %4787 = vmatprep.subr.bf16.mxu0 %v7772_v4  ;;  %v7781_v7 = vld [vmem:[%s10239_s13 + $0x12c] ss:$28 sps:$4 sm:$0xff]  }
 0x2bb   :  { %3987 = vmatprep.subr.bf16.mxu1 %v7724_v6  ;;  %v7778_v6 = vld [vmem:[%s10239_s13 + $0x11c] ss:$28 sps:$4 sm:$0xff]  }
 0x2bd   :  { %4788 = vmatpush1.bf16.msra.mxu0 %v7770_v5 }
 0x2be   :  { %3988 = vmatpush1.bf16.msra.mxu1 %v7722_v8  ;;  %v7776_v8 = vld [vmem:[%s10239_s13 + $0x118] ss:$28 sps:$4 sm:$0xff]   ;;  %4789 = vmatprep.subr.bf16.mxu0 %v7778_v6 }
 0x2bf   :  { %3989 = vmatprep.subr.bf16.mxu1 %v7727_v9  ;;  %v7779_v9 = vld [vmem:[%s10239_s13 + $0x128] ss:$28 sps:$4 sm:$0xff]  }
 0x2c1   :  { %4790 = vmatpush1.bf16.msra.mxu0 %v7776_v8 }
 0x2c2   :  { %3990 = vmatpush1.bf16.msra.mxu1 %v7725_v10  ;;  %v7782_v10 = vld [vmem:[%s10239_s13 + $0x150] ss:$28 sps:$4 sm:$0xff]  }
 0x2c3   :  { %3991 = vmatprep.subr.bf16.mxu1 %v7730_v52  ;;  %v7784_v52 = vld [vmem:[%s10239_s13 + $0x154] ss:$28 sps:$4 sm:$0xff]  }
 0x2c4   :  { %4791 = vmatprep.subr.bf16.mxu0 %v7784_v52 }
 0x2c5   :  { %4792 = vmatpush1.bf16.msra.mxu0 %v7782_v10 }
 0x2c6   :  { %3992 = vmatpush1.bf16.msra.mxu1 %v7728_v11  ;;  %v7787_v11 = vld [vmem:[%s10239_s13 + $0x164] ss:$28 sps:$4 sm:$0xff]  }
 0x2c7   :  { %3993 = vmatprep.subr.bf16.mxu1 %v7733_v13  ;;  %v7790_v13 = vld [vmem:[%s10239_s13 + $0x18c] ss:$28 sps:$4 sm:$0xff]  }
 0x2c8   :  { %4793 = vmatprep.subr.bf16.mxu0 %v7790_v13 }
 0x2ca   :  { %3994 = vmatpush1.bf16.msra.mxu1 %v7731_v14  ;;  %v7785_v14 = vld [vmem:[%s10239_s13 + $0x160] ss:$28 sps:$4 sm:$0xff]  }
 0x2cb   :  { %3995 = vmatprep.subr.bf16.mxu1 %v7736_v17  ;;  %v7788_v17 = vld [vmem:[%s10239_s13 + $0x188] ss:$28 sps:$4 sm:$0xff]  }
 0x2cc   :  { %4794 = vmatpush1.bf16.msra.mxu0 %v7788_v17 }
 0x2ce   :  { %3996 = vmatpush1.bf16.msra.mxu1 %v7734_v46  ;;  %v7793_v46 = vld [vmem:[%s10239_s13 + $0x19c] ss:$28 sps:$4 sm:$0xff]  }
 0x2cf   :  { %3997 = vmatprep.subr.bf16.mxu1 %v7739_v51  ;;  %v7791_v51 = vld [vmem:[%s10239_s13 + $0x198] ss:$28 sps:$4 sm:$0xff]  }
 0x2d2   :  { %3998 = vmatpush1.bf16.msra.mxu1 %v7737_v19  ;;  %v7796_v19 = vld [vmem:[%s10239_s13 + $0xc] ss:$28 sps:$4 sm:$0xff]  }
 0x2d3   :  { %4008 = vmatprep.subr.bf16.mxu1 %v7742_v20  ;;  %4862 = vmatprep.subr.bf16.mxu0 %v7796_v19 }
 0x318   :  { %v3089_v28 = vpop.f32.mrb[12].mxu0 }
 0x319   :  { %v7013_v29 = vadd.f32 %v3089_v28, %v785_v21  ;;  %v3091_v30 = vpop.f32.mrb[13].mxu0 }
 0x31a   :  { %v7014_v31 = vadd.f32 %v3091_v30, %v789_v26  ;;  %v3093_v32 = vpop.f32.mrb[14].mxu0 }
 0x31b   :  { %v3260_v12 = vmax.f32 %v7013_v29, 0.0  ;;  %v3094_v43 = vpop.f32.mrb[15].mxu0 }
 0x31c   :  { %v3261_v18 = vmax.f32 %v7014_v31, 0.0  ;;  %v6666_v43 = vld [vmem:[%s10240_s12 + $0x8] sm:$0xff]  }
 0x31d   :  { %v3267_v36 = vpack.c.bf16 %v3260_v12, %v3260_v12  ;;  %v6618_v12 = vld [vmem:[%s10240_s12] sm:$0xff]  }
 0x31e   :  { %v3268_v33 = vpack.c.bf16 %v3261_v18, %v3261_v18 }
 0x320   :  { %3999 = vmatprep.mubr.bf16.mxu1 %v3268_v33  ;;  %v6619_v33 = vunpack.c.l.bf16 %v6618_v12 }
 0x321   :  { %4000 = vmatmul.mubr.bf16.vlgmr.msra.gmra.mrb[28].mxu1 %v3267_v36  ;;  %v6623_v36 = vunpack.c.l.bf16 %v6666_v43 }
 0x322   :  { %4009 = vmatpush1.bf16.msra.mxu1 %v7740_v56  ;;  %4040 = vmatprep.mubr.bf16.mxu1 %v7924_v1  ;;  %v6620_v56 = vunpack.c.h.bf16 %v6618_v12 }
 0x323   :  { %4010 = vmatprep.subr.bf16.mxu1 %v7745_v50  ;;  %v6667_v50 = vld [vmem:[%s10240_s12 + $0x10] sm:$0xff]  }
 0x324   :  { %v6628_v45 = vunpack.c.h.bf16 %v6667_v50 }
 0x326   :  { %4011 = vmatpush1.bf16.msra.mxu1 %v7743_v44  ;;  %v9723_v44 = vld [vmem:[%s10241_s6] sm:$0x3] }
 0x327   :  { %4945 = vmatprep.subr.bf16.mxu1 %v7751_v48  ;;  %v3379_v24 = vrot.slane %v9723_v44, %v8282_v25  ;;  %v6669_v48 = vld [vmem:[%s10240_s12 + $0x20] sm:$0xff]  }
 0x328   :  { %v6636_v6 = vunpack.c.h.bf16 %v6669_v48 }
 0x32d   :  { %6446 = vmatmul.mubr.msk.bf16.vlgmr.msra.gmra.mrb[28].mxu1 %vm183_vm0, %v3269_v39  ;;  %v6624_v39 = vunpack.c.h.bf16 %v6666_v43 }
 0x32e   :  { %4977 = vmatprep.mubr.bf16.mxu1 %v7924_v1  ;;  %4946 = vmatpush1.bf16.msra.mxu1 %v7749_v47 }
 0x32f   :  { %4947 = vmatprep.subr.bf16.mxu1 %v7757_v54 }
 0x332   :  { %4948 = vmatpush1.bf16.msra.mxu1 %v7755_v55 }
 0x333   :  { %4949 = vmatprep.subr.bf16.mxu1 %v7763_v60 }
 0x336   :  { %4950 = vmatpush1.bf16.msra.mxu1 %v7761_v62 }
 0x337   :  { %4951 = vmatprep.subr.bf16.mxu1 %v7769_v0  ;;  %v6635_v0 = vunpack.c.l.bf16 %v6669_v48 }
 0x33a   :  { %4952 = vmatpush1.bf16.msra.mxu1 %v7767_v3 }
 0x33b   :  { %4953 = vmatprep.subr.bf16.mxu1 %v7775_v42 }
 0x33e   :  { %4954 = vmatpush1.bf16.msra.mxu1 %v7773_v37 }
 0x33f   :  { %4955 = vmatprep.subr.bf16.mxu1 %v7781_v7 }
 0x342   :  { %v9609_v22 = vpop.f32.mrb[16].mxu0  ;;  %4956 = vmatpush1.bf16.msra.mxu1 %v7779_v9 }
 0x343   :  { %v6947_v40 = vpop.f32.mrb[17].mxu0  ;;  %4957 = vmatprep.subr.bf16.mxu1 %v7787_v11  ;;  %v4211_v20 = vmul.f32 1.442695, %v9609_v22  ;;  %v6668_v22 = vld [vmem:[%s10240_s12 + $0x18] sm:$0xff]  }
 0x344   :  { %v4208_v41 = vpop.f32.mrb[18].mxu0  ;;  %v6631_v47 = vunpack.c.l.bf16 %v6668_v22  ;;  %v6632_v60 = vunpack.c.h.bf16 %v6668_v22 }
 0x345   :  { %v6948_v34 = vpop.f32.mrb[19].mxu0  ;;  %7894 = vpow2.f32 %v4211_v20  ;;  %v6627_v41 = vunpack.c.l.bf16 %v6667_v50 }
 0x346   :  { %4958 = vmatpush1.bf16.msra.mxu1 %v7785_v14 }
 0x347   :  { %4959 = vmatprep.subr.bf16.mxu1 %v7793_v46 }
 0x34a   :  { %4960 = vmatpush1.bf16.msra.mxu1 %v7791_v51 }
 0x34f   :  { %v7895_v21 = vpop.eup %7894 }
 0x350   :  { %v4213_v26 = vsub.f32 1.0, %v7895_v21 }
 0x352   :  { %v4214_v28 = vadd.f32 1e-16, %v4213_v26 }
 0x354   :  { %7896 = vrcp.f32 %v4214_v28 }
 0x35e   :  { %v7897_v29 = vpop.eup %7896 }
 0x35f   :  { %v4216_v30 = vmul.f32 %v7897_v29, %v7895_v21 }
 0x361   :  { %v4217_v31 = vadd.f32 1e-16, %v4216_v30 }
 0x363   :  { %7898 = vlog2.f32 %v4217_v31 }
 0x36d   :  { %v7899_v32 = vpop.eup %7898 }
 0x36e   :  { %v4219_v18 = vmul.f32 0.6931472, %v7899_v32 }
 0x370   :  { %v4280_v38 = vadd.f32 %v6619_v33, %v4219_v18  ;;  %v4281_v40 = vadd.f32 %v6620_v56, %v4219_v18  ;;  %v4282_v34 = vadd.f32 %v6623_v36, %v4219_v18  ;;  %v4283_v54 = vadd.f32 %v6624_v39, %v4219_v18 }
 0x371   :  { %v4284_v58 = vadd.f32 %v6627_v41, %v4219_v18  ;;  %v4285_v63 = vadd.f32 %v6628_v45, %v4219_v18  ;;  %v4286_v4 = vadd.f32 %v6631_v47, %v4219_v18  ;;  %v4287_v10 = vadd.f32 %v6632_v60, %v4219_v18 }
 0x372   :  { %v4290_v53 = vmul.f32 10.0, %v4280_v38  ;;  %v4291_v55 = vmul.f32 10.0, %v4281_v40  ;;  %v4292_v62 = vmul.f32 10.0, %v4282_v34  ;;  %v4293_v37 = vmul.f32 10.0, %v4283_v54 }
 0x373   :  { %v4294_v9 = vmul.f32 10.0, %v4284_v58  ;;  %v4295_v11 = vmul.f32 10.0, %v4285_v63  ;;  %v4288_v13 = vadd.f32 %v6635_v0, %v4219_v18  ;;  %v4296_v17 = vmul.f32 10.0, %v4286_v4  ;;  %v6598_v0 = vld [vmem:[%s10242_s11] sm:$0xff]   ;;  %v6663_v4 = vld [vmem:[%s10242_s11 + $0x10] sm:$0xff]  }
 0x374   :  { %v4300_v5 = vmul.f32 0.5, %v4290_v53  ;;  %v4301_v8 = vmul.f32 0.5, %v4291_v55  ;;  %v4302_v52 = vmul.f32 0.5, %v4292_v62  ;;  %v4303_v46 = vmul.f32 0.5, %v4293_v37 }
 0x375   :  { %v4289_v51 = vadd.f32 %v6636_v6, %v4219_v18  ;;  %v4304_v20 = vmul.f32 0.5, %v4294_v9  ;;  %v4297_v21 = vmul.f32 10.0, %v4287_v10  ;;  %v4305_v26 = vmul.f32 0.5, %v4295_v11 }
 0x376   :  { %7900 = vtanh.f32 %v4300_v5  ;;  %v4298_v28 = vmul.f32 10.0, %v4288_v13  ;;  %v4306_v29 = vmul.f32 0.5, %v4296_v17  ;;  %v6599_v13 = vunpack.c.l.bf16 %v6598_v0 }
 0x377   :  { %7902 = vtanh.f32 %v4301_v8  ;;  %v4299_v30 = vmul.f32 10.0, %v4289_v51  ;;  %v4307_v31 = vmul.f32 0.5, %v4297_v21  ;;  %v6664_v8 = vld [vmem:[%s10242_s11 + $0x18] sm:$0xff]   ;;  %v6608_v21 = vunpack.c.h.bf16 %v6663_v4 }
 0x378   :  { %7904 = vtanh.f32 %v4302_v52  ;;  %v4308_v32 = vmul.f32 0.5, %v4298_v28  ;;  %v3375_v52 = vrot.slane %v9723_v44, %v8274_v23  ;;  %v6612_v28 = vunpack.c.h.bf16 %v6664_v8 }
 0x379   :  { %v4309_v12 = vmul.f32 0.5, %v4299_v30 }
 0x380   :  { %v7901_v43 = vpop.eup %7900 }
 0x381   :  { %v7903_v18 = vpop.eup %7902  ;;  %v4320_v40 = vadd.f32 1.0, %v7901_v43 }
 0x382   :  { %v7905_v33 = vpop.eup %7904  ;;  %v4321_v41 = vadd.f32 1.0, %v7903_v18 }
 0x383   :  { %v4322_v34 = vadd.f32 1.0, %v7905_v33  ;;  %v4330_v55 = vmul.f32 0.5, %v4320_v40 }
 0x384   :  { %v4331_v60 = vmul.f32 0.5, %v4321_v41 }
 0x400   :  { %v9733_v59 = vpop.f32.mrb[28].mxu1 }
 0x401   :  { %v4044_v61 = vpop.f32.mrb[29].mxu1  ;;  %v7015_v44 = vadd.f32 %v9733_v59, %v3375_v52  ;;  %v7828_v52 = vld [vmem:[%s10243_s15 + $0x48] sm:$0xff]  }
 0x402   :  { %v9735_v2 = vadd.f32 %v4044_v61, %v3379_v24  ;;  %v4046_v3 = vpop.f32.mrb[30].mxu1  ;;  %v4332_v61 = vmul.f32 0.5, %v4322_v34 }
 0x403   :  { %v4047_v42 = vpop.f32.mrb[31].mxu1  ;;  %v6662_v3 = vld [vmem:[%s10242_s11 + $0x8] sm:$0xff]  }
 0x404   :  { %v4050_v7 = vand.u32 2147483647, %v9735_v2  ;;  %v4049_v11 = vmax.f32 %v9735_v2, 0.0  ;;  %v6603_v51 = vunpack.c.l.bf16 %v6662_v3 }
 0x406   :  { %v4051_v14 = vsub.f32 0.0, %v4050_v7  ;;  %v7826_v7 = vld [vmem:[%s10243_s15 + $0x40] sm:$0xff]  }
 0x407   :  { %6768 = vmatprep.subr.bf16.mxu1 %v7826_v7 }
 0x408   :  { %v4052_v19 = vmul.f32 1.442695, %v4051_v14  ;;  %v6665_v14 = vld [vmem:[%s10242_s11 + $0x20] sm:$0xff]  }
 0x409   :  { %v6615_v2 = vunpack.c.l.bf16 %v6665_v14 }
 0x40a   :  { %7906 = vpow2.f32 %v4052_v19  ;;  %v6604_v19 = vunpack.c.h.bf16 %v6662_v3 }
 0x40b   :  { %7908 = vtanh.f32 %v4303_v46  ;;  %v6600_v46 = vunpack.c.h.bf16 %v6598_v0 }
 0x40c   :  { %7910 = vtanh.f32 %v4304_v20  ;;  %v6607_v20 = vunpack.c.l.bf16 %v6663_v4 }
 0x40d   :  { %7912 = vtanh.f32 %v4305_v26  ;;  %v6611_v26 = vunpack.c.l.bf16 %v6664_v8  ;;  %v7827_v8 = vld [vmem:[%s10243_s15] sm:$0xff]  }
 0x40e   :  { %7914 = vtanh.f32 %v4306_v29 }
 0x40f   :  { %7916 = vtanh.f32 %v4307_v31 }
 0x410   :  { %7918 = vtanh.f32 %v4308_v32  ;;  %v6616_v32 = vunpack.c.h.bf16 %v6665_v14 }
 0x411   :  { %7920 = vtanh.f32 %v4309_v12 }
 0x414   :  { %v7907_v56 = vpop.eup %7906 }
 0x415   :  { %v7909_v36 = vpop.eup %7908  ;;  %v4054_v50 = vadd.f32 1.0, %v7907_v56 }
 0x416   :  { %v7911_v38 = vpop.eup %7910  ;;  %v4323_v45 = vadd.f32 1.0, %v7909_v36 }
 0x417   :  { %v7913_v39 = vpop.eup %7912  ;;  %7922 = vlog2.f32 %v4054_v50  ;;  %v4324_v24 = vadd.f32 1.0, %v7911_v38 }
 0x418   :  { %v7915_v22 = vpop.eup %7914  ;;  %v4325_v48 = vadd.f32 1.0, %v7913_v39  ;;  %v4333_v62 = vmul.f32 0.5, %v4323_v45  ;;  %v7794_v45 = vld [vmem:[%s10239_s13 + $0x8] ss:$28 sps:$4 sm:$0xff]  }
 0x419   :  { %v7917_v47 = vpop.eup %7916  ;;  %v4326_v54 = vadd.f32 1.0, %v7915_v22  ;;  %v4334_v63 = vmul.f32 0.5, %v4324_v24 }
 0x41a   :  { %v7919_v53 = vpop.eup %7918  ;;  %v4335_v42 = vmul.f32 0.5, %v4325_v48  ;;  %v4327_v5 = vadd.f32 1.0, %v7917_v47 }
 0x41b   :  { %v7921_v58 = vpop.eup %7920  ;;  %v4328_v37 = vadd.f32 1.0, %v7919_v53  ;;  %v4336_v6 = vmul.f32 0.5, %v4326_v54 }
 0x41c   :  { %v4329_v9 = vadd.f32 1.0, %v7921_v58  ;;  %v4337_v30 = vmul.f32 0.5, %v4327_v5  ;;  %v7799_v58 = vld [vmem:[%s10239_s13 + $0x44] ss:$28 sps:$4 sm:$0xff]  }
 0x41d   :  { %v4338_v31 = vmul.f32 0.5, %v4328_v37 }
 0x41e   :  { %v4339_v12 = vmul.f32 0.5, %v4329_v9 }
 0x421   :  { %v7923_v10 = vpop.eup %7922 }
 0x422   :  { %v4056_v17 = vmul.f32 0.6931472, %v7923_v10 }
 0x424   :  { %v4057_v29 = vadd.f32 %v4056_v17, %v4049_v11 }
 0x426   :  { %v4260_v43 = vmul.f32 %v6599_v13, %v4057_v29  ;;  %v4261_v18 = vmul.f32 %v6600_v46, %v4057_v29  ;;  %v4262_v33 = vmul.f32 %v6603_v51, %v4057_v29  ;;  %v4263_v56 = vmul.f32 %v6604_v19, %v4057_v29  ;;  %v7829_v13 = vld [vmem:[%s10243_s15 + $0x8] sm:$0xff]   ;;  %v7800_v46 = vld [vmem:[%s10239_s13 + $0x78] ss:$28 sps:$4 sm:$0xff]  }
 0x427   :  { %v4264_v36 = vmul.f32 %v6607_v20, %v4057_v29  ;;  %v4265_v50 = vmul.f32 %v6608_v21, %v4057_v29  ;;  %v4266_v38 = vmul.f32 %v6611_v26, %v4057_v29  ;;  %v4267_v39 = vmul.f32 %v6612_v28, %v4057_v29  ;;  %v7805_v51 = vld [vmem:[%s10239_s13 + $0xb4] ss:$28 sps:$4 sm:$0xff]   ;;  %v7832_v28 = vld [vmem:[%s10243_s15 + $0x58] sm:$0xff]  }
 0x428   :  { %v4270_v22 = vadd.f32 %v7015_v44, %v4260_v43  ;;  %v4271_v40 = vadd.f32 %v7015_v44, %v4261_v18  ;;  %v4272_v41 = vadd.f32 %v7015_v44, %v4262_v33  ;;  %v4273_v34 = vadd.f32 %v7015_v44, %v4263_v56  ;;  %v7830_v20 = vld [vmem:[%s10243_s15 + $0x50] sm:$0xff]   ;;  %v7835_v43 = vld [vmem:[%s10243_s15 + $0x20] sm:$0xff]   ;;  %v7836_v56 = vld [vmem:[%s10243_s15 + $0x68] sm:$0xff]  }
 0x429   :  { %v4274_v59 = vadd.f32 %v7015_v44, %v4264_v36  ;;  %v4275_v24 = vadd.f32 %v7015_v44, %v4265_v50  ;;  %v4276_v47 = vadd.f32 %v7015_v44, %v4266_v38  ;;  %v4277_v48 = vadd.f32 %v7015_v44, %v4267_v39  ;;  %v7831_v21 = vld [vmem:[%s10243_s15 + $0x10] sm:$0xff]   ;;  %v7820_v39 = vld [vmem:[%s10239_s13 + $0x88] ss:$28 sps:$4 sm:$0xff]  }
 0x42a   :  { %v4340_v53 = vmul.f32 %v4330_v55, %v4270_v22  ;;  %v4341_v54 = vmul.f32 %v4331_v60, %v4271_v40  ;;  %v4342_v0 = vmul.f32 %v4332_v61, %v4272_v41  ;;  %v4343_v3 = vmul.f32 %v4333_v62, %v4273_v34  ;;  %v7797_v61 = vld [vmem:[%s10239_s13 + $0x40] ss:$28 sps:$4 sm:$0xff]   ;;  %v7803_v26 = vld [vmem:[%s10239_s13 + $0xb0] ss:$28 sps:$4 sm:$0xff]   ;;  %v7812_v18 = vld [vmem:[%s10239_s13 + $0x158] ss:$28 sps:$4 sm:$0xff]  }
 0x42b   :  { %v4344_v4 = vmul.f32 %v4334_v63, %v4274_v59  ;;  %v4345_v5 = vmul.f32 %v4335_v42, %v4275_v24  ;;  %v4346_v37 = vmul.f32 %v4336_v6, %v4276_v47  ;;  %v4347_v7 = vmul.f32 %v4337_v30, %v4277_v48  ;;  %v7802_v42 = vld [vmem:[%s10239_s13 + $0x7c] ss:$28 sps:$4 sm:$0xff]   ;;  %v7806_v30 = vld [vmem:[%s10239_s13 + $0xe8] ss:$28 sps:$4 sm:$0xff]   ;;  %v7817_v33 = vld [vmem:[%s10239_s13 + $0x194] ss:$28 sps:$4 sm:$0xff]  }
 0x42c   :  { %v9769_v9 = vpack.c.bf16 %v4341_v54, %v4340_v53  ;;  %v9771_v10 = vpack.c.bf16 %v4343_v3, %v4342_v0  ;;  %v4268_v55 = vmul.f32 %v6615_v2, %v4057_v29  ;;  %v4269_v60 = vmul.f32 %v6616_v32, %v4057_v29  ;;  %v7808_v29 = vld [vmem:[%s10239_s13 + $0xec] ss:$28 sps:$4 sm:$0xff]   ;;  %v7834_v2 = vld [vmem:[%s10243_s15 + $0x60] sm:$0xff]   ;;  %v7818_v50 = vld [vmem:[%s10239_s13 + $0x18] ss:$28 sps:$4 sm:$0xff]  }
 0x42d   :  { %v9779_v62 = vpack.c.bf16 %v4345_v5, %v4344_v4  ;;  %v9781_v63 = vpack.c.bf16 %v4347_v7, %v4346_v37  ;;  %v7809_v32 = vld [vmem:[%s10239_s13 + $0x120] ss:$28 sps:$4 sm:$0xff]   ;;  %v7815_v36 = vld [vmem:[%s10239_s13 + $0x190] ss:$28 sps:$4 sm:$0xff]   ;;  %v7822_v40 = vld [vmem:[%s10239_s13 + $0xf8] ss:$28 sps:$4 sm:$0xff]  }
 0x42e   :  { %4812 = vmatmul.mubr.bf16.vlgmr.msra.gmra.mrb[20].mxu0 %v9769_v9  ;;  %4978 = vmatmul.mubr.bf16.vlgmr.msra.gmra.mrb[32].mxu1 %v9769_v9  ;;  %v4278_v6 = vadd.f32 %v7015_v44, %v4268_v55  ;;  %v4279_v11 = vadd.f32 %v7015_v44, %v4269_v60  ;;  %v7833_v44 = vld [vmem:[%s10243_s15 + $0x18] sm:$0xff]   ;;  %v7819_v38 = vld [vmem:[%s10239_s13 + $0x50] ss:$28 sps:$4 sm:$0xff]   ;;  %v7824_v34 = vld [vmem:[%s10239_s13 + $0x168] ss:$28 sps:$4 sm:$0xff]  }
 0x42f   :  { %4863 = vmatpush1.bf16.msra.mxu0 %v7794_v45  ;;  %4821 = vmatprep.mubr.bf16.mxu0 %v7924_v1  ;;  %v7821_v22 = vld [vmem:[%s10239_s13 + $0xc0] ss:$28 sps:$4 sm:$0xff]   ;;  %v7823_v41 = vld [vmem:[%s10239_s13 + $0x130] ss:$28 sps:$4 sm:$0xff]  }
 0x430   :  { %4864 = vmatprep.subr.bf16.mxu0 %v7799_v58  ;;  %4987 = vmatprep.mubr.bf16.mxu1 %v7924_v1  ;;  %v4348_v14 = vmul.f32 %v4338_v31, %v4278_v6  ;;  %v4349_v17 = vmul.f32 %v4339_v12, %v4279_v11  ;;  %v7811_v31 = vld [vmem:[%s10239_s13 + $0x124] ss:$28 sps:$4 sm:$0xff]   ;;  %v7814_v12 = vld [vmem:[%s10239_s13 + $0x15c] ss:$28 sps:$4 sm:$0xff]   ;;  %v7838_v59 = vld [vmem:[%s10243_s15 + $0x70] sm:$0xff]  }
 0x431   :  { %6769 = vmatpush3.bf16.msra.mxu1 %v7827_v8  ;;  %v7825_v45 = vld [vmem:[%s10239_s13 + $0x1a0] ss:$28 sps:$4 sm:$0xff]   ;;  %v7839_v24 = vld [vmem:[%s10243_s15 + $0x30] sm:$0xff]   ;;  %v7844_v58 = vld [vmem:[%s10243_s15 + $0xc8] sm:$0xff]  }
 0x432   :  { %v9799_v19 = vpack.c.bf16 %v4349_v17, %v4348_v14  ;;  %6770 = vmatprep.subr.bf16.mxu1 %v7828_v52  ;;  %v7840_v47 = vld [vmem:[%s10243_s15 + $0x78] sm:$0xff]   ;;  %v7842_v53 = vld [vmem:[%s10243_s15 + $0xc0] sm:$0xff]   ;;  %v7845_v0 = vld [vmem:[%s10243_s15 + $0x88] sm:$0xff]  }
 0x433   :  { %4865 = vmatpush1.bf16.msra.mxu0 %v7797_v61  ;;  %v7841_v48 = vld [vmem:[%s10243_s15 + $0x38] sm:$0xff]   ;;  %v7843_v54 = vld [vmem:[%s10243_s15 + $0x80] sm:$0xff]   ;;  %v7848_v4 = vld [vmem:[%s10243_s15 + $0xd0] sm:$0xff]  }
 0x434   :  { %4866 = vmatprep.subr.bf16.mxu0 %v7802_v42  ;;  %v7846_v3 = vld [vmem:[%s10243_s15 + $0x140] sm:$0xff]   ;;  %v7849_v5 = vld [vmem:[%s10243_s15 + $0x90] sm:$0xff]   ;;  %v7852_v37 = vld [vmem:[%s10243_s15 + $0xd8] sm:$0xff]  }
 0x435   :  { %6771 = vmatpush3.bf16.msra.mxu1 %v7829_v13  ;;  %v7853_v7 = vld [vmem:[%s10243_s15 + $0x98] sm:$0xff]   ;;  %v7856_v8 = vld [vmem:[%s10243_s15 + $0xe0] sm:$0xff]   ;;  %v7863_v55 = vld [vmem:[%s10243_s15 + $0xa8] sm:$0xff]  }
 0x436   :  { %4822 = vmatmul.mubr.bf16.gmra.mrb[24].mxu0 %v9771_v10  ;;  %4988 = vmatmul.mubr.bf16.gmra.mrb[36].mxu1 %v9771_v10  ;;  %v7866_v60 = vld [vmem:[%s10243_s15 + $0xf0] sm:$0xff]   ;;  %v7870_v61 = vld [vmem:[%s10243_s15 + $0xf8] sm:$0xff]  }
 0x437   :  { %4867 = vmatpush1.bf16.msra.mxu0 %v7800_v46  ;;  %4831 = vmatprep.mubr.bf16.mxu0 %v7924_v1  ;;  %v7867_v52 = vld [vmem:[%s10243_s15 + $0xb0] sm:$0xff]  }
 0x438   :  { %4868 = vmatprep.subr.bf16.mxu0 %v7805_v51  ;;  %4997 = vmatprep.mubr.bf16.mxu1 %v7924_v1 }
 0x439   :  { %6772 = vmatprep.subr.bf16.mxu1 %v7830_v20 }
 0x43a   :  { %6773 = vmatpush3.bf16.msra.mxu1 %v7831_v21 }
 0x43b   :  { %4869 = vmatpush1.bf16.msra.mxu0 %v7803_v26  ;;  %6774 = vmatprep.subr.bf16.mxu1 %v7832_v28 }
 0x43c   :  { %4870 = vmatprep.subr.bf16.mxu0 %v7808_v29 }
 0x43e   :  { %4832 = vmatmul.mubr.bf16.gmra.mrb[28].mxu0 %v9779_v62  ;;  %4998 = vmatmul.mubr.bf16.gmra.mrb[40].mxu1 %v9779_v62 }
 0x43f   :  { %4871 = vmatpush1.bf16.msra.mxu0 %v7806_v30  ;;  %4841 = vmatprep.mubr.bf16.mxu0 %v7924_v1 }
 0x440   :  { %5007 = vmatprep.mubr.bf16.mxu1 %v7924_v1  ;;  %4872 = vmatprep.subr.bf16.mxu0 %v7811_v31 }
 0x441   :  { %6775 = vmatpush3.bf16.msra.mxu1 %v7833_v44 }
 0x442   :  { %6776 = vmatprep.subr.bf16.mxu1 %v7834_v2 }
 0x443   :  { %4873 = vmatpush1.bf16.msra.mxu0 %v7809_v32 }
 0x444   :  { %4874 = vmatprep.subr.bf16.mxu0 %v7814_v12 }
 0x445   :  { %6777 = vmatpush3.bf16.msra.mxu1 %v7835_v43 }
 0x446   :  { %4842 = vmatmul.mubr.bf16.gmra.mrb[32].mxu0 %v9781_v63  ;;  %5008 = vmatmul.mubr.bf16.gmra.mrb[44].mxu1 %v9781_v63 }
 0x447   :  { %4851 = vmatprep.mubr.bf16.mxu0 %v7924_v1  ;;  %4875 = vmatpush1.bf16.msra.mxu0 %v7812_v18 }
 0x448   :  { %5017 = vmatprep.mubr.bf16.mxu1 %v7924_v1  ;;  %4876 = vmatprep.subr.bf16.mxu0 %v7817_v33 }
 0x449   :  { %6778 = vmatprep.subr.bf16.mxu1 %v7836_v56 }
 0x44b   :  { %4877 = vmatpush1.bf16.msra.mxu0 %v7815_v36 }
 0x44c   :  { %6949 = vmatprep.subr.bf16.mxu0 %v7925_v15 }
 0x44e   :  { %4852 = vmatmul.mubr.bf16.gmra.mrb[36].mxu0 %v9799_v19  ;;  %5018 = vmatmul.mubr.bf16.gmra.mrb[48].mxu1 %v9799_v19 }
 0x44f   :  { %4894 = vmatprep.mubr.bf16.mxu0 %v7924_v1 }
 0x456   :  { %4895 = vmatmul.mubr.bf16.vlgmr.msra.gmra.mrb[40].mxu0 %v9769_v9 }
 0x457   :  { %6950 = vmatpush3.bf16.msra.mxu0 %v7818_v50  ;;  %4904 = vmatprep.mubr.bf16.mxu0 %v7924_v1 }
 0x458   :  { %6951 = vmatprep.subr.bf16.mxu0 %v7925_v15 }
 0x45b   :  { %6952 = vmatpush3.bf16.msra.mxu0 %v7819_v38 }
 0x45c   :  { %6953 = vmatprep.subr.bf16.mxu0 %v7925_v15 }
 0x45e   :  { %4905 = vmatmul.mubr.bf16.gmra.mrb[44].mxu0 %v9771_v10 }
 0x45f   :  { %6954 = vmatpush3.bf16.msra.mxu0 %v7820_v39  ;;  %4914 = vmatprep.mubr.bf16.mxu0 %v7924_v1 }
 0x460   :  { %6955 = vmatprep.subr.bf16.mxu0 %v7925_v15 }
 0x463   :  { %6956 = vmatpush3.bf16.msra.mxu0 %v7821_v22 }
 0x464   :  { %6957 = vmatprep.subr.bf16.mxu0 %v7925_v15 }
 0x466   :  { %4915 = vmatmul.mubr.bf16.gmra.mrb[48].mxu0 %v9779_v62 }
 0x467   :  { %4924 = vmatprep.mubr.bf16.mxu0 %v7924_v1  ;;  %6958 = vmatpush3.bf16.msra.mxu0 %v7822_v40 }
 0x468   :  { %6959 = vmatprep.subr.bf16.mxu0 %v7925_v15 }
 0x46b   :  { %6960 = vmatpush3.bf16.msra.mxu0 %v7823_v41  ;;  %v7847_v41 = vld [vmem:[%s10243_s15 + $0x100] sm:$0xff]  }
 0x46c   :  { %6961 = vmatprep.subr.bf16.mxu0 %v7925_v15 }
 0x46e   :  { %4925 = vmatmul.mubr.bf16.gmra.mrb[52].mxu0 %v9781_v63 }
 0x46f   :  { %4934 = vmatprep.mubr.bf16.mxu0 %v7924_v1  ;;  %6962 = vmatpush3.bf16.msra.mxu0 %v7824_v34  ;;  %v7837_v1 = vld [vmem:[%s10243_s15 + $0x28] sm:$0xff]  }
 0x470   :  { %6963 = vmatprep.subr.bf16.mxu0 %v7925_v15  ;;  %6779 = vmatpush3.bf16.msra.mxu1 %v7837_v1 }
 0x471   :  { %6780 = vmatprep.subr.bf16.mxu1 %v7838_v59 }
 0x473   :  { %6964 = vmatpush3.bf16.msra.mxu0 %v7825_v45 }
 0x474   :  { %6781 = vmatpush3.bf16.msra.mxu1 %v7839_v24  ;;  %6814 = vmatprep.subr.bf16.mxu0 %v7842_v53  ;;  %v7850_v24 = vld [vmem:[%s10243_s15 + $0x148] sm:$0xff]  }
 0x475   :  { %6782 = vmatprep.subr.bf16.mxu1 %v7840_v47 }
 0x476   :  { %4935 = vmatmul.mubr.bf16.gmra.mrb[56].mxu0 %v9799_v19 }
 0x477   :  { %6965 = vmatprep.mubr.msk.bf16.mxu0 %vm7926_vm1, %v7925_v15 }
 0x478   :  { %6783 = vmatpush3.bf16.msra.mxu1 %v7841_v48 }
 0x479   :  { %6860 = vmatprep.subr.bf16.mxu1 %v7846_v3 }
 0x47e   :  { %6966 = vmatmul.mubr.bf16.vlgmr.msra.gmra.mrb[60].mxu0 %v9769_v9  ;;  %v7858_v9 = vld [vmem:[%s10243_s15 + $0xa0] sm:$0xff]  }
 0x47f   :  { %6969 = vmatprep.mubr.msk.bf16.mxu0 %vm7926_vm1, %v7925_v15  ;;  %6815 = vmatpush3.bf16.msra.mxu0 %v7843_v54 }
 0x480   :  { %6816 = vmatprep.subr.bf16.mxu0 %v7844_v58 }
 0x483   :  { %6817 = vmatpush3.bf16.msra.mxu0 %v7845_v0 }
 0x484   :  { %6818 = vmatprep.subr.bf16.mxu0 %v7848_v4 }
 0x486   :  { %6970 = vmatmul.mubr.bf16.gmra.mrb[64].mxu0 %v9771_v10  ;;  %v7861_v10 = vld [vmem:[%s10243_s15 + $0xe8] sm:$0xff]  }
 0x487   :  { %6973 = vmatprep.mubr.msk.bf16.mxu0 %vm7926_vm1, %v7925_v15  ;;  %6819 = vmatpush3.bf16.msra.mxu0 %v7849_v5 }
 0x488   :  { %6820 = vmatprep.subr.bf16.mxu0 %v7852_v37 }
 0x48b   :  { %6821 = vmatpush3.bf16.msra.mxu0 %v7853_v7  ;;  %v7851_v7 = vld [vmem:[%s10243_s15 + $0x108] sm:$0xff]  }
 0x48c   :  { %6822 = vmatprep.subr.bf16.mxu0 %v7856_v8 }
 0x48e   :  { %6974 = vmatmul.mubr.bf16.gmra.mrb[68].mxu0 %v9779_v62  ;;  %v7871_v62 = vld [vmem:[%s10243_s15 + $0xb8] sm:$0xff]  }
 0x48f   :  { %6977 = vmatprep.mubr.msk.bf16.mxu0 %vm7926_vm1, %v7925_v15  ;;  %6823 = vmatpush3.bf16.msra.mxu0 %v7858_v9 }
 0x490   :  { %6824 = vmatprep.subr.bf16.mxu0 %v7861_v10 }
 0x493   :  { %6825 = vmatpush3.bf16.msra.mxu0 %v7863_v55 }
 0x494   :  { %6826 = vmatprep.subr.bf16.mxu0 %v7866_v60  ;;  %v7854_v60 = vld [vmem:[%s10243_s15 + $0x150] sm:$0xff]  }
 0x496   :  { %6978 = vmatmul.mubr.bf16.gmra.mrb[72].mxu0 %v9781_v63  ;;  %v9990_v63 = vld [vmem:[%s10244_s14] sm:$0x7f] }
 0x497   :  { %6981 = vmatprep.mubr.msk.bf16.mxu0 %vm7926_vm1, %v7925_v15  ;;  %6827 = vmatpush3.bf16.msra.mxu0 %v7867_v52  ;;  %v9994_v42 = vrot.slane %v9990_v63, %v8274_v23  ;;  %v9998_v6 = vrot.slane %v9990_v63, %v8676_v16  ;;  %v10002_v11 = vrot.slane %v9990_v63, %v8282_v25 }
 0x498   :  { %6828 = vmatprep.subr.bf16.mxu0 %v7870_v61  ;;  %v10006_v13 = vrot.slane %v9990_v63, %v8473_v57 }
 0x49b   :  { %6829 = vmatpush3.bf16.msra.mxu0 %v7871_v62 }
 0x49c   :  { %6985 = vmatprep.subr.bf16.mxu0 %v7925_v15 }
 0x49e   :  { %6982 = vmatmul.mubr.bf16.gmra.mrb[76].mxu0 %v9799_v19 }
 0x501   :  { %v4813_v14 = vpop.f32.mrb[20].mxu0  ;;  %v4979_v17 = vpop.f32.mrb[32].mxu1 }
 0x502   :  { %v4814_v46 = vadd.f32 %v4813_v14, %v9994_v42  ;;  %v4980_v51 = vadd.f32 %v4979_v17, %v9998_v6  ;;  %v4815_v23 = vpop.f32.mrb[21].mxu0  ;;  %v4981_v19 = vpop.f32.mrb[33].mxu1 }
 0x503   :  { %v4816_v20 = vadd.f32 %v4815_v23, %v10002_v11  ;;  %v4982_v16 = vadd.f32 %v4981_v19, %v10006_v13  ;;  %v4817_v21 = vpop.f32.mrb[22].mxu0  ;;  %v4983_v26 = vpop.f32.mrb[34].mxu1 }
 0x504   :  { %v4818_v25 = vadd.f32 %v4817_v21, %v9994_v42  ;;  %v4984_v28 = vadd.f32 %v4983_v26, %v9998_v6  ;;  %v4819_v57 = vpop.f32.mrb[23].mxu0  ;;  %v4985_v29 = vpop.f32.mrb[35].mxu1  ;;  %v5101_v44 = vmax.f32 %v4814_v46, 0.0  ;;  %v5105_v2 = vmax.f32 %v4980_v51, 0.0 }
 0x505   :  { %v4820_v30 = vadd.f32 %v4819_v57, %v10002_v11  ;;  %v4986_v31 = vadd.f32 %v4985_v29, %v10006_v13  ;;  %v5102_v43 = vmax.f32 %v4816_v20, 0.0  ;;  %v5106_v18 = vmax.f32 %v4982_v16, 0.0  ;;  %v7855_v16 = vld [vmem:[%s10243_s15 + $0x110] sm:$0xff]   ;;  %v7857_v57 = vld [vmem:[%s10243_s15 + $0x158] sm:$0xff]  }
 0x506   :  { %v5108_v32 = vmax.f32 %v4818_v25, 0.0  ;;  %v5112_v12 = vmax.f32 %v4984_v28, 0.0 }
 0x507   :  { %v5109_v33 = vmax.f32 %v4820_v30, 0.0  ;;  %v5113_v56 = vmax.f32 %v4986_v31, 0.0 }
 0x508   :  { %v5171_v36 = vpack.c.bf16 %v5108_v32, %v5101_v44  ;;  %v10016_v50 = vpack.c.bf16 %v5112_v12, %v5105_v2 }
 0x509   :  { %v5172_v38 = vpack.c.bf16 %v5109_v33, %v5102_v43  ;;  %v10018_v39 = vpack.c.bf16 %v5113_v56, %v5106_v18  ;;  %v4823_v22 = vpop.f32.mrb[24].mxu0  ;;  %v4989_v40 = vpop.f32.mrb[36].mxu1  ;;  %v7859_v56 = vld [vmem:[%s10243_s15 + $0x118] sm:$0xff]  }
 0x50a   :  { %v4824_v34 = vadd.f32 %v4823_v22, %v9994_v42  ;;  %v4990_v45 = vadd.f32 %v4989_v40, %v9998_v6  ;;  %v4825_v1 = vpop.f32.mrb[25].mxu0  ;;  %v4991_v59 = vpop.f32.mrb[37].mxu1 }
 0x50b   :  { %v4826_v47 = vadd.f32 %v4825_v1, %v10002_v11  ;;  %v4992_v48 = vadd.f32 %v4991_v59, %v10006_v13  ;;  %v4827_v53 = vpop.f32.mrb[26].mxu0  ;;  %v4993_v54 = vpop.f32.mrb[38].mxu1  ;;  %5660 = vmatprep.mubr.bf16.mxu1 %v5172_v38 }
 0x50c   :  { %v4828_v58 = vadd.f32 %v4827_v53, %v9994_v42  ;;  %v4994_v0 = vadd.f32 %v4993_v54, %v9998_v6  ;;  %v4829_v3 = vpop.f32.mrb[27].mxu0  ;;  %v4995_v4 = vpop.f32.mrb[39].mxu1  ;;  %5661 = vmatmul.mubr.bf16.vlgmr.msra.gmra.mrb[52].mxu1 %v5171_v36  ;;  %v5115_v8 = vmax.f32 %v4824_v34, 0.0  ;;  %v5119_v9 = vmax.f32 %v4990_v45, 0.0 }
 0x50d   :  { %v4830_v5 = vadd.f32 %v4829_v3, %v10002_v11  ;;  %v4996_v37 = vadd.f32 %v4995_v4, %v10006_v13  ;;  %6861 = vmatpush3.bf16.msra.mxu1 %v7847_v41  ;;  %v5116_v52 = vmax.f32 %v4826_v47, 0.0  ;;  %v5120_v61 = vmax.f32 %v4992_v48, 0.0  ;;  %v7860_v41 = vld [vmem:[%s10243_s15 + $0x160] sm:$0xff]  }
 0x50e   :  { %v5122_v10 = vmax.f32 %v4828_v58, 0.0  ;;  %v5126_v55 = vmax.f32 %v4994_v0, 0.0  ;;  %6862 = vmatprep.subr.bf16.mxu1 %v7850_v24  ;;  %v7862_v0 = vld [vmem:[%s10243_s15 + $0x120] sm:$0xff]  }
 0x50f   :  { %v5123_v62 = vmax.f32 %v4830_v5, 0.0  ;;  %v5127_v14 = vmax.f32 %v4996_v37, 0.0 }
 0x510   :  { %v5178_v17 = vpack.c.bf16 %v5122_v10, %v5115_v8  ;;  %v10040_v46 = vpack.c.bf16 %v5126_v55, %v5119_v9 }
 0x511   :  { %v5179_v51 = vpack.c.bf16 %v5123_v62, %v5116_v52  ;;  %v10042_v23 = vpack.c.bf16 %v5127_v14, %v5120_v61  ;;  %v4833_v19 = vpop.f32.mrb[28].mxu0  ;;  %v4999_v20 = vpop.f32.mrb[40].mxu1  ;;  %6863 = vmatpush3.bf16.msra.mxu1 %v7851_v7  ;;  %v7864_v7 = vld [vmem:[%s10243_s15 + $0x168] sm:$0xff]  }
 0x512   :  { %v4834_v21 = vadd.f32 %v4833_v19, %v9994_v42  ;;  %v5000_v26 = vadd.f32 %v4999_v20, %v9998_v6  ;;  %v4835_v25 = vpop.f32.mrb[29].mxu0  ;;  %v5001_v28 = vpop.f32.mrb[41].mxu1  ;;  %6864 = vmatprep.subr.bf16.mxu1 %v7854_v60 }
 0x513   :  { %v4836_v29 = vadd.f32 %v4835_v25, %v10002_v11  ;;  %v5002_v30 = vadd.f32 %v5001_v28, %v10006_v13  ;;  %v4837_v31 = vpop.f32.mrb[30].mxu0  ;;  %v5003_v44 = vpop.f32.mrb[42].mxu1  ;;  %5668 = vmatprep.mubr.bf16.mxu1 %v5179_v51  ;;  %v7865_v51 = vld [vmem:[%s10243_s15 + $0x128] sm:$0xff]  }
 0x514   :  { %v4838_v2 = vadd.f32 %v4837_v31, %v9994_v42  ;;  %v5004_v32 = vadd.f32 %v5003_v44, %v9998_v6  ;;  %v4839_v12 = vpop.f32.mrb[31].mxu0  ;;  %v5005_v43 = vpop.f32.mrb[43].mxu1  ;;  %5669 = vmatmul.mubr.bf16.gmra.mrb[56].mxu1 %v5178_v17  ;;  %v5129_v36 = vmax.f32 %v4834_v21, 0.0  ;;  %v5133_v38 = vmax.f32 %v5000_v26, 0.0  ;;  %v7868_v26 = vld [vmem:[%s10243_s15 + $0x170] sm:$0xff]  }
 0x515   :  { %v4840_v18 = vadd.f32 %v4839_v12, %v10002_v11  ;;  %v5006_v33 = vadd.f32 %v5005_v43, %v10006_v13  ;;  %6865 = vmatpush3.bf16.msra.mxu1 %v7855_v16  ;;  %v5130_v34 = vmax.f32 %v4836_v29, 0.0  ;;  %v5134_v45 = vmax.f32 %v5002_v30, 0.0  ;;  %v7869_v43 = vld [vmem:[%s10243_s15 + $0x130] sm:$0xff]  }
 0x516   :  { %v5136_v22 = vmax.f32 %v4838_v2, 0.0  ;;  %v5140_v40 = vmax.f32 %v5004_v32, 0.0  ;;  %6866 = vmatprep.subr.bf16.mxu1 %v7857_v57 }
 0x517   :  { %v5137_v1 = vmax.f32 %v4840_v18, 0.0  ;;  %v5141_v59 = vmax.f32 %v5006_v33, 0.0 }
 0x518   :  { %v5185_v24 = vpack.c.bf16 %v5136_v22, %v5129_v36  ;;  %v10064_v47 = vpack.c.bf16 %v5140_v40, %v5133_v38  ;;  %v7872_v38 = vld [vmem:[%s10243_s15 + $0x178] sm:$0xff]  }
 0x519   :  { %v5186_v48 = vpack.c.bf16 %v5137_v1, %v5130_v34  ;;  %v10066_v53 = vpack.c.bf16 %v5141_v59, %v5134_v45  ;;  %v4843_v54 = vpop.f32.mrb[32].mxu0  ;;  %v5009_v58 = vpop.f32.mrb[44].mxu1  ;;  %6867 = vmatpush3.bf16.msra.mxu1 %v7859_v56 }
 0x51a   :  { %v4844_v3 = vadd.f32 %v4843_v54, %v9994_v42  ;;  %v5010_v4 = vadd.f32 %v5009_v58, %v9998_v6  ;;  %v4845_v5 = vpop.f32.mrb[33].mxu0  ;;  %v5011_v37 = vpop.f32.mrb[45].mxu1  ;;  %6868 = vmatprep.subr.bf16.mxu1 %v7860_v41  ;;  %v10110_v54 = vrot.slane %v9990_v63, %v8287_v27 }
 0x51b   :  { %v4846_v8 = vadd.f32 %v4845_v5, %v10002_v11  ;;  %v5012_v9 = vadd.f32 %v5011_v37, %v10006_v13  ;;  %v4847_v10 = vpop.f32.mrb[34].mxu0  ;;  %v5013_v55 = vpop.f32.mrb[46].mxu1  ;;  %5676 = vmatprep.mubr.bf16.mxu1 %v5186_v48  ;;  %v10106_v48 = vrot.slane %v9990_v63, %v8458_v49 }
 0x51c   :  { %v4848_v60 = vadd.f32 %v4847_v10, %v9994_v42  ;;  %v5014_v52 = vadd.f32 %v5013_v55, %v9998_v6  ;;  %v4849_v61 = vpop.f32.mrb[35].mxu0  ;;  %v5015_v62 = vpop.f32.mrb[47].mxu1  ;;  %5677 = vmatmul.mubr.bf16.gmra.mrb[60].mxu1 %v5185_v24  ;;  %v5143_v19 = vmax.f32 %v4844_v3, 0.0  ;;  %v5147_v20 = vmax.f32 %v5010_v4, 0.0 }
 0x51d   :  { %v4850_v14 = vadd.f32 %v4849_v61, %v10002_v11  ;;  %v5016_v17 = vadd.f32 %v5015_v62, %v10006_v13  ;;  %6869 = vmatpush3.bf16.msra.mxu1 %v7862_v0  ;;  %v5144_v25 = vmax.f32 %v4846_v8, 0.0  ;;  %v5148_v28 = vmax.f32 %v5012_v9, 0.0 }
 0x51e   :  { %v5150_v16 = vmax.f32 %v4848_v60, 0.0  ;;  %v5154_v21 = vmax.f32 %v5014_v52, 0.0  ;;  %6870 = vmatprep.subr.bf16.mxu1 %v7864_v7 }
 0x51f   :  { %v5151_v57 = vmax.f32 %v4850_v14, 0.0  ;;  %v5155_v29 = vmax.f32 %v5016_v17, 0.0 }
 0x520   :  { %v5192_v30 = vpack.c.bf16 %v5150_v16, %v5143_v19  ;;  %v10088_v31 = vpack.c.bf16 %v5154_v21, %v5147_v20 }
 0x521   :  { %v5193_v44 = vpack.c.bf16 %v5151_v57, %v5144_v25  ;;  %v10090_v2 = vpack.c.bf16 %v5155_v29, %v5148_v28  ;;  %v4853_v32 = vpop.f32.mrb[36].mxu0  ;;  %v5019_v12 = vpop.f32.mrb[48].mxu1  ;;  %6871 = vmatpush3.bf16.msra.mxu1 %v7865_v51  ;;  %v7874_v28 = vld [vmem:[%s10243_s15 + $0x180] sm:$0xff]  }
 0x522   :  { %v4854_v18 = vadd.f32 %v4853_v32, %v9994_v42  ;;  %v5020_v33 = vadd.f32 %v5019_v12, %v9998_v6  ;;  %v4855_v56 = vpop.f32.mrb[37].mxu0  ;;  %v5021_v36 = vpop.f32.mrb[49].mxu1  ;;  %6872 = vmatprep.subr.bf16.mxu1 %v7868_v26 }
 0x523   :  { %v4856_v22 = vadd.f32 %v4855_v56, %v10002_v11  ;;  %v5022_v40 = vadd.f32 %v5021_v36, %v10006_v13  ;;  %v4857_v41 = vpop.f32.mrb[38].mxu0  ;;  %v5023_v34 = vpop.f32.mrb[50].mxu1  ;;  %5684 = vmatprep.mubr.bf16.mxu1 %v5193_v44 }
 0x524   :  { %v4858_v45 = vadd.f32 %v4857_v41, %v9994_v42  ;;  %v5024_v1 = vadd.f32 %v5023_v34, %v9998_v6  ;;  %v4859_v59 = vpop.f32.mrb[39].mxu0  ;;  %v5025_v24 = vpop.f32.mrb[51].mxu1  ;;  %5685 = vmatmul.mubr.bf16.gmra.mrb[64].mxu1 %v5192_v30  ;;  %v7873_v42 = vld [vmem:[%s10243_s15 + $0x138] sm:$0xff]   ;;  %v5157_v6 = vmax.f32 %v4854_v18, 0.0  ;;  %v5161_v3 = vmax.f32 %v5020_v33, 0.0 }
 0x525   :  { %v4860_v58 = vadd.f32 %v4859_v59, %v10002_v11  ;;  %v5026_v0 = vadd.f32 %v5025_v24, %v10006_v13  ;;  %6873 = vmatpush3.bf16.msra.mxu1 %v7869_v43  ;;  %v5158_v49 = vmax.f32 %v4856_v22, 0.0  ;;  %v5162_v37 = vmax.f32 %v5022_v40, 0.0  ;;  %v7875_v43 = vld [vmem:[%s10243_s15 + $0x188] sm:$0xff]  }
 0x526   :  { %v5164_v4 = vmax.f32 %v4858_v45, 0.0  ;;  %v5168_v5 = vmax.f32 %v5024_v1, 0.0  ;;  %6874 = vmatprep.subr.bf16.mxu1 %v7872_v38 }
 0x527   :  { %v5165_v7 = vmax.f32 %v4860_v58, 0.0  ;;  %v5169_v8 = vmax.f32 %v5026_v0, 0.0 }
 0x528   :  { %v5199_v27 = vpack.c.bf16 %v5164_v4, %v5157_v6  ;;  %v10117_v9 = vpack.c.bf16 %v5168_v5, %v5161_v3 }
 0x529   :  { %v5200_v11 = vpack.c.bf16 %v5165_v7, %v5158_v49  ;;  %v10119_v10 = vpack.c.bf16 %v5169_v8, %v5162_v37  ;;  %v4896_v13 = vpop.f32.mrb[40].mxu0  ;;  %6875 = vmatpush3.bf16.msra.mxu1 %v7873_v42 }
 0x52a   :  { %v4897_v55 = vadd.f32 %v4896_v13, %v10106_v48  ;;  %v4898_v60 = vpop.f32.mrb[41].mxu0 }
 0x52b   :  { %v4899_v52 = vadd.f32 %v4898_v60, %v10110_v54  ;;  %v4900_v61 = vpop.f32.mrb[42].mxu0  ;;  %5692 = vmatprep.mubr.bf16.mxu1 %v5200_v11 }
 0x52c   :  { %v4901_v62 = vadd.f32 %v4900_v61, %v10106_v48  ;;  %v4902_v14 = vpop.f32.mrb[43].mxu0  ;;  %5693 = vmatmul.mubr.bf16.gmra.mrb[68].mxu1 %v5199_v27  ;;  %v5103_v51 = vmax.f32 %v4897_v55, 0.0 }
 0x52d   :  { %v4903_v17 = vadd.f32 %v4902_v14, %v10110_v54  ;;  %5806 = vmatprep.mubr.bf16.mxu1 %v10018_v39  ;;  %v5104_v20 = vmax.f32 %v4899_v52, 0.0 }
 0x52e   :  { %v5110_v19 = vmax.f32 %v4901_v62, 0.0 }
 0x52f   :  { %v5111_v16 = vmax.f32 %v4903_v17, 0.0 }
 0x530   :  { %v5173_v21 = vpack.c.bf16 %v5110_v19, %v5103_v51 }
 0x531   :  { %v5174_v26 = vpack.c.bf16 %v5111_v16, %v5104_v20  ;;  %v4906_v25 = vpop.f32.mrb[44].mxu0  ;;  %v4453_v20 = vrot.slane %v9990_v63, %v8712_v35 }
 0x532   :  { %v4907_v57 = vadd.f32 %v4906_v25, %v10106_v48  ;;  %v4908_v29 = vpop.f32.mrb[45].mxu0 }
 0x533   :  { %v4909_v30 = vadd.f32 %v4908_v29, %v10110_v54  ;;  %v4910_v44 = vpop.f32.mrb[46].mxu0  ;;  %5733 = vmatprep.mubr.bf16.mxu0 %v5174_v26 }
 0x534   :  { %v4911_v39 = vadd.f32 %v4910_v44, %v10106_v48  ;;  %v4912_v32 = vpop.f32.mrb[47].mxu0  ;;  %5734 = vmatmul.mubr.bf16.vlgmr.msra.gmra.mrb[80].mxu0 %v5173_v21  ;;  %5807 = vmatmul.mubr.bf16.vlgmr.msra.gmra.mrb[72].mxu1 %v10016_v50  ;;  %v5117_v18 = vmax.f32 %v4907_v57, 0.0 }
 0x535   :  { %v4913_v12 = vadd.f32 %v4912_v32, %v10110_v54  ;;  %5814 = vmatprep.mubr.bf16.mxu1 %v10042_v23  ;;  %6986 = vmatpush3.bf16.msra.mxu0 %v7874_v28  ;;  %v5118_v56 = vmax.f32 %v4909_v30, 0.0 }
 0x536   :  { %v5124_v33 = vmax.f32 %v4911_v39, 0.0  ;;  %6987 = vmatprep.subr.bf16.mxu0 %v7925_v15 }
 0x537   :  { %v5125_v36 = vmax.f32 %v4913_v12, 0.0 }
 0x538   :  { %v5180_v38 = vpack.c.bf16 %v5124_v33, %v5117_v18 }
 0x539   :  { %v5181_v22 = vpack.c.bf16 %v5125_v36, %v5118_v56  ;;  %v4916_v40 = vpop.f32.mrb[48].mxu0  ;;  %6988 = vmatpush3.bf16.msra.mxu0 %v7875_v43 }
 0x53a   :  { %v4917_v50 = vadd.f32 %v4916_v40, %v10106_v48  ;;  %v4918_v41 = vpop.f32.mrb[49].mxu0 }
 0x53b   :  { %v4919_v23 = vadd.f32 %v4918_v41, %v10110_v54  ;;  %v4920_v34 = vpop.f32.mrb[50].mxu0  ;;  %5741 = vmatprep.mubr.bf16.mxu0 %v5181_v22 }
 0x53c   :  { %v4921_v45 = vadd.f32 %v4920_v34, %v10106_v48  ;;  %v4922_v1 = vpop.f32.mrb[51].mxu0  ;;  %5742 = vmatmul.mubr.bf16.gmra.mrb[84].mxu0 %v5180_v38  ;;  %5815 = vmatmul.mubr.bf16.gmra.mrb[76].mxu1 %v10040_v46  ;;  %v5131_v24 = vmax.f32 %v4917_v50, 0.0 }
 0x53d   :  { %v4923_v59 = vadd.f32 %v4922_v1, %v10110_v54  ;;  %5822 = vmatprep.mubr.bf16.mxu1 %v10066_v53  ;;  %v5132_v0 = vmax.f32 %v4919_v23, 0.0 }
 0x53e   :  { %v5138_v58 = vmax.f32 %v4921_v45, 0.0 }
 0x53f   :  { %v5139_v42 = vmax.f32 %v4923_v59, 0.0 }
 0x540   :  { %v5187_v6 = vpack.c.bf16 %v5138_v58, %v5131_v24 }
 0x541   :  { %v5188_v3 = vpack.c.bf16 %v5139_v42, %v5132_v0  ;;  %v4926_v4 = vpop.f32.mrb[52].mxu0 }
 0x542   :  { %v4927_v5 = vadd.f32 %v4926_v4, %v10106_v48  ;;  %v4928_v49 = vpop.f32.mrb[53].mxu0 }
 0x543   :  { %v4929_v37 = vadd.f32 %v4928_v49, %v10110_v54  ;;  %v4930_v7 = vpop.f32.mrb[54].mxu0  ;;  %5749 = vmatprep.mubr.bf16.mxu0 %v5188_v3 }
 0x544   :  { %v4931_v46 = vadd.f32 %v4930_v7, %v10106_v48  ;;  %v4932_v8 = vpop.f32.mrb[55].mxu0  ;;  %5750 = vmatmul.mubr.bf16.gmra.mrb[88].mxu0 %v5187_v6  ;;  %5823 = vmatmul.mubr.bf16.gmra.mrb[80].mxu1 %v10064_v47  ;;  %v5145_v27 = vmax.f32 %v4927_v5, 0.0 }
 0x545   :  { %v4933_v53 = vadd.f32 %v4932_v8, %v10110_v54  ;;  %5830 = vmatprep.mubr.bf16.mxu1 %v10090_v2  ;;  %v5146_v13 = vmax.f32 %v4929_v37, 0.0 }
 0x546   :  { %v5152_v11 = vmax.f32 %v4931_v46, 0.0 }
 0x547   :  { %v5153_v55 = vmax.f32 %v4933_v53, 0.0 }
 0x548   :  { %v5194_v60 = vpack.c.bf16 %v5152_v11, %v5145_v27 }
 0x549   :  { %v5195_v52 = vpack.c.bf16 %v5153_v55, %v5146_v13  ;;  %v4936_v61 = vpop.f32.mrb[56].mxu0 }
 0x54a   :  { %v4937_v62 = vadd.f32 %v4936_v61, %v10106_v48  ;;  %v4938_v14 = vpop.f32.mrb[57].mxu0 }
 0x54b   :  { %v4939_v17 = vadd.f32 %v4938_v14, %v10110_v54  ;;  %v4940_v51 = vpop.f32.mrb[58].mxu0  ;;  %5757 = vmatprep.mubr.bf16.mxu0 %v5195_v52 }
 0x54c   :  { %v4941_v47 = vadd.f32 %v4940_v51, %v10106_v48  ;;  %v4942_v19 = vpop.f32.mrb[59].mxu0  ;;  %5758 = vmatmul.mubr.bf16.gmra.mrb[92].mxu0 %v5194_v60  ;;  %5831 = vmatmul.mubr.bf16.gmra.mrb[84].mxu1 %v10088_v31  ;;  %v5159_v16 = vmax.f32 %v4937_v62, 0.0 }
 0x54d   :  { %v4943_v2 = vadd.f32 %v4942_v19, %v10110_v54  ;;  %5838 = vmatprep.mubr.bf16.mxu1 %v10119_v10  ;;  %v5160_v26 = vmax.f32 %v4939_v17, 0.0 }
 0x54e   :  { %v5166_v21 = vmax.f32 %v4941_v47, 0.0 }
 0x54f   :  { %v5167_v25 = vmax.f32 %v4943_v2, 0.0 }
 0x550   :  { %v5201_v28 = vpack.c.bf16 %v5166_v21, %v5159_v16 }
 0x551   :  { %v5202_v57 = vpack.c.bf16 %v5167_v25, %v5160_v26  ;;  %v5062_v29 = vpop.f32.mrb[60].mxu0 }
 0x552   :  { %v5063_v30 = vadd.f32 %v5062_v29, %v4453_v20  ;;  %v6967_v48 = vpop.f32.mrb[61].mxu0 }
 0x553   :  { %v5065_v44 = vpop.f32.mrb[62].mxu0  ;;  %5765 = vmatprep.mubr.bf16.mxu0 %v5202_v57 }
 0x554   :  { %v5066_v39 = vadd.f32 %v5065_v44, %v4453_v20  ;;  %v6968_v31 = vpop.f32.mrb[63].mxu0  ;;  %5766 = vmatmul.mubr.bf16.gmra.mrb[96].mxu0 %v5201_v28  ;;  %5839 = vmatmul.mubr.bf16.gmra.mrb[88].mxu1 %v10117_v9  ;;  %v5107_v35 = vmax.f32 %v5063_v30, 0.0 }
 0x555   :  { %6989 = vmatprep.mubr.msk.bf16.mxu0 %vm7926_vm1, %v7925_v15 }
 0x556   :  { %v5114_v63 = vmax.f32 %v5066_v39, 0.0 }
 0x558   :  { %v5177_v54 = vpack.c.bf16 %v5114_v63, %v5107_v35 }
 0x559   :  { %v5070_v10 = vpop.f32.mrb[64].mxu0 }
 0x55a   :  { %v5071_v32 = vadd.f32 %v5070_v10, %v4453_v20  ;;  %v6971_v12 = vpop.f32.mrb[65].mxu0 }
 0x55b   :  { %v5073_v43 = vpop.f32.mrb[66].mxu0  ;;  %v10186_v12 = vld [vmem:[%s10245_s16] ss:$0 sm:$0xff] }
 0x55c   :  { %v5074_v18 = vadd.f32 %v5073_v43, %v4453_v20  ;;  %v6972_v33 = vpop.f32.mrb[67].mxu0  ;;  %6990 = vmatmul.mubr.msk.bf16.vlgmr.msra.gmra.mrb[100].mxu0 %vm183_vm0, %v5177_v54  ;;  %v5121_v56 = vmax.f32 %v5071_v32, 0.0 }
 0x55d   :  { %6993 = vmatprep.mubr.msk.bf16.mxu0 %vm7926_vm1, %v7925_v15 }
 0x55e   :  { %v5128_v36 = vmax.f32 %v5074_v18, 0.0 }
 0x560   :  { %v5184_v9 = vpack.c.bf16 %v5128_v36, %v5121_v56 }
 0x561   :  { %v5078_v38 = vpop.f32.mrb[68].mxu0 }
 0x562   :  { %v5079_v22 = vadd.f32 %v5078_v38, %v4453_v20  ;;  %v6975_v40 = vpop.f32.mrb[69].mxu0 }
 0x563   :  { %v5081_v50 = vpop.f32.mrb[70].mxu0 }
 0x564   :  { %v5082_v41 = vadd.f32 %v5081_v50, %v4453_v20  ;;  %v6976_v23 = vpop.f32.mrb[71].mxu0  ;;  %6994 = vmatmul.mubr.msk.bf16.gmra.mrb[104].mxu0 %vm183_vm0, %v5184_v9  ;;  %v5135_v34 = vmax.f32 %v5079_v22, 0.0 }
 0x565   :  { %6997 = vmatprep.mubr.msk.bf16.mxu0 %vm7926_vm1, %v7925_v15 }
 0x566   :  { %v5142_v45 = vmax.f32 %v5082_v41, 0.0 }
 0x568   :  { %v5191_v1 = vpack.c.bf16 %v5142_v45, %v5135_v34 }
 0x569   :  { %v5086_v59 = vpop.f32.mrb[72].mxu0 }
 0x56a   :  { %v5087_v24 = vadd.f32 %v5086_v59, %v4453_v20  ;;  %v6979_v58 = vpop.f32.mrb[73].mxu0 }
 0x56b   :  { %v5089_v0 = vpop.f32.mrb[74].mxu0 }
 0x56c   :  { %v5090_v42 = vadd.f32 %v5089_v0, %v4453_v20  ;;  %v6980_v6 = vpop.f32.mrb[75].mxu0  ;;  %6998 = vmatmul.mubr.msk.bf16.gmra.mrb[108].mxu0 %vm183_vm0, %v5191_v1  ;;  %v5149_v3 = vmax.f32 %v5087_v24, 0.0 }
 0x56d   :  { %7001 = vmatprep.mubr.msk.bf16.mxu0 %vm7926_vm1, %v7925_v15 }
 0x56e   :  { %v5156_v4 = vmax.f32 %v5090_v42, 0.0 }
 0x570   :  { %v5198_v5 = vpack.c.bf16 %v5156_v4, %v5149_v3 }
 0x571   :  { %v5094_v49 = vpop.f32.mrb[76].mxu0 }
 0x572   :  { %v5095_v37 = vadd.f32 %v5094_v49, %v4453_v20  ;;  %v6983_v7 = vpop.f32.mrb[77].mxu0 }
 0x573   :  { %v5097_v46 = vpop.f32.mrb[78].mxu0 }
 0x574   :  { %v5098_v8 = vadd.f32 %v5097_v46, %v4453_v20  ;;  %v6984_v53 = vpop.f32.mrb[79].mxu0  ;;  %7002 = vmatmul.mubr.msk.bf16.gmra.mrb[112].mxu0 %vm183_vm0, %v5198_v5  ;;  %v5163_v27 = vmax.f32 %v5095_v37, 0.0 }
 0x575   :  { %7005 = vmatprep.mubr.msk.bf16.mxu0 %vm7926_vm1, %v7925_v15 }
 0x576   :  { %v5170_v11 = vmax.f32 %v5098_v8, 0.0 }
 0x578   :  { %v5205_v13 = vpack.c.bf16 %v5170_v11, %v5163_v27 }
 0x57c   :  { %7006 = vmatmul.mubr.msk.bf16.gmra.mrb[116].mxu0 %vm183_vm0, %v5205_v13 }
 0x5df   :  { %v6784_v55 = vpop.f32.mrb[52].mxu1 }
 0x5e0   :  { %v6785_v60 = vpop.f32.mrb[53].mxu1 }
 0x5e1   :  { %v6786_v52 = vadd.f32 %v6785_v60, %v6784_v55  ;;  %v6787_v61 = vpop.f32.mrb[54].mxu1 }
 0x5e2   :  { %v6788_v62 = vpop.f32.mrb[55].mxu1 }
 0x5e3   :  { %v6789_v14 = vadd.f32 %v6788_v62, %v6787_v61  ;;  %v5663_v36 = vadd.f32 %v6786_v52, %v10186_v12 }
 0x5e5   :  { %v5666_v23 = vadd.f32 %v6789_v14, %v10186_v12 }
 0x5e7   :  { %v6790_v17 = vpop.f32.mrb[56].mxu1 }
 0x5e8   :  { %v6791_v51 = vpop.f32.mrb[57].mxu1 }
 0x5e9   :  { %v6792_v47 = vadd.f32 %v6791_v51, %v6790_v17  ;;  %v6793_v19 = vpop.f32.mrb[58].mxu1 }
 0x5ea   :  { %v6794_v2 = vpop.f32.mrb[59].mxu1 }
 0x5eb   :  { %v6795_v20 = vadd.f32 %v6794_v2, %v6793_v19  ;;  %v5671_v4 = vadd.f32 %v6792_v47, %v10186_v12 }
 0x5ed   :  { %v5674_v53 = vadd.f32 %v6795_v20, %v10186_v12 }
 0x5ef   :  { %v6796_v16 = vpop.f32.mrb[60].mxu1 }
 0x5f0   :  { %v6797_v21 = vpop.f32.mrb[61].mxu1 }
 0x5f1   :  { %v6798_v15 = vadd.f32 %v6797_v21, %v6796_v16  ;;  %v6799_v26 = vpop.f32.mrb[62].mxu1 }
 0x5f2   :  { %v6800_v25 = vpop.f32.mrb[63].mxu1 }
 0x5f3   :  { %v6801_v28 = vadd.f32 %v6800_v25, %v6799_v26  ;;  %v5679_v51 = vadd.f32 %v6798_v15, %v10186_v12 }
 0x5f5   :  { %v5682_v26 = vadd.f32 %v6801_v28, %v10186_v12 }
 0x5f7   :  { %v6802_v57 = vpop.f32.mrb[64].mxu1 }
 0x5f8   :  { %v6803_v29 = vpop.f32.mrb[65].mxu1 }
 0x5f9   :  { %v10175_v30 = vadd.f32 %v6803_v29, %v6802_v57  ;;  %v6805_v48 = vpop.f32.mrb[66].mxu1 }
 0x5fa   :  { %v6806_v44 = vpop.f32.mrb[67].mxu1 }
 0x5fb   :  { %v10177_v39 = vadd.f32 %v6806_v44, %v6805_v48  ;;  %v5687_v15 = vadd.f32 %v10175_v30, %v10186_v12 }
 0x5fd   :  { %v5690_v28 = vadd.f32 %v10177_v39, %v10186_v12 }
 0x5ff   :  { %v6808_v31 = vpop.f32.mrb[68].mxu1 }
 0x600   :  { %v6809_v35 = vpop.f32.mrb[69].mxu1 }
 0x601   :  { %v10179_v63 = vadd.f32 %v6809_v35, %v6808_v31  ;;  %v6811_v54 = vpop.f32.mrb[70].mxu1 }
 0x602   :  { %v6812_v10 = vpop.f32.mrb[71].mxu1 }
 0x603   :  { %v10181_v32 = vadd.f32 %v6812_v10, %v6811_v54  ;;  %v5695_v30 = vadd.f32 %v10179_v63, %v10186_v12 }
 0x605   :  { %v5698_v39 = vadd.f32 %v10181_v32, %v10186_v12 }
 0x607   :  { %v6830_v43 = vpop.f32.mrb[80].mxu0  ;;  %v6876_v18 = vpop.f32.mrb[72].mxu1 }
 0x608   :  { %v6831_v33 = vpop.f32.mrb[81].mxu0  ;;  %v6877_v56 = vpop.f32.mrb[73].mxu1 }
 0x609   :  { %v6832_v9 = vadd.f32 %v6831_v33, %v6830_v43  ;;  %v6878_v38 = vadd.f32 %v6877_v56, %v6876_v18  ;;  %v6833_v22 = vpop.f32.mrb[82].mxu0  ;;  %v6879_v40 = vpop.f32.mrb[74].mxu1 }
 0x60a   :  { %v6834_v50 = vpop.f32.mrb[83].mxu0  ;;  %v6880_v41 = vpop.f32.mrb[75].mxu1 }
 0x60b   :  { %v5736_v34 = vadd.f32 %v6832_v9, %v5663_v36  ;;  %v6835_v45 = vadd.f32 %v6834_v50, %v6833_v22  ;;  %v6881_v1 = vadd.f32 %v6880_v41, %v6879_v40 }
 0x60d   :  { %v5739_v59 = vadd.f32 %v6835_v45, %v5666_v23  ;;  %v10190_v24 = vadd.f32 %v6878_v38, %v5736_v34 }
 0x60f   :  { %v6836_v58 = vpop.f32.mrb[84].mxu0  ;;  %v6882_v0 = vpop.f32.mrb[76].mxu1  ;;  %v10192_v42 = vadd.f32 %v6881_v1, %v5739_v59 }
 0x610   :  { %v6837_v6 = vpop.f32.mrb[85].mxu0  ;;  %v6883_v3 = vpop.f32.mrb[77].mxu1 }
 0x611   :  { %v6838_v5 = vadd.f32 %v6837_v6, %v6836_v58  ;;  %v6884_v49 = vadd.f32 %v6883_v3, %v6882_v0  ;;  %v6839_v37 = vpop.f32.mrb[86].mxu0  ;;  %v6885_v7 = vpop.f32.mrb[78].mxu1 }
 0x612   :  { %v6840_v46 = vpop.f32.mrb[87].mxu0  ;;  %v6886_v8 = vpop.f32.mrb[79].mxu1 }
 0x613   :  { %v5744_v27 = vadd.f32 %v6838_v5, %v5671_v4  ;;  %v6841_v11 = vadd.f32 %v6840_v46, %v6839_v37  ;;  %v6887_v13 = vadd.f32 %v6886_v8, %v6885_v7 }
 0x615   :  { %v5747_v55 = vadd.f32 %v6841_v11, %v5674_v53  ;;  %v10196_v60 = vadd.f32 %v6884_v49, %v5744_v27 }
 0x617   :  { %v6842_v52 = vpop.f32.mrb[88].mxu0  ;;  %v6888_v61 = vpop.f32.mrb[80].mxu1  ;;  %v10198_v62 = vadd.f32 %v6887_v13, %v5747_v55 }
 0x618   :  { %v6843_v14 = vpop.f32.mrb[89].mxu0  ;;  %v6889_v17 = vpop.f32.mrb[81].mxu1 }
 0x619   :  { %v6844_v47 = vadd.f32 %v6843_v14, %v6842_v52  ;;  %v6890_v19 = vadd.f32 %v6889_v17, %v6888_v61  ;;  %v6845_v2 = vpop.f32.mrb[90].mxu0  ;;  %v6891_v16 = vpop.f32.mrb[82].mxu1 }
 0x61a   :  { %v6846_v21 = vpop.f32.mrb[91].mxu0  ;;  %v6892_v20 = vpop.f32.mrb[83].mxu1 }
 0x61b   :  { %v5752_v25 = vadd.f32 %v6844_v47, %v5679_v51  ;;  %v6847_v57 = vadd.f32 %v6846_v21, %v6845_v2  ;;  %v6893_v29 = vadd.f32 %v6892_v20, %v6891_v16 }
 0x61d   :  { %v5755_v48 = vadd.f32 %v6847_v57, %v5682_v26  ;;  %v5825_v44 = vadd.f32 %v6890_v19, %v5752_v25 }
 0x61f   :  { %v6848_v31 = vpop.f32.mrb[92].mxu0  ;;  %v6894_v35 = vpop.f32.mrb[84].mxu1  ;;  %v5828_v54 = vadd.f32 %v6893_v29, %v5755_v48 }
 0x620   :  { %v6849_v10 = vpop.f32.mrb[93].mxu0  ;;  %v6895_v43 = vpop.f32.mrb[85].mxu1 }
 0x621   :  { %v6850_v18 = vadd.f32 %v6849_v10, %v6848_v31  ;;  %v6896_v33 = vadd.f32 %v6895_v43, %v6894_v35  ;;  %v6851_v56 = vpop.f32.mrb[94].mxu0  ;;  %v6897_v36 = vpop.f32.mrb[86].mxu1 }
 0x622   :  { %v6852_v9 = vpop.f32.mrb[95].mxu0  ;;  %v6898_v38 = vpop.f32.mrb[87].mxu1 }
 0x623   :  { %v5760_v22 = vadd.f32 %v6850_v18, %v5687_v15  ;;  %v6853_v40 = vadd.f32 %v6852_v9, %v6851_v56  ;;  %v6899_v50 = vadd.f32 %v6898_v38, %v6897_v36 }
 0x625   :  { %v5763_v41 = vadd.f32 %v6853_v40, %v5690_v28  ;;  %v5833_v23 = vadd.f32 %v6896_v33, %v5760_v22 }
 0x627   :  { %v6854_v34 = vpop.f32.mrb[96].mxu0  ;;  %v6900_v45 = vpop.f32.mrb[88].mxu1  ;;  %v5836_v1 = vadd.f32 %v6899_v50, %v5763_v41 }
 0x628   :  { %v6855_v59 = vpop.f32.mrb[97].mxu0  ;;  %v6901_v58 = vpop.f32.mrb[89].mxu1 }
 0x629   :  { %v6856_v0 = vadd.f32 %v6855_v59, %v6854_v34  ;;  %v6902_v6 = vadd.f32 %v6901_v58, %v6900_v45  ;;  %v6857_v3 = vpop.f32.mrb[98].mxu0  ;;  %v6903_v4 = vpop.f32.mrb[90].mxu1 }
 0x62a   :  { %v6858_v5 = vpop.f32.mrb[99].mxu0  ;;  %v6904_v49 = vpop.f32.mrb[91].mxu1 }
 0x62b   :  { %v5768_v37 = vadd.f32 %v6856_v0, %v5695_v30  ;;  %v6859_v7 = vadd.f32 %v6858_v5, %v6857_v3  ;;  %v6905_v46 = vadd.f32 %v6904_v49, %v6903_v4 }
 0x62d   :  { %v5771_v8 = vadd.f32 %v6859_v7, %v5698_v39  ;;  %v5841_v53 = vadd.f32 %v6902_v6, %v5768_v37 }
 0x62f   :  { %v5881_v27 = vpop.f32.mrb[100].mxu0  ;;  %v5844_v11 = vadd.f32 %v6905_v46, %v5771_v8 }
 0x630   :  { %v5882_v13 = vadd.f32 %v5881_v27, %v10190_v24  ;;  %v6991_v55 = vpop.f32.mrb[101].mxu0 }
 0x631   :  { %v5884_v63 = vpop.f32.mrb[102].mxu0 }
 0x632   :  { %v5885_v52 = vadd.f32 %v5884_v63, %v10192_v42  ;;  %v6992_v61 = vpop.f32.mrb[103].mxu0 }
 0x634   :  { %v6640_v14 = vpack.c.bf16 %v5885_v52, %v5882_v13 }
 0x636   :  { %6641 = vst [vmem:[%s10246_s17] sm:$0xff] %v6640_v14  }
 0x637   :  { %v5889_v32 = vpop.f32.mrb[104].mxu0 }
 0x638   :  { %v5890_v12 = vadd.f32 %v5889_v32, %v10196_v60  ;;  %v6995_v17 = vpop.f32.mrb[105].mxu0 }
 0x639   :  { %v5892_v51 = vpop.f32.mrb[106].mxu0 }
 0x63a   :  { %v5893_v47 = vadd.f32 %v5892_v51, %v10198_v62  ;;  %v6996_v19 = vpop.f32.mrb[107].mxu0 }
 0x63c   :  { %v6645_v2 = vpack.c.bf16 %v5893_v47, %v5890_v12 }
 0x63e   :  { %6670 = vst [vmem:[%s10246_s17 + $0x8] sm:$0xff] %v6645_v2  }
 0x63f   :  { %v5897_v24 = vpop.f32.mrb[108].mxu0 }
 0x640   :  { %v5898_v42 = vadd.f32 %v5897_v24, %v5825_v44  ;;  %v6999_v16 = vpop.f32.mrb[109].mxu0 }
 0x641   :  { %v5900_v21 = vpop.f32.mrb[110].mxu0 }
 0x642   :  { %v5901_v20 = vadd.f32 %v5900_v21, %v5828_v54  ;;  %v7000_v26 = vpop.f32.mrb[111].mxu0 }
 0x644   :  { %v6650_v25 = vpack.c.bf16 %v5901_v20, %v5898_v42 }
 0x646   :  { %6671 = vst [vmem:[%s10246_s17 + $0x10] sm:$0xff] %v6650_v25  }
 0x647   :  { %v5905_v60 = vpop.f32.mrb[112].mxu0 }
 0x648   :  { %v5906_v57 = vadd.f32 %v5905_v60, %v5833_v23  ;;  %v7003_v62 = vpop.f32.mrb[113].mxu0 }
 0x649   :  { %v5908_v29 = vpop.f32.mrb[114].mxu0 }
 0x64a   :  { %v5909_v48 = vadd.f32 %v5908_v29, %v5836_v1  ;;  %v7004_v31 = vpop.f32.mrb[115].mxu0 }
 0x64c   :  { %v6655_v35 = vpack.c.bf16 %v5909_v48, %v5906_v57 }
 0x64e   :  { %6672 = vst [vmem:[%s10246_s17 + $0x18] sm:$0xff] %v6655_v35  }
 0x64f   :  { %v5913_v44 = vpop.f32.mrb[116].mxu0 }
 0x650   :  { %v5914_v10 = vadd.f32 %v5913_v44, %v5841_v53  ;;  %v7007_v54 = vpop.f32.mrb[117].mxu0 }
 0x651   :  { %v5916_v43 = vpop.f32.mrb[118].mxu0 }
 0x652   :  { %v5917_v15 = vadd.f32 %v5916_v43, %v5844_v11  ;;  %v7008_v18 = vpop.f32.mrb[119].mxu0 }
 0x654   :  { %v6660_v33 = vpack.c.bf16 %v5917_v15, %v5914_v10 }
 0x656   :  { %6673 = vst [vmem:[%s10246_s17 + $0x20] sm:$0xff] %v6660_v33  }

</bundles_post_ra>
